<compile_context>
chip_gen: v6e
topology: v6e:2x2x1
jax: 0.10.0
libtpu: 0.0.40
codegen_flags: <defaults>
</compile_context>

<pallas_src>
import numpy as np

import jax
import jax.numpy as jnp
from jax.experimental import pallas as pl
from jax.experimental.pallas import tpu as pltpu

NC = 3          # input channels (fixed in the reference script)
NDF = 8         # small ndf for this synthetic run
IMG = 64        # DCGAN discriminator geometry (4x4/s2/p1 x4 then 4x4/s1/p0)
LRELU_SLOPE = 0.2
BN_EPS = 1e-5

_VMEM = pl.BlockSpec(memory_space=pltpu.MemorySpace.VMEM)


# ----------------------------------------------------------------------------
# The fused kernel: all 5 conv layers + 3 batch-norms + activations + sigmoid
# ----------------------------------------------------------------------------
def _disc_kernel(x_ref,
                 s1_ref, b1_ref,
                 s2_ref, b2_ref, p2_ref, g2_ref, be2_ref,
                 s3_ref, b3_ref, p3_ref, g3_ref, be3_ref,
                 s4_ref, b4_ref, p4_ref, g4_ref, be4_ref,
                 s5_ref, b5_ref,
                 o_ref):
    """Activations are 2-D (N*H, W*C) bf16 values; accumulation in f32."""

    def conv(x, s_ref, b_ref):
        # sum over the kh taps of  (row-select) @ (folded kw+channel weights)
        acc = None
        for di in range(s_ref.shape[0]):
            rows = jnp.dot(s_ref[di], x, preferred_element_type=jnp.float32)
            rows = rows.astype(jnp.bfloat16)       # exact: S is one-hot 0/1
            part = jnp.dot(rows, b_ref[di], preferred_element_type=jnp.float32)
            acc = part if acc is None else acc + part
        return acc                                  # (N*Ho, Wo*Co) f32

    def lrelu(y):
        return jnp.maximum(y, LRELU_SLOPE * y)      # valid since 0 < slope < 1

    def bn_lrelu(acc, p_ref, g_ref, be_ref):
        # One-pass, per-channel batch stats.  P folds "average over the Wo
        # column groups of one channel" and re-broadcasts, so everything stays
        # a lane-dense (1, Wo*C) row vector.
        m_rows = acc.shape[0]                       # = N * Ho
        inv_m = 1.0 / m_rows
        s_x = jnp.sum(acc, axis=0, keepdims=True) * inv_m
        s_xx = jnp.sum(acc * acc, axis=0, keepdims=True) * inv_m
        mean = jnp.dot(s_x, p_ref[...], preferred_element_type=jnp.float32)
        ex2 = jnp.dot(s_xx, p_ref[...], preferred_element_type=jnp.float32)
        var = ex2 - mean * mean                     # biased variance (training)
        scale = g_ref[...] * jax.lax.rsqrt(var + BN_EPS)
        shift = be_ref[...] - mean * scale
        return lrelu(acc * scale + shift)

    x0 = x_ref[...]                                                   # (128,192)
    x1 = lrelu(conv(x0, s1_ref, b1_ref)).astype(jnp.bfloat16)         # (64, 256)
    x2 = bn_lrelu(conv(x1, s2_ref, b2_ref),
                  p2_ref, g2_ref, be2_ref).astype(jnp.bfloat16)       # (32, 256)
    x3 = bn_lrelu(conv(x2, s3_ref, b3_ref),
                  p3_ref, g3_ref, be3_ref).astype(jnp.bfloat16)       # (16, 256)
    x4 = bn_lrelu(conv(x3, s4_ref, b4_ref),
                  p4_ref, g4_ref, be4_ref).astype(jnp.bfloat16)       # (8,  256)
    logits = conv(x4, s5_ref, b5_ref)                                 # (N, 1)
    o_ref[...] = 1.0 / (1.0 + jnp.exp(-logits))                       # sigmoid


# ----------------------------------------------------------------------------
# One-time weight preprocessing (pure constants + tiny einsums on the weights)
# ----------------------------------------------------------------------------
def _h_select(n, hi, ho, stride, pad, k):
    """S[di, (b,ho), (b,hi)] = 1 iff hi == stride*ho + di - pad (else 0-pad)."""
    s = np.zeros((k, n * ho, n * hi), np.float32)
    for di in range(k):
        for b in range(n):
            for o in range(ho):
                i = stride * o + di - pad
                if 0 <= i < hi:
                    s[di, b * ho + o, b * hi + i] = 1.0
    return jnp.asarray(s, jnp.bfloat16)


def _w_fold(w_oihw, wi, wo, stride, pad):
    """Fold the kw taps + W zero padding into B[di] of shape (wi*Ci, wo*Co)."""
    co, ci, k, _ = w_oihw.shape
    sel = np.zeros((k, wi, wo), np.float32)
    for dj in range(k):
        for o in range(wo):
            i = stride * o + dj - pad
            if 0 <= i < wi:
                sel[dj, i, o] = 1.0
    # B[di, (wi,ci), (wo,co)] = sum_dj sel[dj,wi,wo] * W[co,ci,di,dj]
    b = jnp.einsum("jxw,uvdj->dxvwu", jnp.asarray(sel), w_oihw.astype(jnp.float32))
    return b.reshape(k, wi * ci, wo * co).astype(jnp.bfloat16)


def _bn_fold(wo, c):
    """(Wo*C, Wo*C) projector: average the Wo column groups of each channel."""
    return jnp.asarray(np.kron(np.ones((wo, wo), np.float32) / wo,
                               np.eye(c, dtype=np.float32)))


def prepare_kernel_params(params, batch):
    """Turn PyTorch-layout weights into kernel-ready matmul operands (done once)."""
    kp = {}
    geo = [
        ("1", params["w1"], 64, 32, 2, 1, None, None),
        ("2", params["w2"], 32, 16, 2, 1, params["g2"], params["b2"]),
        ("3", params["w3"], 16, 8, 2, 1, params["g3"], params["b3"]),
        ("4", params["w4"], 8, 4, 2, 1, params["g4"], params["b4"]),
        ("5", params["w5"], 4, 1, 1, 0, None, None),
    ]
    for name, w, hi, ho, stride, pad, g, b in geo:
        co, ci, k, _ = w.shape
        kp["s" + name] = _h_select(batch, hi, ho, stride, pad, k)
        kp["b" + name] = _w_fold(w, hi, ho, stride, pad)   # square maps: Wi=Hi
        if g is not None:
            kp["p" + name] = _bn_fold(ho, co)
            kp["g" + name] = jnp.tile(g.astype(jnp.float32), ho).reshape(1, ho * co)
            kp["be" + name] = jnp.tile(b.astype(jnp.float32), ho).reshape(1, ho * co)
    return kp


# ----------------------------------------------------------------------------
# Forward pass (one pallas_call)
# ----------------------------------------------------------------------------
@jax.jit
def discriminator_forward(x_nchw, kp):
    n, c, h, w = x_nchw.shape
    # NCHW -> (N*H, W*C) lane-dense slab; the only XLA glue on the data path.
    x2d = jnp.transpose(x_nchw, (0, 2, 3, 1)).reshape(n * h, w * c).astype(jnp.bfloat16)
    args = (x2d,
            kp["s1"], kp["b1"],
            kp["s2"], kp["b2"], kp["p2"], kp["g2"], kp["be2"],
            kp["s3"], kp["b3"], kp["p3"], kp["g3"], kp["be3"],
            kp["s4"], kp["b4"], kp["p4"], kp["g4"], kp["be4"],
            kp["s5"], kp["b5"])
    out = pl.pallas_call(
        _disc_kernel,
        out_shape=jax.ShapeDtypeStruct((n, 1), jnp.float32),
        in_specs=[_VMEM] * len(args),
        out_specs=_VMEM,
    )(*args)
    return out.reshape(n)          # .view(-1, 1).squeeze(1)


# ----------------------------------------------------------------------------
# Parameters + pure-XLA reference (for correctness check only)
# ----------------------------------------------------------------------------
def init_params(key, nc=NC, ndf=NDF):
    ks = jax.random.split(key, 8)
    return {
        "w1": jax.random.normal(ks[0], (ndf, nc, 4, 4), jnp.float32) * 0.02,
        "w2": jax.random.normal(ks[1], (ndf * 2, ndf, 4, 4), jnp.float32) * 0.02,
        "w3": jax.random.normal(ks[2], (ndf * 4, ndf * 2, 4, 4), jnp.float32) * 0.02,
        "w4": jax.random.normal(ks[3], (ndf * 8, ndf * 4, 4, 4), jnp.float32) * 0.02,
        "w5": jax.random.normal(ks[4], (1, ndf * 8, 4, 4), jnp.float32) * 0.02,
        "g2": 1.0 + jax.random.normal(ks[5], (ndf * 2,), jnp.float32) * 0.02,
        "b2": jnp.zeros((ndf * 2,), jnp.float32),
        "g3": 1.0 + jax.random.normal(ks[6], (ndf * 4,), jnp.float32) * 0.02,
        "b3": jnp.zeros((ndf * 4,), jnp.float32),
        "g4": 1.0 + jax.random.normal(ks[7], (ndf * 8,), jnp.float32) * 0.02,
        "b4": jnp.zeros((ndf * 8,), jnp.float32),
    }


@jax.jit
def reference_forward(x, p):
    def conv(x, w, s, pad):
        return jax.lax.conv_general_dilated(
            x, w, (s, s), [(pad, pad), (pad, pad)],
            dimension_numbers=("NCHW", "OIHW", "NCHW"))

    def bn(x, g, b):
        m = jnp.mean(x, axis=(0, 2, 3), keepdims=True)
        v = jnp.mean((x - m) ** 2, axis=(0, 2, 3), keepdims=True)
        return (x - m) * jax.lax.rsqrt(v + BN_EPS) * g.reshape(1, -1, 1, 1) \
            + b.reshape(1, -1, 1, 1)

    def lrelu(x):
        return jnp.where(x >= 0, x, LRELU_SLOPE * x)

    h = lrelu(conv(x, p["w1"], 2, 1))
    h = lrelu(bn(conv(h, p["w2"], 2, 1), p["g2"], p["b2"]))
    h = lrelu(bn(conv(h, p["w3"], 2, 1), p["g3"], p["b3"]))
    h = lrelu(bn(conv(h, p["w4"], 2, 1), p["g4"], p["b4"]))
    h = conv(h, p["w5"], 1, 0)
    return jax.nn.sigmoid(h).reshape(-1)


if __name__ == "__main__":
    key = jax.random.PRNGKey(0)
    k_in, k_par = jax.random.split(key)

    batch = 2
    x = jax.random.normal(k_in, (batch, NC, IMG, IMG), jnp.float32)
    params = init_params(k_par)
    kparams = prepare_kernel_params(params, batch)

    out = jax.block_until_ready(discriminator_forward(x, kparams))
    assert out.shape == (batch,), out.shape
    assert bool(jnp.all((out > 0.0) & (out < 1.0))), "sigmoid output out of range"

    # Correctness vs. an XLA f32 reference (bf16 MXU operands => ~1e-2 tolerance).
    ref = jax.block_until_ready(reference_forward(x, params))
    err = float(jnp.max(jnp.abs(out - ref)))
    assert err < 3e-2, f"mismatch vs reference: max|diff|={err}"

    print("KERNEL_OK")
</pallas_src>

<mosaic_0001>
module attributes {stable_mosaic.version = 11 : i64} {
  func.func @_disc_kernel(%arg0: memref<128x192xbf16, #tpu.memory_space<vmem>>, %arg1: memref<4x64x128xbf16, #tpu.memory_space<vmem>>, %arg2: memref<4x192x256xbf16, #tpu.memory_space<vmem>>, %arg3: memref<4x32x64xbf16, #tpu.memory_space<vmem>>, %arg4: memref<4x256x256xbf16, #tpu.memory_space<vmem>>, %arg5: memref<256x256xf32, #tpu.memory_space<vmem>>, %arg6: memref<1x256xf32, #tpu.memory_space<vmem>>, %arg7: memref<1x256xf32, #tpu.memory_space<vmem>>, %arg8: memref<4x16x32xbf16, #tpu.memory_space<vmem>>, %arg9: memref<4x256x256xbf16, #tpu.memory_space<vmem>>, %arg10: memref<256x256xf32, #tpu.memory_space<vmem>>, %arg11: memref<1x256xf32, #tpu.memory_space<vmem>>, %arg12: memref<1x256xf32, #tpu.memory_space<vmem>>, %arg13: memref<4x8x16xbf16, #tpu.memory_space<vmem>>, %arg14: memref<4x256x256xbf16, #tpu.memory_space<vmem>>, %arg15: memref<256x256xf32, #tpu.memory_space<vmem>>, %arg16: memref<1x256xf32, #tpu.memory_space<vmem>>, %arg17: memref<1x256xf32, #tpu.memory_space<vmem>>, %arg18: memref<4x2x8xbf16, #tpu.memory_space<vmem>>, %arg19: memref<4x256x1xbf16, #tpu.memory_space<vmem>>, %arg20: memref<2x1xf32, #tpu.memory_space<vmem>>) attributes {dimension_semantics = [], scalar_prefetch = 0 : i64, scratch_operands = 0 : i64, tpu.core_type = #tpu.core_type<tc>} {
    %c0 = arith.constant 0 : index
    %c0_0 = arith.constant 0 : index
    %0 = vector.load %arg0[%c0, %c0_0] : memref<128x192xbf16, #tpu.memory_space<vmem>>, vector<128x192xbf16>
    %c0_1 = arith.constant 0 : index
    %c0_2 = arith.constant 0 : index
    %c0_3 = arith.constant 0 : index
    %1 = vector.load %arg1[%c0_1, %c0_2, %c0_3] : memref<4x64x128xbf16, #tpu.memory_space<vmem>>, vector<1x64x128xbf16>
    %2 = vector.shape_cast %1 : vector<1x64x128xbf16> to vector<64x128xbf16>
    %cst = arith.constant dense<0.000000e+00> : vector<64x192xf32>
    %3 = tpu.matmul %2, %0, %cst {dimension_numbers = #tpu.dot_dimension_numbers<[1], [0], [0], [1], [0, 0, 1, 1], [], []>} : vector<64x128xbf16>, vector<128x192xbf16>, vector<64x192xf32> -> vector<64x192xf32>
    %4 = arith.truncf %3 : vector<64x192xf32> to vector<64x192xbf16>
    %c0_4 = arith.constant 0 : index
    %c0_5 = arith.constant 0 : index
    %c0_6 = arith.constant 0 : index
    %5 = vector.load %arg2[%c0_4, %c0_5, %c0_6] : memref<4x192x256xbf16, #tpu.memory_space<vmem>>, vector<1x192x256xbf16>
    %6 = vector.shape_cast %5 : vector<1x192x256xbf16> to vector<192x256xbf16>
    %cst_7 = arith.constant dense<0.000000e+00> : vector<64x256xf32>
    %7 = tpu.matmul %4, %6, %cst_7 {dimension_numbers = #tpu.dot_dimension_numbers<[1], [0], [0], [1], [0, 0, 1, 1], [], []>} : vector<64x192xbf16>, vector<192x256xbf16>, vector<64x256xf32> -> vector<64x256xf32>
    %c1 = arith.constant 1 : index
    %c0_8 = arith.constant 0 : index
    %c0_9 = arith.constant 0 : index
    %8 = vector.load %arg1[%c1, %c0_8, %c0_9] : memref<4x64x128xbf16, #tpu.memory_space<vmem>>, vector<1x64x128xbf16>
    %9 = vector.shape_cast %8 : vector<1x64x128xbf16> to vector<64x128xbf16>
    %cst_10 = arith.constant dense<0.000000e+00> : vector<64x192xf32>
    %10 = tpu.matmul %9, %0, %cst_10 {dimension_numbers = #tpu.dot_dimension_numbers<[1], [0], [0], [1], [0, 0, 1, 1], [], []>} : vector<64x128xbf16>, vector<128x192xbf16>, vector<64x192xf32> -> vector<64x192xf32>
    %11 = arith.truncf %10 : vector<64x192xf32> to vector<64x192xbf16>
    %c1_11 = arith.constant 1 : index
    %c0_12 = arith.constant 0 : index
    %c0_13 = arith.constant 0 : index
    %12 = vector.load %arg2[%c1_11, %c0_12, %c0_13] : memref<4x192x256xbf16, #tpu.memory_space<vmem>>, vector<1x192x256xbf16>
    %13 = vector.shape_cast %12 : vector<1x192x256xbf16> to vector<192x256xbf16>
    %cst_14 = arith.constant dense<0.000000e+00> : vector<64x256xf32>
    %14 = tpu.matmul %11, %13, %cst_14 {dimension_numbers = #tpu.dot_dimension_numbers<[1], [0], [0], [1], [0, 0, 1, 1], [], []>} : vector<64x192xbf16>, vector<192x256xbf16>, vector<64x256xf32> -> vector<64x256xf32>
    %15 = arith.addf %7, %14 : vector<64x256xf32>
    %c2 = arith.constant 2 : index
    %c0_15 = arith.constant 0 : index
    %c0_16 = arith.constant 0 : index
    %16 = vector.load %arg1[%c2, %c0_15, %c0_16] : memref<4x64x128xbf16, #tpu.memory_space<vmem>>, vector<1x64x128xbf16>
    %17 = vector.shape_cast %16 : vector<1x64x128xbf16> to vector<64x128xbf16>
    %cst_17 = arith.constant dense<0.000000e+00> : vector<64x192xf32>
    %18 = tpu.matmul %17, %0, %cst_17 {dimension_numbers = #tpu.dot_dimension_numbers<[1], [0], [0], [1], [0, 0, 1, 1], [], []>} : vector<64x128xbf16>, vector<128x192xbf16>, vector<64x192xf32> -> vector<64x192xf32>
    %19 = arith.truncf %18 : vector<64x192xf32> to vector<64x192xbf16>
    %c2_18 = arith.constant 2 : index
    %c0_19 = arith.constant 0 : index
    %c0_20 = arith.constant 0 : index
    %20 = vector.load %arg2[%c2_18, %c0_19, %c0_20] : memref<4x192x256xbf16, #tpu.memory_space<vmem>>, vector<1x192x256xbf16>
    %21 = vector.shape_cast %20 : vector<1x192x256xbf16> to vector<192x256xbf16>
    %cst_21 = arith.constant dense<0.000000e+00> : vector<64x256xf32>
    %22 = tpu.matmul %19, %21, %cst_21 {dimension_numbers = #tpu.dot_dimension_numbers<[1], [0], [0], [1], [0, 0, 1, 1], [], []>} : vector<64x192xbf16>, vector<192x256xbf16>, vector<64x256xf32> -> vector<64x256xf32>
    %23 = arith.addf %15, %22 : vector<64x256xf32>
    %c3 = arith.constant 3 : index
    %c0_22 = arith.constant 0 : index
    %c0_23 = arith.constant 0 : index
    %24 = vector.load %arg1[%c3, %c0_22, %c0_23] : memref<4x64x128xbf16, #tpu.memory_space<vmem>>, vector<1x64x128xbf16>
    %25 = vector.shape_cast %24 : vector<1x64x128xbf16> to vector<64x128xbf16>
    %cst_24 = arith.constant dense<0.000000e+00> : vector<64x192xf32>
    %26 = tpu.matmul %25, %0, %cst_24 {dimension_numbers = #tpu.dot_dimension_numbers<[1], [0], [0], [1], [0, 0, 1, 1], [], []>} : vector<64x128xbf16>, vector<128x192xbf16>, vector<64x192xf32> -> vector<64x192xf32>
    %27 = arith.truncf %26 : vector<64x192xf32> to vector<64x192xbf16>
    %c3_25 = arith.constant 3 : index
    %c0_26 = arith.constant 0 : index
    %c0_27 = arith.constant 0 : index
    %28 = vector.load %arg2[%c3_25, %c0_26, %c0_27] : memref<4x192x256xbf16, #tpu.memory_space<vmem>>, vector<1x192x256xbf16>
    %29 = vector.shape_cast %28 : vector<1x192x256xbf16> to vector<192x256xbf16>
    %cst_28 = arith.constant dense<0.000000e+00> : vector<64x256xf32>
    %30 = tpu.matmul %27, %29, %cst_28 {dimension_numbers = #tpu.dot_dimension_numbers<[1], [0], [0], [1], [0, 0, 1, 1], [], []>} : vector<64x192xbf16>, vector<192x256xbf16>, vector<64x256xf32> -> vector<64x256xf32>
    %31 = arith.addf %23, %30 : vector<64x256xf32>
    %cst_29 = arith.constant 2.000000e-01 : f32
    %32 = vector.broadcast %cst_29 : f32 to vector<64x256xf32>
    %33 = arith.mulf %32, %31 : vector<64x256xf32>
    %34 = arith.maximumf %31, %33 : vector<64x256xf32>
    %35 = arith.truncf %34 : vector<64x256xf32> to vector<64x256xbf16>
    %c0_30 = arith.constant 0 : index
    %c0_31 = arith.constant 0 : index
    %c0_32 = arith.constant 0 : index
    %36 = vector.load %arg3[%c0_30, %c0_31, %c0_32] : memref<4x32x64xbf16, #tpu.memory_space<vmem>>, vector<1x32x64xbf16>
    %37 = vector.shape_cast %36 : vector<1x32x64xbf16> to vector<32x64xbf16>
    %cst_33 = arith.constant dense<0.000000e+00> : vector<32x256xf32>
    %38 = tpu.matmul %37, %35, %cst_33 {dimension_numbers = #tpu.dot_dimension_numbers<[1], [0], [0], [1], [0, 0, 1, 1], [], []>} : vector<32x64xbf16>, vector<64x256xbf16>, vector<32x256xf32> -> vector<32x256xf32>
    %39 = arith.truncf %38 : vector<32x256xf32> to vector<32x256xbf16>
    %c0_34 = arith.constant 0 : index
    %c0_35 = arith.constant 0 : index
    %c0_36 = arith.constant 0 : index
    %40 = vector.load %arg4[%c0_34, %c0_35, %c0_36] : memref<4x256x256xbf16, #tpu.memory_space<vmem>>, vector<1x256x256xbf16>
    %41 = vector.shape_cast %40 : vector<1x256x256xbf16> to vector<256x256xbf16>
    %cst_37 = arith.constant dense<0.000000e+00> : vector<32x256xf32>
    %42 = tpu.matmul %39, %41, %cst_37 {dimension_numbers = #tpu.dot_dimension_numbers<[1], [0], [0], [1], [0, 0, 1, 1], [], []>} : vector<32x256xbf16>, vector<256x256xbf16>, vector<32x256xf32> -> vector<32x256xf32>
    %c1_38 = arith.constant 1 : index
    %c0_39 = arith.constant 0 : index
    %c0_40 = arith.constant 0 : index
    %43 = vector.load %arg3[%c1_38, %c0_39, %c0_40] : memref<4x32x64xbf16, #tpu.memory_space<vmem>>, vector<1x32x64xbf16>
    %44 = vector.shape_cast %43 : vector<1x32x64xbf16> to vector<32x64xbf16>
    %cst_41 = arith.constant dense<0.000000e+00> : vector<32x256xf32>
    %45 = tpu.matmul %44, %35, %cst_41 {dimension_numbers = #tpu.dot_dimension_numbers<[1], [0], [0], [1], [0, 0, 1, 1], [], []>} : vector<32x64xbf16>, vector<64x256xbf16>, vector<32x256xf32> -> vector<32x256xf32>
    %46 = arith.truncf %45 : vector<32x256xf32> to vector<32x256xbf16>
    %c1_42 = arith.constant 1 : index
    %c0_43 = arith.constant 0 : index
    %c0_44 = arith.constant 0 : index
    %47 = vector.load %arg4[%c1_42, %c0_43, %c0_44] : memref<4x256x256xbf16, #tpu.memory_space<vmem>>, vector<1x256x256xbf16>
    %48 = vector.shape_cast %47 : vector<1x256x256xbf16> to vector<256x256xbf16>
    %cst_45 = arith.constant dense<0.000000e+00> : vector<32x256xf32>
    %49 = tpu.matmul %46, %48, %cst_45 {dimension_numbers = #tpu.dot_dimension_numbers<[1], [0], [0], [1], [0, 0, 1, 1], [], []>} : vector<32x256xbf16>, vector<256x256xbf16>, vector<32x256xf32> -> vector<32x256xf32>
    %50 = arith.addf %42, %49 : vector<32x256xf32>
    %c2_46 = arith.constant 2 : index
    %c0_47 = arith.constant 0 : index
    %c0_48 = arith.constant 0 : index
    %51 = vector.load %arg3[%c2_46, %c0_47, %c0_48] : memref<4x32x64xbf16, #tpu.memory_space<vmem>>, vector<1x32x64xbf16>
    %52 = vector.shape_cast %51 : vector<1x32x64xbf16> to vector<32x64xbf16>
    %cst_49 = arith.constant dense<0.000000e+00> : vector<32x256xf32>
    %53 = tpu.matmul %52, %35, %cst_49 {dimension_numbers = #tpu.dot_dimension_numbers<[1], [0], [0], [1], [0, 0, 1, 1], [], []>} : vector<32x64xbf16>, vector<64x256xbf16>, vector<32x256xf32> -> vector<32x256xf32>
    %54 = arith.truncf %53 : vector<32x256xf32> to vector<32x256xbf16>
    %c2_50 = arith.constant 2 : index
    %c0_51 = arith.constant 0 : index
    %c0_52 = arith.constant 0 : index
    %55 = vector.load %arg4[%c2_50, %c0_51, %c0_52] : memref<4x256x256xbf16, #tpu.memory_space<vmem>>, vector<1x256x256xbf16>
    %56 = vector.shape_cast %55 : vector<1x256x256xbf16> to vector<256x256xbf16>
    %cst_53 = arith.constant dense<0.000000e+00> : vector<32x256xf32>
    %57 = tpu.matmul %54, %56, %cst_53 {dimension_numbers = #tpu.dot_dimension_numbers<[1], [0], [0], [1], [0, 0, 1, 1], [], []>} : vector<32x256xbf16>, vector<256x256xbf16>, vector<32x256xf32> -> vector<32x256xf32>
    %58 = arith.addf %50, %57 : vector<32x256xf32>
    %c3_54 = arith.constant 3 : index
    %c0_55 = arith.constant 0 : index
    %c0_56 = arith.constant 0 : index
    %59 = vector.load %arg3[%c3_54, %c0_55, %c0_56] : memref<4x32x64xbf16, #tpu.memory_space<vmem>>, vector<1x32x64xbf16>
    %60 = vector.shape_cast %59 : vector<1x32x64xbf16> to vector<32x64xbf16>
    %cst_57 = arith.constant dense<0.000000e+00> : vector<32x256xf32>
    %61 = tpu.matmul %60, %35, %cst_57 {dimension_numbers = #tpu.dot_dimension_numbers<[1], [0], [0], [1], [0, 0, 1, 1], [], []>} : vector<32x64xbf16>, vector<64x256xbf16>, vector<32x256xf32> -> vector<32x256xf32>
    %62 = arith.truncf %61 : vector<32x256xf32> to vector<32x256xbf16>
    %c3_58 = arith.constant 3 : index
    %c0_59 = arith.constant 0 : index
    %c0_60 = arith.constant 0 : index
    %63 = vector.load %arg4[%c3_58, %c0_59, %c0_60] : memref<4x256x256xbf16, #tpu.memory_space<vmem>>, vector<1x256x256xbf16>
    %64 = vector.shape_cast %63 : vector<1x256x256xbf16> to vector<256x256xbf16>
    %cst_61 = arith.constant dense<0.000000e+00> : vector<32x256xf32>
    %65 = tpu.matmul %62, %64, %cst_61 {dimension_numbers = #tpu.dot_dimension_numbers<[1], [0], [0], [1], [0, 0, 1, 1], [], []>} : vector<32x256xbf16>, vector<256x256xbf16>, vector<32x256xf32> -> vector<32x256xf32>
    %66 = arith.addf %58, %65 : vector<32x256xf32>
    %cst_62 = arith.constant dense<0.000000e+00> : vector<256xf32>
    %67 = vector.multi_reduction <add>, %66, %cst_62 [0] : vector<32x256xf32> to vector<256xf32>
    %68 = vector.shape_cast %67 : vector<256xf32> to vector<1x256xf32>
    %cst_63 = arith.constant 3.125000e-02 : f32
    %69 = vector.broadcast %cst_63 : f32 to vector<1x256xf32>
    %70 = arith.mulf %68, %69 : vector<1x256xf32>
    %71 = arith.mulf %66, %66 : vector<32x256xf32>
    %cst_64 = arith.constant dense<0.000000e+00> : vector<256xf32>
    %72 = vector.multi_reduction <add>, %71, %cst_64 [0] : vector<32x256xf32> to vector<256xf32>
    %73 = vector.shape_cast %72 : vector<256xf32> to vector<1x256xf32>
    %cst_65 = arith.constant 3.125000e-02 : f32
    %74 = vector.broadcast %cst_65 : f32 to vector<1x256xf32>
    %75 = arith.mulf %73, %74 : vector<1x256xf32>
    %c0_66 = arith.constant 0 : index
    %c0_67 = arith.constant 0 : index
    %76 = vector.load %arg5[%c0_66, %c0_67] : memref<256x256xf32, #tpu.memory_space<vmem>>, vector<256x256xf32>
    %cst_68 = arith.constant dense<0.000000e+00> : vector<1x256xf32>
    %77 = tpu.matmul %70, %76, %cst_68 {dimension_numbers = #tpu.dot_dimension_numbers<[1], [0], [0], [1], [0, 0, 1, 1], [], []>} : vector<1x256xf32>, vector<256x256xf32>, vector<1x256xf32> -> vector<1x256xf32>
    %c0_69 = arith.constant 0 : index
    %c0_70 = arith.constant 0 : index
    %78 = vector.load %arg5[%c0_69, %c0_70] : memref<256x256xf32, #tpu.memory_space<vmem>>, vector<256x256xf32>
    %cst_71 = arith.constant dense<0.000000e+00> : vector<1x256xf32>
    %79 = tpu.matmul %75, %78, %cst_71 {dimension_numbers = #tpu.dot_dimension_numbers<[1], [0], [0], [1], [0, 0, 1, 1], [], []>} : vector<1x256xf32>, vector<256x256xf32>, vector<1x256xf32> -> vector<1x256xf32>
    %80 = arith.mulf %77, %77 : vector<1x256xf32>
    %81 = arith.subf %79, %80 : vector<1x256xf32>
    %c0_72 = arith.constant 0 : index
    %c0_73 = arith.constant 0 : index
    %82 = vector.load %arg6[%c0_72, %c0_73] : memref<1x256xf32, #tpu.memory_space<vmem>>, vector<1x256xf32>
    %cst_74 = arith.constant 9.99999974E-6 : f32
    %83 = vector.broadcast %cst_74 : f32 to vector<1x256xf32>
    %84 = arith.addf %81, %83 : vector<1x256xf32>
    %85 = math.rsqrt %84 : vector<1x256xf32>
    %86 = arith.mulf %82, %85 : vector<1x256xf32>
    %c0_75 = arith.constant 0 : index
    %c0_76 = arith.constant 0 : index
    %87 = vector.load %arg7[%c0_75, %c0_76] : memref<1x256xf32, #tpu.memory_space<vmem>>, vector<1x256xf32>
    %88 = arith.mulf %77, %86 : vector<1x256xf32>
    %89 = arith.subf %87, %88 : vector<1x256xf32>
    %90 = vector.broadcast %86 : vector<1x256xf32> to vector<32x256xf32>
    %91 = arith.mulf %66, %90 : vector<32x256xf32>
    %92 = vector.broadcast %89 : vector<1x256xf32> to vector<32x256xf32>
    %93 = arith.addf %91, %92 : vector<32x256xf32>
    %cst_77 = arith.constant 2.000000e-01 : f32
    %94 = vector.broadcast %cst_77 : f32 to vector<32x256xf32>
    %95 = arith.mulf %94, %93 : vector<32x256xf32>
    %96 = arith.maximumf %93, %95 : vector<32x256xf32>
    %97 = arith.truncf %96 : vector<32x256xf32> to vector<32x256xbf16>
    %c0_78 = arith.constant 0 : index
    %c0_79 = arith.constant 0 : index
    %c0_80 = arith.constant 0 : index
    %98 = vector.load %arg8[%c0_78, %c0_79, %c0_80] : memref<4x16x32xbf16, #tpu.memory_space<vmem>>, vector<1x16x32xbf16>
    %99 = vector.shape_cast %98 : vector<1x16x32xbf16> to vector<16x32xbf16>
    %cst_81 = arith.constant dense<0.000000e+00> : vector<16x256xf32>
    %100 = tpu.matmul %99, %97, %cst_81 {dimension_numbers = #tpu.dot_dimension_numbers<[1], [0], [0], [1], [0, 0, 1, 1], [], []>} : vector<16x32xbf16>, vector<32x256xbf16>, vector<16x256xf32> -> vector<16x256xf32>
    %101 = arith.truncf %100 : vector<16x256xf32> to vector<16x256xbf16>
    %c0_82 = arith.constant 0 : index
    %c0_83 = arith.constant 0 : index
    %c0_84 = arith.constant 0 : index
    %102 = vector.load %arg9[%c0_82, %c0_83, %c0_84] : memref<4x256x256xbf16, #tpu.memory_space<vmem>>, vector<1x256x256xbf16>
    %103 = vector.shape_cast %102 : vector<1x256x256xbf16> to vector<256x256xbf16>
    %cst_85 = arith.constant dense<0.000000e+00> : vector<16x256xf32>
    %104 = tpu.matmul %101, %103, %cst_85 {dimension_numbers = #tpu.dot_dimension_numbers<[1], [0], [0], [1], [0, 0, 1, 1], [], []>} : vector<16x256xbf16>, vector<256x256xbf16>, vector<16x256xf32> -> vector<16x256xf32>
    %c1_86 = arith.constant 1 : index
    %c0_87 = arith.constant 0 : index
    %c0_88 = arith.constant 0 : index
    %105 = vector.load %arg8[%c1_86, %c0_87, %c0_88] : memref<4x16x32xbf16, #tpu.memory_space<vmem>>, vector<1x16x32xbf16>
    %106 = vector.shape_cast %105 : vector<1x16x32xbf16> to vector<16x32xbf16>
    %cst_89 = arith.constant dense<0.000000e+00> : vector<16x256xf32>
    %107 = tpu.matmul %106, %97, %cst_89 {dimension_numbers = #tpu.dot_dimension_numbers<[1], [0], [0], [1], [0, 0, 1, 1], [], []>} : vector<16x32xbf16>, vector<32x256xbf16>, vector<16x256xf32> -> vector<16x256xf32>
    %108 = arith.truncf %107 : vector<16x256xf32> to vector<16x256xbf16>
    %c1_90 = arith.constant 1 : index
    %c0_91 = arith.constant 0 : index
    %c0_92 = arith.constant 0 : index
    %109 = vector.load %arg9[%c1_90, %c0_91, %c0_92] : memref<4x256x256xbf16, #tpu.memory_space<vmem>>, vector<1x256x256xbf16>
    %110 = vector.shape_cast %109 : vector<1x256x256xbf16> to vector<256x256xbf16>
    %cst_93 = arith.constant dense<0.000000e+00> : vector<16x256xf32>
    %111 = tpu.matmul %108, %110, %cst_93 {dimension_numbers = #tpu.dot_dimension_numbers<[1], [0], [0], [1], [0, 0, 1, 1], [], []>} : vector<16x256xbf16>, vector<256x256xbf16>, vector<16x256xf32> -> vector<16x256xf32>
    %112 = arith.addf %104, %111 : vector<16x256xf32>
    %c2_94 = arith.constant 2 : index
    %c0_95 = arith.constant 0 : index
    %c0_96 = arith.constant 0 : index
    %113 = vector.load %arg8[%c2_94, %c0_95, %c0_96] : memref<4x16x32xbf16, #tpu.memory_space<vmem>>, vector<1x16x32xbf16>
    %114 = vector.shape_cast %113 : vector<1x16x32xbf16> to vector<16x32xbf16>
    %cst_97 = arith.constant dense<0.000000e+00> : vector<16x256xf32>
    %115 = tpu.matmul %114, %97, %cst_97 {dimension_numbers = #tpu.dot_dimension_numbers<[1], [0], [0], [1], [0, 0, 1, 1], [], []>} : vector<16x32xbf16>, vector<32x256xbf16>, vector<16x256xf32> -> vector<16x256xf32>
    %116 = arith.truncf %115 : vector<16x256xf32> to vector<16x256xbf16>
    %c2_98 = arith.constant 2 : index
    %c0_99 = arith.constant 0 : index
    %c0_100 = arith.constant 0 : index
    %117 = vector.load %arg9[%c2_98, %c0_99, %c0_100] : memref<4x256x256xbf16, #tpu.memory_space<vmem>>, vector<1x256x256xbf16>
    %118 = vector.shape_cast %117 : vector<1x256x256xbf16> to vector<256x256xbf16>
    %cst_101 = arith.constant dense<0.000000e+00> : vector<16x256xf32>
    %119 = tpu.matmul %116, %118, %cst_101 {dimension_numbers = #tpu.dot_dimension_numbers<[1], [0], [0], [1], [0, 0, 1, 1], [], []>} : vector<16x256xbf16>, vector<256x256xbf16>, vector<16x256xf32> -> vector<16x256xf32>
    %120 = arith.addf %112, %119 : vector<16x256xf32>
    %c3_102 = arith.constant 3 : index
    %c0_103 = arith.constant 0 : index
    %c0_104 = arith.constant 0 : index
    %121 = vector.load %arg8[%c3_102, %c0_103, %c0_104] : memref<4x16x32xbf16, #tpu.memory_space<vmem>>, vector<1x16x32xbf16>
    %122 = vector.shape_cast %121 : vector<1x16x32xbf16> to vector<16x32xbf16>
    %cst_105 = arith.constant dense<0.000000e+00> : vector<16x256xf32>
    %123 = tpu.matmul %122, %97, %cst_105 {dimension_numbers = #tpu.dot_dimension_numbers<[1], [0], [0], [1], [0, 0, 1, 1], [], []>} : vector<16x32xbf16>, vector<32x256xbf16>, vector<16x256xf32> -> vector<16x256xf32>
    %124 = arith.truncf %123 : vector<16x256xf32> to vector<16x256xbf16>
    %c3_106 = arith.constant 3 : index
    %c0_107 = arith.constant 0 : index
    %c0_108 = arith.constant 0 : index
    %125 = vector.load %arg9[%c3_106, %c0_107, %c0_108] : memref<4x256x256xbf16, #tpu.memory_space<vmem>>, vector<1x256x256xbf16>
    %126 = vector.shape_cast %125 : vector<1x256x256xbf16> to vector<256x256xbf16>
    %cst_109 = arith.constant dense<0.000000e+00> : vector<16x256xf32>
    %127 = tpu.matmul %124, %126, %cst_109 {dimension_numbers = #tpu.dot_dimension_numbers<[1], [0], [0], [1], [0, 0, 1, 1], [], []>} : vector<16x256xbf16>, vector<256x256xbf16>, vector<16x256xf32> -> vector<16x256xf32>
    %128 = arith.addf %120, %127 : vector<16x256xf32>
    %cst_110 = arith.constant dense<0.000000e+00> : vector<256xf32>
    %129 = vector.multi_reduction <add>, %128, %cst_110 [0] : vector<16x256xf32> to vector<256xf32>
    %130 = vector.shape_cast %129 : vector<256xf32> to vector<1x256xf32>
    %cst_111 = arith.constant 6.250000e-02 : f32
    %131 = vector.broadcast %cst_111 : f32 to vector<1x256xf32>
    %132 = arith.mulf %130, %131 : vector<1x256xf32>
    %133 = arith.mulf %128, %128 : vector<16x256xf32>
    %cst_112 = arith.constant dense<0.000000e+00> : vector<256xf32>
    %134 = vector.multi_reduction <add>, %133, %cst_112 [0] : vector<16x256xf32> to vector<256xf32>
    %135 = vector.shape_cast %134 : vector<256xf32> to vector<1x256xf32>
    %cst_113 = arith.constant 6.250000e-02 : f32
    %136 = vector.broadcast %cst_113 : f32 to vector<1x256xf32>
    %137 = arith.mulf %135, %136 : vector<1x256xf32>
    %c0_114 = arith.constant 0 : index
    %c0_115 = arith.constant 0 : index
    %138 = vector.load %arg10[%c0_114, %c0_115] : memref<256x256xf32, #tpu.memory_space<vmem>>, vector<256x256xf32>
    %cst_116 = arith.constant dense<0.000000e+00> : vector<1x256xf32>
    %139 = tpu.matmul %132, %138, %cst_116 {dimension_numbers = #tpu.dot_dimension_numbers<[1], [0], [0], [1], [0, 0, 1, 1], [], []>} : vector<1x256xf32>, vector<256x256xf32>, vector<1x256xf32> -> vector<1x256xf32>
    %c0_117 = arith.constant 0 : index
    %c0_118 = arith.constant 0 : index
    %140 = vector.load %arg10[%c0_117, %c0_118] : memref<256x256xf32, #tpu.memory_space<vmem>>, vector<256x256xf32>
    %cst_119 = arith.constant dense<0.000000e+00> : vector<1x256xf32>
    %141 = tpu.matmul %137, %140, %cst_119 {dimension_numbers = #tpu.dot_dimension_numbers<[1], [0], [0], [1], [0, 0, 1, 1], [], []>} : vector<1x256xf32>, vector<256x256xf32>, vector<1x256xf32> -> vector<1x256xf32>
    %142 = arith.mulf %139, %139 : vector<1x256xf32>
    %143 = arith.subf %141, %142 : vector<1x256xf32>
    %c0_120 = arith.constant 0 : index
    %c0_121 = arith.constant 0 : index
    %144 = vector.load %arg11[%c0_120, %c0_121] : memref<1x256xf32, #tpu.memory_space<vmem>>, vector<1x256xf32>
    %cst_122 = arith.constant 9.99999974E-6 : f32
    %145 = vector.broadcast %cst_122 : f32 to vector<1x256xf32>
    %146 = arith.addf %143, %145 : vector<1x256xf32>
    %147 = math.rsqrt %146 : vector<1x256xf32>
    %148 = arith.mulf %144, %147 : vector<1x256xf32>
    %c0_123 = arith.constant 0 : index
    %c0_124 = arith.constant 0 : index
    %149 = vector.load %arg12[%c0_123, %c0_124] : memref<1x256xf32, #tpu.memory_space<vmem>>, vector<1x256xf32>
    %150 = arith.mulf %139, %148 : vector<1x256xf32>
    %151 = arith.subf %149, %150 : vector<1x256xf32>
    %152 = vector.broadcast %148 : vector<1x256xf32> to vector<16x256xf32>
    %153 = arith.mulf %128, %152 : vector<16x256xf32>
    %154 = vector.broadcast %151 : vector<1x256xf32> to vector<16x256xf32>
    %155 = arith.addf %153, %154 : vector<16x256xf32>
    %cst_125 = arith.constant 2.000000e-01 : f32
    %156 = vector.broadcast %cst_125 : f32 to vector<16x256xf32>
    %157 = arith.mulf %156, %155 : vector<16x256xf32>
    %158 = arith.maximumf %155, %157 : vector<16x256xf32>
    %159 = arith.truncf %158 : vector<16x256xf32> to vector<16x256xbf16>
    %c0_126 = arith.constant 0 : index
    %c0_127 = arith.constant 0 : index
    %c0_128 = arith.constant 0 : index
    %160 = vector.load %arg13[%c0_126, %c0_127, %c0_128] : memref<4x8x16xbf16, #tpu.memory_space<vmem>>, vector<1x8x16xbf16>
    %161 = vector.shape_cast %160 : vector<1x8x16xbf16> to vector<8x16xbf16>
    %cst_129 = arith.constant dense<0.000000e+00> : vector<8x256xf32>
    %162 = tpu.matmul %161, %159, %cst_129 {dimension_numbers = #tpu.dot_dimension_numbers<[1], [0], [0], [1], [0, 0, 1, 1], [], []>} : vector<8x16xbf16>, vector<16x256xbf16>, vector<8x256xf32> -> vector<8x256xf32>
    %163 = arith.truncf %162 : vector<8x256xf32> to vector<8x256xbf16>
    %c0_130 = arith.constant 0 : index
    %c0_131 = arith.constant 0 : index
    %c0_132 = arith.constant 0 : index
    %164 = vector.load %arg14[%c0_130, %c0_131, %c0_132] : memref<4x256x256xbf16, #tpu.memory_space<vmem>>, vector<1x256x256xbf16>
    %165 = vector.shape_cast %164 : vector<1x256x256xbf16> to vector<256x256xbf16>
    %cst_133 = arith.constant dense<0.000000e+00> : vector<8x256xf32>
    %166 = tpu.matmul %163, %165, %cst_133 {dimension_numbers = #tpu.dot_dimension_numbers<[1], [0], [0], [1], [0, 0, 1, 1], [], []>} : vector<8x256xbf16>, vector<256x256xbf16>, vector<8x256xf32> -> vector<8x256xf32>
    %c1_134 = arith.constant 1 : index
    %c0_135 = arith.constant 0 : index
    %c0_136 = arith.constant 0 : index
    %167 = vector.load %arg13[%c1_134, %c0_135, %c0_136] : memref<4x8x16xbf16, #tpu.memory_space<vmem>>, vector<1x8x16xbf16>
    %168 = vector.shape_cast %167 : vector<1x8x16xbf16> to vector<8x16xbf16>
    %cst_137 = arith.constant dense<0.000000e+00> : vector<8x256xf32>
    %169 = tpu.matmul %168, %159, %cst_137 {dimension_numbers = #tpu.dot_dimension_numbers<[1], [0], [0], [1], [0, 0, 1, 1], [], []>} : vector<8x16xbf16>, vector<16x256xbf16>, vector<8x256xf32> -> vector<8x256xf32>
    %170 = arith.truncf %169 : vector<8x256xf32> to vector<8x256xbf16>
    %c1_138 = arith.constant 1 : index
    %c0_139 = arith.constant 0 : index
    %c0_140 = arith.constant 0 : index
    %171 = vector.load %arg14[%c1_138, %c0_139, %c0_140] : memref<4x256x256xbf16, #tpu.memory_space<vmem>>, vector<1x256x256xbf16>
    %172 = vector.shape_cast %171 : vector<1x256x256xbf16> to vector<256x256xbf16>
    %cst_141 = arith.constant dense<0.000000e+00> : vector<8x256xf32>
    %173 = tpu.matmul %170, %172, %cst_141 {dimension_numbers = #tpu.dot_dimension_numbers<[1], [0], [0], [1], [0, 0, 1, 1], [], []>} : vector<8x256xbf16>, vector<256x256xbf16>, vector<8x256xf32> -> vector<8x256xf32>
    %174 = arith.addf %166, %173 : vector<8x256xf32>
    %c2_142 = arith.constant 2 : index
    %c0_143 = arith.constant 0 : index
    %c0_144 = arith.constant 0 : index
    %175 = vector.load %arg13[%c2_142, %c0_143, %c0_144] : memref<4x8x16xbf16, #tpu.memory_space<vmem>>, vector<1x8x16xbf16>
    %176 = vector.shape_cast %175 : vector<1x8x16xbf16> to vector<8x16xbf16>
    %cst_145 = arith.constant dense<0.000000e+00> : vector<8x256xf32>
    %177 = tpu.matmul %176, %159, %cst_145 {dimension_numbers = #tpu.dot_dimension_numbers<[1], [0], [0], [1], [0, 0, 1, 1], [], []>} : vector<8x16xbf16>, vector<16x256xbf16>, vector<8x256xf32> -> vector<8x256xf32>
    %178 = arith.truncf %177 : vector<8x256xf32> to vector<8x256xbf16>
    %c2_146 = arith.constant 2 : index
    %c0_147 = arith.constant 0 : index
    %c0_148 = arith.constant 0 : index
    %179 = vector.load %arg14[%c2_146, %c0_147, %c0_148] : memref<4x256x256xbf16, #tpu.memory_space<vmem>>, vector<1x256x256xbf16>
    %180 = vector.shape_cast %179 : vector<1x256x256xbf16> to vector<256x256xbf16>
    %cst_149 = arith.constant dense<0.000000e+00> : vector<8x256xf32>
    %181 = tpu.matmul %178, %180, %cst_149 {dimension_numbers = #tpu.dot_dimension_numbers<[1], [0], [0], [1], [0, 0, 1, 1], [], []>} : vector<8x256xbf16>, vector<256x256xbf16>, vector<8x256xf32> -> vector<8x256xf32>
    %182 = arith.addf %174, %181 : vector<8x256xf32>
    %c3_150 = arith.constant 3 : index
    %c0_151 = arith.constant 0 : index
    %c0_152 = arith.constant 0 : index
    %183 = vector.load %arg13[%c3_150, %c0_151, %c0_152] : memref<4x8x16xbf16, #tpu.memory_space<vmem>>, vector<1x8x16xbf16>
    %184 = vector.shape_cast %183 : vector<1x8x16xbf16> to vector<8x16xbf16>
    %cst_153 = arith.constant dense<0.000000e+00> : vector<8x256xf32>
    %185 = tpu.matmul %184, %159, %cst_153 {dimension_numbers = #tpu.dot_dimension_numbers<[1], [0], [0], [1], [0, 0, 1, 1], [], []>} : vector<8x16xbf16>, vector<16x256xbf16>, vector<8x256xf32> -> vector<8x256xf32>
    %186 = arith.truncf %185 : vector<8x256xf32> to vector<8x256xbf16>
    %c3_154 = arith.constant 3 : index
    %c0_155 = arith.constant 0 : index
    %c0_156 = arith.constant 0 : index
    %187 = vector.load %arg14[%c3_154, %c0_155, %c0_156] : memref<4x256x256xbf16, #tpu.memory_space<vmem>>, vector<1x256x256xbf16>
    %188 = vector.shape_cast %187 : vector<1x256x256xbf16> to vector<256x256xbf16>
    %cst_157 = arith.constant dense<0.000000e+00> : vector<8x256xf32>
    %189 = tpu.matmul %186, %188, %cst_157 {dimension_numbers = #tpu.dot_dimension_numbers<[1], [0], [0], [1], [0, 0, 1, 1], [], []>} : vector<8x256xbf16>, vector<256x256xbf16>, vector<8x256xf32> -> vector<8x256xf32>
    %190 = arith.addf %182, %189 : vector<8x256xf32>
    %cst_158 = arith.constant dense<0.000000e+00> : vector<256xf32>
    %191 = vector.multi_reduction <add>, %190, %cst_158 [0] : vector<8x256xf32> to vector<256xf32>
    %192 = vector.shape_cast %191 : vector<256xf32> to vector<1x256xf32>
    %cst_159 = arith.constant 1.250000e-01 : f32
    %193 = vector.broadcast %cst_159 : f32 to vector<1x256xf32>
    %194 = arith.mulf %192, %193 : vector<1x256xf32>
    %195 = arith.mulf %190, %190 : vector<8x256xf32>
    %cst_160 = arith.constant dense<0.000000e+00> : vector<256xf32>
    %196 = vector.multi_reduction <add>, %195, %cst_160 [0] : vector<8x256xf32> to vector<256xf32>
    %197 = vector.shape_cast %196 : vector<256xf32> to vector<1x256xf32>
    %cst_161 = arith.constant 1.250000e-01 : f32
    %198 = vector.broadcast %cst_161 : f32 to vector<1x256xf32>
    %199 = arith.mulf %197, %198 : vector<1x256xf32>
    %c0_162 = arith.constant 0 : index
    %c0_163 = arith.constant 0 : index
    %200 = vector.load %arg15[%c0_162, %c0_163] : memref<256x256xf32, #tpu.memory_space<vmem>>, vector<256x256xf32>
    %cst_164 = arith.constant dense<0.000000e+00> : vector<1x256xf32>
    %201 = tpu.matmul %194, %200, %cst_164 {dimension_numbers = #tpu.dot_dimension_numbers<[1], [0], [0], [1], [0, 0, 1, 1], [], []>} : vector<1x256xf32>, vector<256x256xf32>, vector<1x256xf32> -> vector<1x256xf32>
    %c0_165 = arith.constant 0 : index
    %c0_166 = arith.constant 0 : index
    %202 = vector.load %arg15[%c0_165, %c0_166] : memref<256x256xf32, #tpu.memory_space<vmem>>, vector<256x256xf32>
    %cst_167 = arith.constant dense<0.000000e+00> : vector<1x256xf32>
    %203 = tpu.matmul %199, %202, %cst_167 {dimension_numbers = #tpu.dot_dimension_numbers<[1], [0], [0], [1], [0, 0, 1, 1], [], []>} : vector<1x256xf32>, vector<256x256xf32>, vector<1x256xf32> -> vector<1x256xf32>
    %204 = arith.mulf %201, %201 : vector<1x256xf32>
    %205 = arith.subf %203, %204 : vector<1x256xf32>
    %c0_168 = arith.constant 0 : index
    %c0_169 = arith.constant 0 : index
    %206 = vector.load %arg16[%c0_168, %c0_169] : memref<1x256xf32, #tpu.memory_space<vmem>>, vector<1x256xf32>
    %cst_170 = arith.constant 9.99999974E-6 : f32
    %207 = vector.broadcast %cst_170 : f32 to vector<1x256xf32>
    %208 = arith.addf %205, %207 : vector<1x256xf32>
    %209 = math.rsqrt %208 : vector<1x256xf32>
    %210 = arith.mulf %206, %209 : vector<1x256xf32>
    %c0_171 = arith.constant 0 : index
    %c0_172 = arith.constant 0 : index
    %211 = vector.load %arg17[%c0_171, %c0_172] : memref<1x256xf32, #tpu.memory_space<vmem>>, vector<1x256xf32>
    %212 = arith.mulf %201, %210 : vector<1x256xf32>
    %213 = arith.subf %211, %212 : vector<1x256xf32>
    %214 = vector.broadcast %210 : vector<1x256xf32> to vector<8x256xf32>
    %215 = arith.mulf %190, %214 : vector<8x256xf32>
    %216 = vector.broadcast %213 : vector<1x256xf32> to vector<8x256xf32>
    %217 = arith.addf %215, %216 : vector<8x256xf32>
    %cst_173 = arith.constant 2.000000e-01 : f32
    %218 = vector.broadcast %cst_173 : f32 to vector<8x256xf32>
    %219 = arith.mulf %218, %217 : vector<8x256xf32>
    %220 = arith.maximumf %217, %219 : vector<8x256xf32>
    %221 = arith.truncf %220 : vector<8x256xf32> to vector<8x256xbf16>
    %c0_174 = arith.constant 0 : index
    %c0_175 = arith.constant 0 : index
    %c0_176 = arith.constant 0 : index
    %222 = vector.load %arg18[%c0_174, %c0_175, %c0_176] : memref<4x2x8xbf16, #tpu.memory_space<vmem>>, vector<1x2x8xbf16>
    %223 = vector.shape_cast %222 : vector<1x2x8xbf16> to vector<2x8xbf16>
    %cst_177 = arith.constant dense<0.000000e+00> : vector<2x256xf32>
    %224 = tpu.matmul %223, %221, %cst_177 {dimension_numbers = #tpu.dot_dimension_numbers<[1], [0], [0], [1], [0, 0, 1, 1], [], []>} : vector<2x8xbf16>, vector<8x256xbf16>, vector<2x256xf32> -> vector<2x256xf32>
    %225 = arith.truncf %224 : vector<2x256xf32> to vector<2x256xbf16>
    %c0_178 = arith.constant 0 : index
    %c0_179 = arith.constant 0 : index
    %c0_180 = arith.constant 0 : index
    %226 = vector.load %arg19[%c0_178, %c0_179, %c0_180] : memref<4x256x1xbf16, #tpu.memory_space<vmem>>, vector<1x256x1xbf16>
    %227 = vector.shape_cast %226 : vector<1x256x1xbf16> to vector<256x1xbf16>
    %cst_181 = arith.constant dense<0.000000e+00> : vector<2x1xf32>
    %228 = tpu.matmul %225, %227, %cst_181 {dimension_numbers = #tpu.dot_dimension_numbers<[1], [0], [0], [1], [0, 0, 1, 1], [], []>} : vector<2x256xbf16>, vector<256x1xbf16>, vector<2x1xf32> -> vector<2x1xf32>
    %c1_182 = arith.constant 1 : index
    %c0_183 = arith.constant 0 : index
    %c0_184 = arith.constant 0 : index
    %229 = vector.load %arg18[%c1_182, %c0_183, %c0_184] : memref<4x2x8xbf16, #tpu.memory_space<vmem>>, vector<1x2x8xbf16>
    %230 = vector.shape_cast %229 : vector<1x2x8xbf16> to vector<2x8xbf16>
    %cst_185 = arith.constant dense<0.000000e+00> : vector<2x256xf32>
    %231 = tpu.matmul %230, %221, %cst_185 {dimension_numbers = #tpu.dot_dimension_numbers<[1], [0], [0], [1], [0, 0, 1, 1], [], []>} : vector<2x8xbf16>, vector<8x256xbf16>, vector<2x256xf32> -> vector<2x256xf32>
    %232 = arith.truncf %231 : vector<2x256xf32> to vector<2x256xbf16>
    %c1_186 = arith.constant 1 : index
    %c0_187 = arith.constant 0 : index
    %c0_188 = arith.constant 0 : index
    %233 = vector.load %arg19[%c1_186, %c0_187, %c0_188] : memref<4x256x1xbf16, #tpu.memory_space<vmem>>, vector<1x256x1xbf16>
    %234 = vector.shape_cast %233 : vector<1x256x1xbf16> to vector<256x1xbf16>
    %cst_189 = arith.constant dense<0.000000e+00> : vector<2x1xf32>
    %235 = tpu.matmul %232, %234, %cst_189 {dimension_numbers = #tpu.dot_dimension_numbers<[1], [0], [0], [1], [0, 0, 1, 1], [], []>} : vector<2x256xbf16>, vector<256x1xbf16>, vector<2x1xf32> -> vector<2x1xf32>
    %236 = arith.addf %228, %235 : vector<2x1xf32>
    %c2_190 = arith.constant 2 : index
    %c0_191 = arith.constant 0 : index
    %c0_192 = arith.constant 0 : index
    %237 = vector.load %arg18[%c2_190, %c0_191, %c0_192] : memref<4x2x8xbf16, #tpu.memory_space<vmem>>, vector<1x2x8xbf16>
    %238 = vector.shape_cast %237 : vector<1x2x8xbf16> to vector<2x8xbf16>
    %cst_193 = arith.constant dense<0.000000e+00> : vector<2x256xf32>
    %239 = tpu.matmul %238, %221, %cst_193 {dimension_numbers = #tpu.dot_dimension_numbers<[1], [0], [0], [1], [0, 0, 1, 1], [], []>} : vector<2x8xbf16>, vector<8x256xbf16>, vector<2x256xf32> -> vector<2x256xf32>
    %240 = arith.truncf %239 : vector<2x256xf32> to vector<2x256xbf16>
    %c2_194 = arith.constant 2 : index
    %c0_195 = arith.constant 0 : index
    %c0_196 = arith.constant 0 : index
    %241 = vector.load %arg19[%c2_194, %c0_195, %c0_196] : memref<4x256x1xbf16, #tpu.memory_space<vmem>>, vector<1x256x1xbf16>
    %242 = vector.shape_cast %241 : vector<1x256x1xbf16> to vector<256x1xbf16>
    %cst_197 = arith.constant dense<0.000000e+00> : vector<2x1xf32>
    %243 = tpu.matmul %240, %242, %cst_197 {dimension_numbers = #tpu.dot_dimension_numbers<[1], [0], [0], [1], [0, 0, 1, 1], [], []>} : vector<2x256xbf16>, vector<256x1xbf16>, vector<2x1xf32> -> vector<2x1xf32>
    %244 = arith.addf %236, %243 : vector<2x1xf32>
    %c3_198 = arith.constant 3 : index
    %c0_199 = arith.constant 0 : index
    %c0_200 = arith.constant 0 : index
    %245 = vector.load %arg18[%c3_198, %c0_199, %c0_200] : memref<4x2x8xbf16, #tpu.memory_space<vmem>>, vector<1x2x8xbf16>
    %246 = vector.shape_cast %245 : vector<1x2x8xbf16> to vector<2x8xbf16>
    %cst_201 = arith.constant dense<0.000000e+00> : vector<2x256xf32>
    %247 = tpu.matmul %246, %221, %cst_201 {dimension_numbers = #tpu.dot_dimension_numbers<[1], [0], [0], [1], [0, 0, 1, 1], [], []>} : vector<2x8xbf16>, vector<8x256xbf16>, vector<2x256xf32> -> vector<2x256xf32>
    %248 = arith.truncf %247 : vector<2x256xf32> to vector<2x256xbf16>
    %c3_202 = arith.constant 3 : index
    %c0_203 = arith.constant 0 : index
    %c0_204 = arith.constant 0 : index
    %249 = vector.load %arg19[%c3_202, %c0_203, %c0_204] : memref<4x256x1xbf16, #tpu.memory_space<vmem>>, vector<1x256x1xbf16>
    %250 = vector.shape_cast %249 : vector<1x256x1xbf16> to vector<256x1xbf16>
    %cst_205 = arith.constant dense<0.000000e+00> : vector<2x1xf32>
    %251 = tpu.matmul %248, %250, %cst_205 {dimension_numbers = #tpu.dot_dimension_numbers<[1], [0], [0], [1], [0, 0, 1, 1], [], []>} : vector<2x256xbf16>, vector<256x1xbf16>, vector<2x1xf32> -> vector<2x1xf32>
    %252 = arith.addf %244, %251 : vector<2x1xf32>
    %cst_206 = arith.constant 0.000000e+00 : f32
    %253 = vector.broadcast %cst_206 : f32 to vector<2x1xf32>
    %254 = arith.subf %253, %252 : vector<2x1xf32>
    %255 = math.exp %254 : vector<2x1xf32>
    %cst_207 = arith.constant 1.000000e+00 : f32
    %256 = vector.broadcast %cst_207 : f32 to vector<2x1xf32>
    %257 = arith.addf %256, %255 : vector<2x1xf32>
    %cst_208 = arith.constant 1.000000e+00 : f32
    %258 = vector.broadcast %cst_208 : f32 to vector<2x1xf32>
    %259 = arith.divf %258, %257 : vector<2x1xf32>
    %c0_209 = arith.constant 0 : index
    %c0_210 = arith.constant 0 : index
    %260 = vector.load %arg20[%c0_209, %c0_210] : memref<2x1xf32, #tpu.memory_space<vmem>>, vector<2x1xf32>
    tpu.vector_store %arg20[%c0_209, %c0_210], %259 {strides = array<i32>} : memref<2x1xf32, #tpu.memory_space<vmem>>, vector<2x1xf32>,
    return
  }
}

</mosaic_0001>

<bundles_post_ra>
// kernel: discriminator_forward.1
= control target key start
LH: loop header
LB: loop body
LE: loop exit
PB: predicated region body
PF: predicated region fallthrough
CT: control target
= control target key end

     0   :  { %s11045_s0 = inlined_call_operand.vmem [shape: bf16[128,192], index: 0, kind: input, shape index: {}]   ;;  %s11046_s1 = inlined_call_operand.vmem [shape: bf16[4,64,128], index: 1, kind: input, shape index: {}]   ;;  %s11047_s2 = inlined_call_operand.vmem [shape: bf16[4,192,256], index: 2, kind: input, shape index: {}]   ;;  %s11048_s3 = inlined_call_operand.vmem [shape: bf16[4,32,64], index: 3, kind: input, shape index: {}]   ;;  %s11049_s4 = inlined_call_operand.vmem [shape: bf16[4,256,256], index: 4, kind: input, shape index: {}]   ;;  %s11050_s5 = inlined_call_operand.hbm [shape: f32[256,256], index: 5, kind: input, shape index: {}]   ;;  %s11051_s6 = inlined_call_operand.vmem [shape: f32[1,256], index: 6, kind: input, shape index: {}]   ;;  %s11052_s7 = inlined_call_operand.hbm [shape: f32[1,256], index: 7, kind: input, shape index: {}]   ;;  %s11053_s8 = inlined_call_operand.hbm [shape: bf16[4,16,32], index: 8, kind: input, shape index: {}]   ;;  %s11054_s9 = inlined_call_operand.hbm [shape: bf16[4,256,256], index: 9, kind: input, shape index: {}]   ;;  %s11055_s10 = inlined_call_operand.hbm [shape: f32[256,256], index: 10, kind: input, shape index: {}]   ;;  %s11056_s11 = inlined_call_operand.hbm [shape: f32[1,256], index: 11, kind: input, shape index: {}]   ;;  %s11057_s12 = inlined_call_operand.hbm [shape: f32[1,256], index: 12, kind: input, shape index: {}]   ;;  %s11058_s13 = inlined_call_operand.vmem [shape: bf16[4,8,16], index: 13, kind: input, shape index: {}]   ;;  %s11059_s14 = inlined_call_operand.hbm [shape: bf16[4,256,256], index: 14, kind: input, shape index: {}]   ;;  %s11060_s15 = inlined_call_operand.hbm [shape: f32[256,256], index: 15, kind: input, shape index: {}]   ;;  %s11061_s16 = inlined_call_operand.vmem [shape: f32[1,256], index: 16, kind: input, shape index: {}]   ;;  %s11062_s17 = inlined_call_operand.hbm [shape: f32[1,256], index: 17, kind: input, shape index: {}]   ;;  %s11063_s18 = inlined_call_operand.vmem [shape: bf16[4,2,8], index: 18, kind: input, shape index: {}]   ;;  %s11064_s19 = inlined_call_operand.vmem [shape: bf16[4,256,1], index: 19, kind: input, shape index: {}]   ;;  %s11065_s20 = inlined_call_operand.vmem [shape: f32[2,1], index: 20, kind: output, shape index: {}]  }
   0x1   :  { %11071 = sst [smem:[#allocation24_spill]] %s11045_s0 }
   0x2   :  { %11072 = sst [smem:[#allocation25_spill]] %s11046_s1 }
   0x3   :  { %11073 = sst [smem:[#allocation26_spill]] %s11047_s2 }
   0x4   :  { %11074 = sst [smem:[#allocation27_spill]] %s11048_s3 }
   0x5   :  { %11075 = sst [smem:[#allocation28_spill]] %s11049_s4 }
   0x6   :  { %25 = vsyncpa [#allocation3], 0 }
   0x7   :  { %26 = vsyncpa [#allocation5], 0 }
   0x8   :  { %27 = vsyncpa [#allocation8], 0 }
   0x9   :  { %28 = vsyncpa [#allocation11], 0 }
   0xa   :  { %29 = vsyncpa [#allocation14], 0 }
   0xb   :  { %30 = vsyncpa [#allocation17], 0  ;;  %s9379_s1 = smov [#allocation4]   ;;  %s9380_s23 = smov [#allocation7]  }
   0xc   :  { %s61_s22 = sshll.u32 %s9379_s1, 4  ;;  %s82_s24 = sshll.u32 %s9380_s23, 4  ;;  %s62_s22 = int_to_ptr.vmem [resolvable:$true] %s61_s22  ;;  %s83_s24 = int_to_ptr.vmem [resolvable:$true] %s82_s24 }
   0xd   :  { %s9175_s2 = scalar_lea.vmem %s62_s22, 32  ;;  %p9180_p1 = scmp.lt.s32.totalorder %s62_s22, %s62_s22 }
   0xe   :  { %p9176_p0 = scmp.ne.s32.totalorder %s62_s22, %s9175_s2  ;;  %p9181_p2 = scmp.lt.s32.totalorder %s9175_s2, %s9175_s2 }
  0x10   :  { %p9182_p3 = por %p9181_p2, %p9180_p1 }
  0x12   :  { %p9183_p4 = pnand %p9182_p3, %p9176_p0 }
  0x14   :  { %9186 = shalt.err (!%p9183_p4)
}
  0x15   :  { %64 = dma.hbm_to_vmem [thread:$0]  %s11052_s7, 32, %s62_s22, [#allocation5]  }
  0x16   :  { %s9195_s26 = scalar_lea.vmem %s83_s24, 16384  ;;  %p9200_p6 = scmp.lt.s32.totalorder %s83_s24, %s83_s24 }
  0x17   :  { %p9196_p5 = scmp.ne.s32.totalorder %s83_s24, %s9195_s26  ;;  %p9201_p7 = scmp.lt.s32.totalorder %s9195_s26, %s9195_s26 }
  0x19   :  { %p9202_p8 = por %p9201_p7, %p9200_p6 }
  0x1b   :  { %p9203_p9 = pnand %p9202_p8, %p9196_p5 }
  0x1d   :  { %9206 = shalt.err (!%p9203_p9)
}
  0x1e   :  { %s9381_s27 = smov 128   ;;  %s9382_s28 = smov 8  }
  0x1f   :  { %88 = dma.hbm_to_vmem [thread:$0]  %s11054_s9, 16384, %s83_s24, [#allocation8], %s9381_s27, %s9381_s27, %s9382_s28  }
  0x20   :  { %s9383_s30 = smov [#allocation10]   ;;  %s9384_s21 = smov [#allocation13]  }
  0x21   :  { %s107_s0 = sshll.u32 %s9383_s30, 4  ;;  %s128_s1 = sshll.u32 %s9384_s21, 4  ;;  %s108_s0 = int_to_ptr.vmem [resolvable:$true] %s107_s0  ;;  %s129_s1 = int_to_ptr.vmem [resolvable:$true] %s128_s1 }
  0x22   :  { %s9215_s7 = scalar_lea.vmem %s108_s0, 32  ;;  %p9220_p11 = scmp.lt.s32.totalorder %s108_s0, %s108_s0 }
  0x23   :  { %p9216_p10 = scmp.ne.s32.totalorder %s108_s0, %s9215_s7  ;;  %p9221_p12 = scmp.lt.s32.totalorder %s9215_s7, %s9215_s7 }
  0x25   :  { %p9222_p13 = por %p9221_p12, %p9220_p11 }
  0x27   :  { %p9223_p0 = pnand %p9222_p13, %p9216_p10 }
  0x29   :  { %9226 = shalt.err (!%p9223_p0)
}
  0x2a   :  { %110 = dma.hbm_to_vmem [thread:$0]  %s11056_s11, 32, %s108_s0, [#allocation11]  }
  0x2b   :  { %s9235_s2 = scalar_lea.vmem %s129_s1, 16384  ;;  %p9240_p2 = scmp.lt.s32.totalorder %s129_s1, %s129_s1 }
  0x2c   :  { %p9236_p1 = scmp.ne.s32.totalorder %s129_s1, %s9235_s2  ;;  %p9241_p3 = scmp.lt.s32.totalorder %s9235_s2, %s9235_s2 }
  0x2e   :  { %p9242_p4 = por %p9241_p3, %p9240_p2 }
  0x30   :  { %p9243_p5 = pnand %p9242_p4, %p9236_p1 }
  0x32   :  { %9246 = shalt.err (!%p9243_p5)
}
  0x33   :  { %134 = dma.hbm_to_vmem [thread:$0]  %s11059_s14, 16384, %s129_s1, [#allocation14], %s9381_s27, %s9381_s27, %s9382_s28  }
  0x34   :  { %s9385_s25 = smov [#allocation2]  }
  0x35   :  { %s46_s3 = sshll.u32 %s9385_s25, 4  ;;  %s47_s3 = int_to_ptr.vmem [resolvable:$true] %s46_s3 }
  0x36   :  { %s9255_s26 = scalar_lea.vmem %s47_s3, 8192  ;;  %p9260_p7 = scmp.lt.s32.totalorder %s47_s3, %s47_s3 }
  0x37   :  { %p9256_p6 = scmp.ne.s32.totalorder %s47_s3, %s9255_s26  ;;  %p9261_p8 = scmp.lt.s32.totalorder %s9255_s26, %s9255_s26 }
  0x39   :  { %p9262_p9 = por %p9261_p8, %p9260_p7 }
  0x3b   :  { %p9263_p10 = pnand %p9262_p9, %p9256_p6 }
  0x3d   :  { %9266 = shalt.err (!%p9263_p10)
}
  0x3e   :  { %s9386_s11 = smov 256   ;;  %s9387_s4 = smov 16  }
  0x3f   :  { %52 = dma.hbm_to_vmem [thread:$0]  %s11050_s5, 8192, %s47_s3, [#allocation3], %s9386_s11, %s9386_s11, %s9387_s4  }
  0x40   :  { %s9388_s14 = smov [#allocation6]  }
  0x41   :  { %s70_s27 = sshll.u32 %s9388_s14, 4  ;;  %s71_s27 = int_to_ptr.vmem [resolvable:$true] %s70_s27 }
  0x42   :  { %s9275_s28 = scalar_lea.vmem %s71_s27, 512  ;;  %p9280_p12 = scmp.lt.s32.totalorder %s71_s27, %s71_s27 }
  0x43   :  { %p9276_p11 = scmp.ne.s32.totalorder %s71_s27, %s9275_s28  ;;  %p9281_p13 = scmp.lt.s32.totalorder %s9275_s28, %s9275_s28 }
  0x45   :  { %p9282_p0 = por %p9281_p13, %p9280_p12 }
  0x47   :  { %p9283_p1 = pnand %p9282_p0, %p9276_p11 }
  0x49   :  { %9286 = shalt.err (!%p9283_p1)
}
  0x4a   :  { %s9389_s0 = smov 64   ;;  %s9390_s21 = smov 4  }
  0x4b   :  { %76 = dma.hbm_to_vmem [thread:$0]  %s11053_s8, 512, %s71_s27, [#allocation5], %s9389_s0, %s9389_s0, %s9390_s21  }
  0x4c   :  { %s9391_s22 = smov [#allocation9]   ;;  %s9392_s2 = smov [#allocation12]  }
  0x4d   :  { %s94_s23 = sshll.u32 %s9391_s22, 4  ;;  %s117_s5 = sshll.u32 %s9392_s2, 4  ;;  %s95_s23 = int_to_ptr.vmem [resolvable:$true] %s94_s23  ;;  %s118_s5 = int_to_ptr.vmem [resolvable:$true] %s117_s5 }
  0x4e   :  { %s9295_s9 = scalar_lea.vmem %s95_s23, 8192  ;;  %p9300_p3 = scmp.lt.s32.totalorder %s95_s23, %s95_s23 }
  0x4f   :  { %p9296_p2 = scmp.ne.s32.totalorder %s95_s23, %s9295_s9  ;;  %p9301_p4 = scmp.lt.s32.totalorder %s9295_s9, %s9295_s9 }
  0x51   :  { %p9302_p5 = por %p9301_p4, %p9300_p3 }
  0x53   :  { %p9303_p6 = pnand %p9302_p5, %p9296_p2 }
  0x55   :  { %9306 = shalt.err (!%p9303_p6)
}
  0x56   :  { %100 = dma.hbm_to_vmem [thread:$0]  %s11055_s10, 8192, %s95_s23, [#allocation8], %s9386_s11, %s9386_s11, %s9387_s4  }
  0x57   :  { %s9315_s8 = scalar_lea.vmem %s118_s5, 32  ;;  %p9320_p8 = scmp.lt.s32.totalorder %s118_s5, %s118_s5 }
  0x58   :  { %p9316_p7 = scmp.ne.s32.totalorder %s118_s5, %s9315_s8  ;;  %p9321_p9 = scmp.lt.s32.totalorder %s9315_s8, %s9315_s8 }
  0x5a   :  { %p9322_p10 = por %p9321_p9, %p9320_p8 }
  0x5c   :  { %p9323_p11 = pnand %p9322_p10, %p9316_p7 }
  0x5e   :  { %9326 = shalt.err (!%p9323_p11)
}
  0x5f   :  { %120 = dma.hbm_to_vmem [thread:$0]  %s11057_s12, 32, %s118_s5, [#allocation11]  }
  0x60   :  { %s9393_s29 = smov [#allocation15]   ;;  %s9394_s14 = smov [#allocation16]  }
  0x61   :  { %s140_s30 = sshll.u32 %s9393_s29, 4  ;;  %s155_s27 = sshll.u32 %s9394_s14, 4  ;;  %s141_s30 = int_to_ptr.vmem [resolvable:$true] %s140_s30  ;;  %s156_s27 = int_to_ptr.vmem [resolvable:$true] %s155_s27 }
  0x62   :  { %s9335_s28 = scalar_lea.vmem %s141_s30, 8192  ;;  %p9340_p13 = scmp.lt.s32.totalorder %s141_s30, %s141_s30 }
  0x63   :  { %p9336_p12 = scmp.ne.s32.totalorder %s141_s30, %s9335_s28  ;;  %p9341_p0 = scmp.lt.s32.totalorder %s9335_s28, %s9335_s28 }
  0x65   :  { %p9342_p1 = por %p9341_p0, %p9340_p13 }
  0x67   :  { %p9343_p2 = pnand %p9342_p1, %p9336_p12 }
  0x69   :  { %9346 = shalt.err (!%p9343_p2)
}
  0x6a   :  { %146 = dma.hbm_to_vmem [thread:$0]  %s11060_s15, 8192, %s141_s30, [#allocation14], %s9386_s11, %s9386_s11, %s9387_s4  }
  0x6b   :  { %s9355_s12 = scalar_lea.vmem %s156_s27, 32  ;;  %p9360_p4 = scmp.lt.s32.totalorder %s156_s27, %s156_s27 }
  0x6c   :  { %p9356_p3 = scmp.ne.s32.totalorder %s156_s27, %s9355_s12  ;;  %p9361_p5 = scmp.lt.s32.totalorder %s9355_s12, %s9355_s12 }
  0x6e   :  { %p9362_p6 = por %p9361_p5, %p9360_p4 }
  0x70   :  { %p9363_p7 = pnand %p9362_p6, %p9356_p3 }
  0x72   :  { %9366 = shalt.err (!%p9363_p7)
}
  0x73   :  { %158 = dma.hbm_to_vmem [thread:$0]  %s11062_s17, 32, %s156_s27, [#allocation17]  }
  0x74   :  { %9367 = dma.done.wait [#allocation3], 8192  }
  0x75   :  { %9368 = vsyncadd [#allocation3], 4294959104 }
  0x76   :  { %9369 = dma.done.wait [#allocation5], 544  }
  0x77   :  { %9370 = vsyncadd [#allocation5], 4294966752 }
  0x78   :  { %9371 = dma.done.wait [#allocation8], 24576  }
  0x79   :  { %9372 = vsyncadd [#allocation8], 4294942720 }
  0x7a   :  { %9373 = dma.done.wait [#allocation11], 64  }
  0x7b   :  { %9374 = vsyncadd [#allocation11], 4294967232 }
  0x7c   :  { %9375 = dma.done.wait [#allocation14], 24576  }
  0x7d   :  { %9376 = vsyncadd [#allocation14], 4294942720 }
  0x7e   :  { %9377 = dma.done.wait [#allocation17], 32  }
  0x7f   :  { %9378 = vsyncadd [#allocation17], 4294967264  ;;  %v9395_v0 = vmov 0   ;;  %s11076_s17 = sld [smem:[#allocation24_spill]]  ;;  %vm686_vm0 = vcmask 523264   ;;  %vm3416_vm1 = vcmask 261120  }
  0x80   :  { %354 = vmatprep.mubr.bf16.mxu0 %v9395_v0  ;;  %492 = vmatprep.mubr.bf16.mxu1 %v9395_v0  ;;  %s11077_s25 = sld [smem:[#allocation26_spill]]  ;;  %vm4917_vm2 = vcmask 130048   ;;  %vm6370_vm3 = vcmask 1043456   ;;  %vm6366_vm4 = vcmask 64512   ;;  %vm7247_vm5 = vcmask 1024  }
  0x81   :  { %s11078_s30 = sld [smem:[#allocation25_spill]] }
  0x82   :  { %s11079_s27 = sld [smem:[#allocation28_spill]] }
  0x83   :  { %s11080_s24 = sld [smem:[#allocation27_spill]] }
  0x85   :  { %v9546_v1 = vld [vmem:[%s11076_s17 + $0x74] ss:$8 sps:$4 sm:$0xff]   ;;  %v8301_v2 = vld [vmem:[%s11076_s17 + $0x70] ss:$8 sps:$4 sm:$0xff]   ;;  %v8302_v3 = vld [vmem:[%s11076_s17 + $0x64] ss:$8 sps:$4 sm:$0xff]  }
  0x86   :  { %322 = vmatprep.subr.bf16.mxu0 %v9546_v1  ;;  %460 = vmatprep.subr.bf16.mxu1 %v9546_v1  ;;  %v8304_v4 = vld [vmem:[%s11076_s17 + $0x60] ss:$8 sps:$4 sm:$0xff]   ;;  %v8305_v5 = vld [vmem:[%s11076_s17 + $0x54] ss:$8 sps:$4 sm:$0xff]   ;;  %v8307_v6 = vld [vmem:[%s11076_s17 + $0x50] ss:$8 sps:$4 sm:$0xff]  }
  0x87   :  { %323 = vmatpush1.bf16.msra.mxu0 %v8301_v2  ;;  %461 = vmatpush1.bf16.msra.mxu1 %v8301_v2  ;;  %v8308_v7 = vld [vmem:[%s11076_s17 + $0x44] ss:$8 sps:$4 sm:$0xff]   ;;  %v8310_v8 = vld [vmem:[%s11076_s17 + $0x40] ss:$8 sps:$4 sm:$0xff]   ;;  %v8311_v9 = vld [vmem:[%s11076_s17 + $0x34] ss:$8 sps:$4 sm:$0xff]  }
  0x88   :  { %324 = vmatprep.subr.bf16.mxu0 %v8302_v3  ;;  %462 = vmatprep.subr.bf16.mxu1 %v8302_v3  ;;  %v8313_v10 = vld [vmem:[%s11076_s17 + $0x30] ss:$8 sps:$4 sm:$0xff]   ;;  %v8314_v11 = vld [vmem:[%s11076_s17 + $0x24] ss:$8 sps:$4 sm:$0xff]   ;;  %v8316_v12 = vld [vmem:[%s11076_s17 + $0x20] ss:$8 sps:$4 sm:$0xff]  }
  0x89   :  { %v8317_v13 = vld [vmem:[%s11076_s17 + $0x14] ss:$8 sps:$4 sm:$0xff]   ;;  %v8319_v14 = vld [vmem:[%s11076_s17 + $0x10] ss:$8 sps:$4 sm:$0xff]   ;;  %v8320_v15 = vld [vmem:[%s11076_s17 + $0x4] ss:$8 sps:$4 sm:$0xff]  }
  0x8a   :  { %v8322_v16 = vld [vmem:[%s11076_s17] ss:$8 sps:$4 sm:$0xff]   ;;  %v8333_v17 = vld [vmem:[%s11077_s25 + $0x134] ss:$8 sps:$4 sm:$0xff]   ;;  %v8331_v21 = vld [vmem:[%s11077_s25 + $0x130] ss:$8 sps:$4 sm:$0xff]  }
  0x8b   :  { %325 = vmatpush1.bf16.msra.mxu0 %v8304_v4  ;;  %463 = vmatpush1.bf16.msra.mxu1 %v8304_v4  ;;  %v8336_v18 = vld [vmem:[%s11077_s25 + $0x74] ss:$8 sps:$4 sm:$0xff]   ;;  %v8323_v19 = vld [vmem:[%s11078_s30] sm:$0xff]   ;;  %v8334_v22 = vld [vmem:[%s11077_s25 + $0x70] ss:$8 sps:$4 sm:$0xff]  }
  0x8c   :  { %326 = vmatprep.subr.bf16.mxu0 %v8305_v5  ;;  %464 = vmatprep.subr.bf16.mxu1 %v8305_v5  ;;  %v8324_v20 = vld [vmem:[%s11078_s30 + $0x20] sm:$0xff]   ;;  %v8345_v27 = vld [vmem:[%s11077_s25 + $0x114] ss:$8 sps:$4 sm:$0xff]   ;;  %v8325_v29 = vld [vmem:[%s11078_s30 + $0x8] sm:$0xff]  }
  0x8d   :  { %v8339_v23 = vld [vmem:[%s11077_s25 + $0x124] ss:$8 sps:$4 sm:$0xff]   ;;  %v8337_v25 = vld [vmem:[%s11077_s25 + $0x120] ss:$8 sps:$4 sm:$0xff]   ;;  %v8348_v28 = vld [vmem:[%s11077_s25 + $0x54] ss:$8 sps:$4 sm:$0xff]  }
  0x8e   :  { %v8342_v24 = vld [vmem:[%s11077_s25 + $0x64] ss:$8 sps:$4 sm:$0xff]   ;;  %v8340_v26 = vld [vmem:[%s11077_s25 + $0x60] ss:$8 sps:$4 sm:$0xff]   ;;  %v8343_v31 = vld [vmem:[%s11077_s25 + $0x110] ss:$8 sps:$4 sm:$0xff]  }
  0x8f   :  { %327 = vmatpush1.bf16.msra.mxu0 %v8307_v6  ;;  %465 = vmatpush1.bf16.msra.mxu1 %v8307_v6  ;;  %v8326_v30 = vld [vmem:[%s11078_s30 + $0x28] sm:$0xff]   ;;  %v8346_v32 = vld [vmem:[%s11077_s25 + $0x50] ss:$8 sps:$4 sm:$0xff]   ;;  %v8357_v39 = vld [vmem:[%s11077_s25 + $0xf4] ss:$8 sps:$4 sm:$0xff]  }
  0x90   :  { %328 = vmatprep.subr.bf16.mxu0 %v8308_v7  ;;  %466 = vmatprep.subr.bf16.mxu1 %v8308_v7  ;;  %v8351_v33 = vld [vmem:[%s11077_s25 + $0x104] ss:$8 sps:$4 sm:$0xff]   ;;  %v8349_v35 = vld [vmem:[%s11077_s25 + $0x100] ss:$8 sps:$4 sm:$0xff]   ;;  %v8327_v37 = vld [vmem:[%s11078_s30 + $0x10] sm:$0xff]  }
  0x91   :  { %v8354_v34 = vld [vmem:[%s11077_s25 + $0x44] ss:$8 sps:$4 sm:$0xff]   ;;  %v8352_v36 = vld [vmem:[%s11077_s25 + $0x40] ss:$8 sps:$4 sm:$0xff]   ;;  %v8328_v38 = vld [vmem:[%s11078_s30 + $0x30] sm:$0xff]  }
  0x92   :  { %v8360_v40 = vld [vmem:[%s11077_s25 + $0x34] ss:$8 sps:$4 sm:$0xff]   ;;  %v8355_v41 = vld [vmem:[%s11077_s25 + $0xf0] ss:$8 sps:$4 sm:$0xff]   ;;  %v8363_v43 = vld [vmem:[%s11077_s25 + $0xe4] ss:$8 sps:$4 sm:$0xff]  }
  0x93   :  { %329 = vmatpush1.bf16.msra.mxu0 %v8310_v8  ;;  %467 = vmatpush1.bf16.msra.mxu1 %v8310_v8  ;;  %v8358_v42 = vld [vmem:[%s11077_s25 + $0x30] ss:$8 sps:$4 sm:$0xff]   ;;  %v8366_v44 = vld [vmem:[%s11077_s25 + $0x24] ss:$8 sps:$4 sm:$0xff]   ;;  %v8361_v45 = vld [vmem:[%s11077_s25 + $0xe0] ss:$8 sps:$4 sm:$0xff]  }
  0x94   :  { %330 = vmatprep.subr.bf16.mxu0 %v8311_v9  ;;  %468 = vmatprep.subr.bf16.mxu1 %v8311_v9  ;;  %v8364_v46 = vld [vmem:[%s11077_s25 + $0x20] ss:$8 sps:$4 sm:$0xff]   ;;  %v8369_v47 = vld [vmem:[%s11077_s25 + $0xd4] ss:$8 sps:$4 sm:$0xff]   ;;  %v8367_v51 = vld [vmem:[%s11077_s25 + $0xd0] ss:$8 sps:$4 sm:$0xff]  }
  0x95   :  { %v8372_v48 = vld [vmem:[%s11077_s25 + $0x14] ss:$8 sps:$4 sm:$0xff]   ;;  %v8370_v52 = vld [vmem:[%s11077_s25 + $0x10] ss:$8 sps:$4 sm:$0xff]   ;;  %v8375_v53 = vld [vmem:[%s11077_s25 + $0xc4] ss:$8 sps:$4 sm:$0xff]  }
  0x96   :  { %v8329_v49 = vld [vmem:[%s11078_s30 + $0x18] sm:$0xff]   ;;  %v8378_v54 = vld [vmem:[%s11077_s25 + $0x4] ss:$8 sps:$4 sm:$0xff]   ;;  %v8373_v55 = vld [vmem:[%s11077_s25 + $0xc0] ss:$8 sps:$4 sm:$0xff]  }
  0x97   :  { %331 = vmatpush1.bf16.msra.mxu0 %v8313_v10  ;;  %469 = vmatpush1.bf16.msra.mxu1 %v8313_v10  ;;  %v8330_v50 = vld [vmem:[%s11078_s30 + $0x38] sm:$0xff]   ;;  %v8376_v56 = vld [vmem:[%s11077_s25] ss:$8 sps:$4 sm:$0xff]   ;;  %v8387_v61 = vld [vmem:[%s11077_s25 + $0x164] ss:$8 sps:$4 sm:$0xff]  }
  0x98   :  { %332 = vmatprep.subr.bf16.mxu0 %v8314_v11  ;;  %470 = vmatprep.subr.bf16.mxu1 %v8314_v11  ;;  %v8381_v57 = vld [vmem:[%s11077_s25 + $0x174] ss:$8 sps:$4 sm:$0xff]   ;;  %v8379_v59 = vld [vmem:[%s11077_s25 + $0x170] ss:$8 sps:$4 sm:$0xff]   ;;  %v8390_v62 = vld [vmem:[%s11077_s25 + $0xa4] ss:$8 sps:$4 sm:$0xff]  }
  0x99   :  { %v8384_v58 = vld [vmem:[%s11077_s25 + $0xb4] ss:$8 sps:$4 sm:$0xff]   ;;  %v8382_v60 = vld [vmem:[%s11077_s25 + $0xb0] ss:$8 sps:$4 sm:$0xff]   ;;  %v8385_v63 = vld [vmem:[%s11077_s25 + $0x160] ss:$8 sps:$4 sm:$0xff]  }
  0x9a   :  { %v8388_v2 = vld [vmem:[%s11077_s25 + $0xa0] ss:$8 sps:$4 sm:$0xff]   ;;  %v8393_v3 = vld [vmem:[%s11077_s25 + $0x154] ss:$8 sps:$4 sm:$0xff]   ;;  %v8391_v5 = vld [vmem:[%s11077_s25 + $0x150] ss:$8 sps:$4 sm:$0xff]  }
  0x9b   :  { %333 = vmatpush1.bf16.msra.mxu0 %v8316_v12  ;;  %471 = vmatpush1.bf16.msra.mxu1 %v8316_v12  ;;  %v8396_v4 = vld [vmem:[%s11077_s25 + $0x94] ss:$8 sps:$4 sm:$0xff]   ;;  %v8394_v6 = vld [vmem:[%s11077_s25 + $0x90] ss:$8 sps:$4 sm:$0xff]   ;;  %v8399_v7 = vld [vmem:[%s11077_s25 + $0x144] ss:$8 sps:$4 sm:$0xff]  }
  0x9c   :  { %334 = vmatprep.subr.bf16.mxu0 %v8317_v13  ;;  %472 = vmatprep.subr.bf16.mxu1 %v8317_v13  ;;  %v8402_v8 = vld [vmem:[%s11077_s25 + $0x84] ss:$8 sps:$4 sm:$0xff]   ;;  %v8397_v9 = vld [vmem:[%s11077_s25 + $0x140] ss:$8 sps:$4 sm:$0xff]   ;;  %v8413_v11 = vld [vmem:[%s11077_s25 + $0x1f4] ss:$8 sps:$4 sm:$0xff]  }
  0x9d   :  { %v8400_v10 = vld [vmem:[%s11077_s25 + $0x80] ss:$8 sps:$4 sm:$0xff]  }
  0x9f   :  { %335 = vmatpush1.bf16.msra.mxu0 %v8319_v14  ;;  %473 = vmatpush1.bf16.msra.mxu1 %v8319_v14 }
  0xa0   :  { %336 = vmatprep.subr.bf16.mxu0 %v8320_v15  ;;  %474 = vmatprep.subr.bf16.mxu1 %v8320_v15 }
  0xa3   :  { %337 = vmatpush1.bf16.msra.mxu0 %v8322_v16  ;;  %475 = vmatpush1.bf16.msra.mxu1 %v8322_v16 }
  0xa4   :  { %699 = vmatprep.subr.bf16.mxu0 %v8333_v17  ;;  %904 = vmatprep.subr.bf16.mxu1 %v8336_v18  ;;  %v8411_v18 = vld [vmem:[%s11077_s25 + $0x1f0] ss:$8 sps:$4 sm:$0xff]  }
  0xa6   :  { %355 = vmatmul.mubr.bf16.vlgmr.msra.gmra.mxu0 %v8323_v19  ;;  %493 = vmatmul.mubr.bf16.vlgmr.msra.gmra.mxu1 %v8324_v20 }
  0xa7   :  { %364 = vmatprep.mubr.bf16.mxu0 %v9395_v0  ;;  %502 = vmatprep.mubr.bf16.mxu1 %v9395_v0 }
  0xa8   :  { %700 = vmatpush1.bf16.msra.mxu0 %v8331_v21  ;;  %905 = vmatpush1.bf16.msra.mxu1 %v8334_v22 }
  0xa9   :  { %701 = vmatprep.subr.bf16.mxu0 %v8339_v23  ;;  %906 = vmatprep.subr.bf16.mxu1 %v8342_v24 }
  0xac   :  { %702 = vmatpush1.bf16.msra.mxu0 %v8337_v25  ;;  %907 = vmatpush1.bf16.msra.mxu1 %v8340_v26 }
  0xad   :  { %703 = vmatprep.subr.bf16.mxu0 %v8345_v27  ;;  %908 = vmatprep.subr.bf16.mxu1 %v8348_v28  ;;  %v8414_v27 = vld [vmem:[%s11077_s25 + $0x1e0] ss:$8 sps:$4 sm:$0xff]  }
  0xae   :  { %365 = vmatmul.mubr.bf16.gmra.mxu0 %v8325_v29  ;;  %503 = vmatmul.mubr.bf16.gmra.mxu1 %v8326_v30  ;;  %v9787_v30 = vld [vmem:[%s11076_s17 + $0x70] ss:$8 sps:$4 sm:$0xff]  }
  0xaf   :  { %374 = vmatprep.mubr.bf16.mxu0 %v9395_v0  ;;  %512 = vmatprep.mubr.bf16.mxu1 %v9395_v0 }
  0xb0   :  { %704 = vmatpush1.bf16.msra.mxu0 %v8343_v31  ;;  %909 = vmatpush1.bf16.msra.mxu1 %v8346_v32 }
  0xb1   :  { %705 = vmatprep.subr.bf16.mxu0 %v8351_v33  ;;  %910 = vmatprep.subr.bf16.mxu1 %v8354_v34  ;;  %v9793_v33 = vld [vmem:[%s11076_s17 + $0x64] ss:$8 sps:$4 sm:$0xff]  }
  0xb4   :  { %706 = vmatpush1.bf16.msra.mxu0 %v8349_v35  ;;  %911 = vmatpush1.bf16.msra.mxu1 %v8352_v36 }
  0xb5   :  { %707 = vmatprep.subr.bf16.mxu0 %v8357_v39  ;;  %912 = vmatprep.subr.bf16.mxu1 %v8360_v40  ;;  %v9799_v39 = vld [vmem:[%s11076_s17 + $0x60] ss:$8 sps:$4 sm:$0xff]  }
  0xb6   :  { %375 = vmatmul.mubr.bf16.gmra.mxu0 %v8327_v37  ;;  %513 = vmatmul.mubr.bf16.gmra.mxu1 %v8328_v38 }
  0xb7   :  { %384 = vmatprep.mubr.bf16.mxu0 %v9395_v0  ;;  %522 = vmatprep.mubr.bf16.mxu1 %v9395_v0 }
  0xb8   :  { %708 = vmatpush1.bf16.msra.mxu0 %v8355_v41  ;;  %913 = vmatpush1.bf16.msra.mxu1 %v8358_v42 }
  0xb9   :  { %709 = vmatprep.subr.bf16.mxu0 %v8363_v43  ;;  %914 = vmatprep.subr.bf16.mxu1 %v8366_v44  ;;  %v9805_v43 = vld [vmem:[%s11076_s17 + $0x54] ss:$8 sps:$4 sm:$0xff]  }
  0xbc   :  { %710 = vmatpush1.bf16.msra.mxu0 %v8361_v45  ;;  %915 = vmatpush1.bf16.msra.mxu1 %v8364_v46  ;;  %v9155_v46 = vld [vmem:[%s11076_s17 + $0x50] ss:$8 sps:$4 sm:$0xff]  }
  0xbd   :  { %711 = vmatprep.subr.bf16.mxu0 %v8369_v47  ;;  %916 = vmatprep.subr.bf16.mxu1 %v8372_v48 }
  0xbe   :  { %385 = vmatmul.mubr.bf16.gmra.mxu0 %v8329_v49  ;;  %523 = vmatmul.mubr.bf16.gmra.mxu1 %v8330_v50  ;;  %v9156_v49 = vld [vmem:[%s11076_s17 + $0x44] ss:$8 sps:$4 sm:$0xff]  }
  0xc0   :  { %712 = vmatpush1.bf16.msra.mxu0 %v8367_v51  ;;  %917 = vmatpush1.bf16.msra.mxu1 %v8370_v52 }
  0xc1   :  { %713 = vmatprep.subr.bf16.mxu0 %v8375_v53  ;;  %918 = vmatprep.subr.bf16.mxu1 %v8378_v54 }
  0xc4   :  { %714 = vmatpush1.bf16.msra.mxu0 %v8373_v55  ;;  %919 = vmatpush1.bf16.msra.mxu1 %v8376_v56  ;;  %v9157_v55 = vld [vmem:[%s11076_s17 + $0x40] ss:$8 sps:$4 sm:$0xff]  }
  0xc5   :  { %723 = vmatprep.subr.bf16.mxu0 %v8381_v57  ;;  %928 = vmatprep.subr.bf16.mxu1 %v8384_v58 }
  0xc8   :  { %724 = vmatpush2.bf16.msra.mxu0 %v8379_v59  ;;  %929 = vmatpush2.bf16.msra.mxu1 %v8382_v60  ;;  %v9158_v59 = vld [vmem:[%s11076_s17 + $0x34] ss:$8 sps:$4 sm:$0xff]  }
  0xc9   :  { %725 = vmatprep.subr.bf16.mxu0 %v8387_v61  ;;  %930 = vmatprep.subr.bf16.mxu1 %v8390_v62  ;;  %v9159_v62 = vld [vmem:[%s11076_s17 + $0x30] ss:$8 sps:$4 sm:$0xff]  }
  0xcc   :  { %726 = vmatpush2.bf16.msra.mxu0 %v8385_v63  ;;  %931 = vmatpush2.bf16.msra.mxu1 %v8388_v2 }
  0xcd   :  { %727 = vmatprep.subr.bf16.mxu0 %v8393_v3  ;;  %932 = vmatprep.subr.bf16.mxu1 %v8396_v4  ;;  %v9160_v3 = vld [vmem:[%s11076_s17 + $0x24] ss:$8 sps:$4 sm:$0xff]  }
  0xd0   :  { %728 = vmatpush2.bf16.msra.mxu0 %v8391_v5  ;;  %933 = vmatpush2.bf16.msra.mxu1 %v8394_v6 }
  0xd1   :  { %729 = vmatprep.subr.bf16.mxu0 %v8399_v7  ;;  %934 = vmatprep.subr.bf16.mxu1 %v8402_v8 }
  0xd4   :  { %730 = vmatpush2.bf16.msra.mxu0 %v8397_v9  ;;  %935 = vmatpush2.bf16.msra.mxu1 %v8400_v10  ;;  %v9161_v9 = vld [vmem:[%s11076_s17 + $0x20] ss:$8 sps:$4 sm:$0xff]  }
  0xd5   :  { %1010 = vmatprep.subr.bf16.mxu0 %v9546_v1  ;;  %1248 = vmatprep.subr.bf16.mxu1 %v8413_v11  ;;  %v8416_v1 = vld [vmem:[%s11077_s25 + $0x1e4] ss:$8 sps:$4 sm:$0xff]   ;;  %v9162_v11 = vld [vmem:[%s11076_s17 + $0x14] ss:$8 sps:$4 sm:$0xff]  }
 0x166   :  { %v356_v12 = vpop.f32.mrf.mxu0  ;;  %v494_v13 = vpop.f32.mrf.mxu1 }
 0x168   :  { %v358_v14 = vpop.f32.mrf.mxu0  ;;  %v496_v15 = vpop.f32.mrf.mxu1 }
 0x16a   :  { %v360_v16 = vpop.f32.mrf.mxu0  ;;  %v498_v17 = vpop.f32.mrf.mxu1 }
 0x16b   :  { %v395_v19 = vpack.c.bf16 %v360_v16, %v356_v12  ;;  %v533_v24 = vpack.c.bf16 %v498_v17, %v494_v13  ;;  %v9163_v12 = vld [vmem:[%s11076_s17 + $0x10] ss:$8 sps:$4 sm:$0xff]   ;;  %v9164_v13 = vld [vmem:[%s11076_s17 + $0x4] ss:$8 sps:$4 sm:$0xff]   ;;  %v9166_v16 = vld [vmem:[%s11076_s17 + $0x74] ss:$8 sps:$4 sm:$0xff]  }
 0x16c   :  { %v362_v20 = vpop.f32.mrf.mxu0  ;;  %v500_v21 = vpop.f32.mrf.mxu1  ;;  %v8404_v17 = vld [vmem:[%s11078_s30 + $0x48] sm:$0xff]  }
 0x16d   :  { %v396_v22 = vpack.c.bf16 %v362_v20, %v358_v14  ;;  %v534_v23 = vpack.c.bf16 %v500_v21, %v496_v15  ;;  %v8403_v14 = vld [vmem:[%s11078_s30 + $0x40] sm:$0xff]   ;;  %v8419_v21 = vld [vmem:[%s11077_s25 + $0x1d4] ss:$8 sps:$4 sm:$0xff]  }
 0x16e   :  { %v366_v25 = vpop.f32.mrf.mxu0  ;;  %v504_v26 = vpop.f32.mrf.mxu1  ;;  %v9165_v15 = vld [vmem:[%s11076_s17] ss:$8 sps:$4 sm:$0xff]  }
 0x16f   :  { %7339 = vmatprep.mubr.msk.bf16.mxu0 %vm686_vm0, %v534_v23  ;;  %7367 = vmatprep.mubr.msk.bf16.mxu1 %vm686_vm0, %v396_v22  ;;  %v8407_v20 = vld [vmem:[%s11078_s30 + $0x60] sm:$0xff]   ;;  %v8408_v23 = vld [vmem:[%s11078_s30 + $0x68] sm:$0xff]  }
 0x170   :  { %v368_v28 = vpop.f32.mrf.mxu0  ;;  %v506_v29 = vpop.f32.mrf.mxu1  ;;  %732 = vmatmul.mubr.bf16.vlgmr.msra.gmra.mxu0 %v533_v24  ;;  %937 = vmatmul.mubr.bf16.vlgmr.msra.gmra.mxu1 %v395_v19  ;;  %v8406_v19 = vld [vmem:[%s11078_s30 + $0x58] sm:$0xff]   ;;  %v8422_v22 = vld [vmem:[%s11077_s25 + $0x1c4] ss:$8 sps:$4 sm:$0xff]   ;;  %v8420_v24 = vld [vmem:[%s11077_s25 + $0x1c0] ss:$8 sps:$4 sm:$0xff]  }
 0x171   :  { %1011 = vmatpush1.bf16.msra.mxu0 %v9787_v30  ;;  %1249 = vmatpush1.bf16.msra.mxu1 %v8411_v18  ;;  %v8405_v18 = vld [vmem:[%s11078_s30 + $0x50] sm:$0xff]  }
 0x172   :  { %v370_v31 = vpop.f32.mrf.mxu0  ;;  %v508_v32 = vpop.f32.mrf.mxu1  ;;  %1012 = vmatprep.subr.bf16.mxu0 %v9793_v33  ;;  %1250 = vmatprep.subr.bf16.mxu1 %v8416_v1  ;;  %v8417_v1 = vld [vmem:[%s11077_s25 + $0x1d0] ss:$8 sps:$4 sm:$0xff]  }
 0x173   :  { %v397_v34 = vpack.c.bf16 %v370_v31, %v366_v25  ;;  %v535_v40 = vpack.c.bf16 %v508_v32, %v504_v26  ;;  %v8425_v25 = vld [vmem:[%s11077_s25 + $0x1b4] ss:$8 sps:$4 sm:$0xff]   ;;  %v8423_v26 = vld [vmem:[%s11077_s25 + $0x1b0] ss:$8 sps:$4 sm:$0xff]   ;;  %v8434_v32 = vld [vmem:[%s11077_s25 + $0x184] ss:$8 sps:$4 sm:$0xff]  }
 0x174   :  { %v372_v35 = vpop.f32.mrf.mxu0  ;;  %v510_v36 = vpop.f32.mrf.mxu1  ;;  %v8429_v31 = vld [vmem:[%s11077_s25 + $0x190] ss:$8 sps:$4 sm:$0xff]  }
 0x175   :  { %v398_v37 = vpack.c.bf16 %v372_v35, %v368_v28  ;;  %v536_v38 = vpack.c.bf16 %v510_v36, %v506_v29  ;;  %1013 = vmatpush1.bf16.msra.mxu0 %v9799_v39  ;;  %1251 = vmatpush1.bf16.msra.mxu1 %v8414_v27  ;;  %v8428_v27 = vld [vmem:[%s11077_s25 + $0x1a4] ss:$8 sps:$4 sm:$0xff]   ;;  %v8409_v28 = vld [vmem:[%s11078_s30 + $0x70] sm:$0xff]   ;;  %v8426_v29 = vld [vmem:[%s11077_s25 + $0x1a0] ss:$8 sps:$4 sm:$0xff]  }
 0x176   :  { %v376_v41 = vpop.f32.mrf.mxu0  ;;  %v514_v42 = vpop.f32.mrf.mxu1  ;;  %1014 = vmatprep.subr.bf16.mxu0 %v9805_v43  ;;  %1252 = vmatprep.subr.bf16.mxu1 %v8419_v21  ;;  %v8437_v35 = vld [vmem:[%s11077_s25 + $0x234] ss:$8 sps:$4 sm:$0xff]   ;;  %v8435_v36 = vld [vmem:[%s11077_s25 + $0x230] ss:$8 sps:$4 sm:$0xff]  }
 0x177   :  { %7340 = vmatprep.mubr.msk.bf16.mxu0 %vm686_vm0, %v536_v38  ;;  %7368 = vmatprep.mubr.msk.bf16.mxu1 %vm686_vm0, %v398_v37  ;;  %v8440_v37 = vld [vmem:[%s11077_s25 + $0x224] ss:$8 sps:$4 sm:$0xff]   ;;  %v8438_v38 = vld [vmem:[%s11077_s25 + $0x220] ss:$8 sps:$4 sm:$0xff]  }
 0x178   :  { %v378_v44 = vpop.f32.mrf.mxu0  ;;  %v516_v45 = vpop.f32.mrf.mxu1  ;;  %742 = vmatmul.mubr.bf16.gmra.mxu0 %v535_v40  ;;  %947 = vmatmul.mubr.bf16.gmra.mxu1 %v397_v34  ;;  %v8432_v34 = vld [vmem:[%s11077_s25 + $0x180] ss:$8 sps:$4 sm:$0xff]   ;;  %v8441_v40 = vld [vmem:[%s11077_s25 + $0x210] ss:$8 sps:$4 sm:$0xff]  }
 0x179   :  { %1015 = vmatpush1.bf16.msra.mxu0 %v9155_v46  ;;  %1253 = vmatpush1.bf16.msra.mxu1 %v8417_v1 }
 0x17a   :  { %v380_v47 = vpop.f32.mrf.mxu0  ;;  %v518_v48 = vpop.f32.mrf.mxu1  ;;  %1016 = vmatprep.subr.bf16.mxu0 %v9156_v49  ;;  %1254 = vmatprep.subr.bf16.mxu1 %v8422_v22 }
 0x17b   :  { %v399_v50 = vpack.c.bf16 %v380_v47, %v376_v41  ;;  %v537_v56 = vpack.c.bf16 %v518_v48, %v514_v42  ;;  %v8446_v41 = vld [vmem:[%s11077_s25 + $0x204] ss:$8 sps:$4 sm:$0xff]   ;;  %v8444_v42 = vld [vmem:[%s11077_s25 + $0x200] ss:$8 sps:$4 sm:$0xff]  }
 0x17c   :  { %v382_v51 = vpop.f32.mrf.mxu0  ;;  %v520_v52 = vpop.f32.mrf.mxu1 }
 0x17d   :  { %v400_v53 = vpack.c.bf16 %v382_v51, %v378_v44  ;;  %v538_v54 = vpack.c.bf16 %v520_v52, %v516_v45  ;;  %1017 = vmatpush1.bf16.msra.mxu0 %v9157_v55  ;;  %1255 = vmatpush1.bf16.msra.mxu1 %v8420_v24 }
 0x17e   :  { %v386_v57 = vpop.f32.mrf.mxu0  ;;  %v524_v58 = vpop.f32.mrf.mxu1  ;;  %1018 = vmatprep.subr.bf16.mxu0 %v9158_v59  ;;  %1256 = vmatprep.subr.bf16.mxu1 %v8425_v25 }
 0x17f   :  { %7341 = vmatprep.mubr.msk.bf16.mxu0 %vm686_vm0, %v538_v54  ;;  %7369 = vmatprep.mubr.msk.bf16.mxu1 %vm686_vm0, %v400_v53 }
 0x180   :  { %v388_v60 = vpop.f32.mrf.mxu0  ;;  %v526_v61 = vpop.f32.mrf.mxu1  ;;  %752 = vmatmul.mubr.bf16.gmra.mxu0 %v537_v56  ;;  %957 = vmatmul.mubr.bf16.gmra.mxu1 %v399_v50 }
 0x181   :  { %1019 = vmatpush1.bf16.msra.mxu0 %v9159_v62  ;;  %1257 = vmatpush1.bf16.msra.mxu1 %v8423_v26  ;;  %v8452_v26 = vld [vmem:[%s11077_s25 + $0x2a4] ss:$8 sps:$4 sm:$0xff]  }
 0x182   :  { %v390_v63 = vpop.f32.mrf.mxu0  ;;  %v528_v2 = vpop.f32.mrf.mxu1  ;;  %1020 = vmatprep.subr.bf16.mxu0 %v9160_v3  ;;  %1258 = vmatprep.subr.bf16.mxu1 %v8428_v27 }
 0x183   :  { %v401_v4 = vpack.c.bf16 %v390_v63, %v386_v57  ;;  %v539_v10 = vpack.c.bf16 %v528_v2, %v524_v58 }
 0x184   :  { %v392_v5 = vpop.f32.mrf.mxu0  ;;  %v530_v6 = vpop.f32.mrf.mxu1 }
 0x185   :  { %v402_v7 = vpack.c.bf16 %v392_v5, %v388_v60  ;;  %v540_v8 = vpack.c.bf16 %v530_v6, %v526_v61  ;;  %1021 = vmatpush1.bf16.msra.mxu0 %v9161_v9  ;;  %1259 = vmatpush1.bf16.msra.mxu1 %v8426_v29 }
 0x186   :  { %1022 = vmatprep.subr.bf16.mxu0 %v9162_v11 }
 0x187   :  { %7342 = vmatprep.mubr.msk.bf16.mxu0 %vm686_vm0, %v540_v8  ;;  %7370 = vmatprep.mubr.msk.bf16.mxu1 %vm686_vm0, %v402_v7 }
 0x188   :  { %762 = vmatmul.mubr.bf16.gmra.mxu0 %v539_v10  ;;  %967 = vmatmul.mubr.bf16.gmra.mxu1 %v401_v4 }
 0x189   :  { %1023 = vmatpush1.bf16.msra.mxu0 %v9163_v12  ;;  %1042 = vmatprep.mubr.bf16.mxu0 %v9395_v0 }
 0x18a   :  { %1024 = vmatprep.subr.bf16.mxu0 %v9164_v13 }
 0x18d   :  { %1025 = vmatpush1.bf16.msra.mxu0 %v9165_v15 }
 0x18e   :  { %1370 = vmatprep.subr.bf16.mxu0 %v9166_v16 }
 0x190   :  { %1043 = vmatmul.mubr.bf16.vlgmr.msra.gmra.mxu0 %v8403_v14 }
 0x191   :  { %1052 = vmatprep.mubr.bf16.mxu0 %v9395_v0  ;;  %1371 = vmatpush1.bf16.msra.mxu0 %v9787_v30  ;;  %v8431_v30 = vld [vmem:[%s11077_s25 + $0x194] ss:$8 sps:$4 sm:$0xff]  }
 0x192   :  { %1372 = vmatprep.subr.bf16.mxu0 %v9793_v33  ;;  %1260 = vmatprep.subr.bf16.mxu1 %v8431_v30  ;;  %v8410_v33 = vld [vmem:[%s11078_s30 + $0x78] sm:$0xff]  }
 0x193   :  { %1261 = vmatpush1.bf16.msra.mxu1 %v8429_v31  ;;  %v8455_v30 = vld [vmem:[%s11077_s25 + $0x294] ss:$8 sps:$4 sm:$0xff]  }
 0x194   :  { %1262 = vmatprep.subr.bf16.mxu1 %v8434_v32 }
 0x195   :  { %1373 = vmatpush1.bf16.msra.mxu0 %v9799_v39  ;;  %v8443_v39 = vld [vmem:[%s11077_s25 + $0x214] ss:$8 sps:$4 sm:$0xff]  }
 0x196   :  { %1374 = vmatprep.subr.bf16.mxu0 %v9805_v43  ;;  %v8449_v43 = vld [vmem:[%s11077_s25 + $0x2b4] ss:$8 sps:$4 sm:$0xff]  }
 0x197   :  { %1263 = vmatpush1.bf16.msra.mxu1 %v8432_v34  ;;  %v8453_v34 = vld [vmem:[%s11077_s25 + $0x290] ss:$8 sps:$4 sm:$0xff]  }
 0x198   :  { %1053 = vmatmul.mubr.bf16.gmra.mxu0 %v8404_v17  ;;  %1272 = vmatprep.subr.bf16.mxu1 %v8437_v35 }
 0x199   :  { %1062 = vmatprep.mubr.bf16.mxu0 %v9395_v0  ;;  %1375 = vmatpush1.bf16.msra.mxu0 %v9155_v46 }
 0x19a   :  { %1376 = vmatprep.subr.bf16.mxu0 %v9156_v49 }
 0x19b   :  { %1273 = vmatpush2.bf16.msra.mxu1 %v8435_v36  ;;  %v8458_v36 = vld [vmem:[%s11077_s25 + $0x284] ss:$8 sps:$4 sm:$0xff]  }
 0x19c   :  { %1274 = vmatprep.subr.bf16.mxu1 %v8440_v37 }
 0x19d   :  { %1377 = vmatpush1.bf16.msra.mxu0 %v9157_v55 }
 0x19e   :  { %1378 = vmatprep.subr.bf16.mxu0 %v9158_v59 }
 0x19f   :  { %1275 = vmatpush2.bf16.msra.mxu1 %v8438_v38  ;;  %v8456_v38 = vld [vmem:[%s11077_s25 + $0x280] ss:$8 sps:$4 sm:$0xff]  }
 0x1a0   :  { %1063 = vmatmul.mubr.bf16.gmra.mxu0 %v8405_v18  ;;  %1276 = vmatprep.subr.bf16.mxu1 %v8443_v39 }
 0x1a1   :  { %1072 = vmatprep.mubr.bf16.mxu0 %v9395_v0  ;;  %1379 = vmatpush1.bf16.msra.mxu0 %v9159_v62 }
 0x1a2   :  { %1380 = vmatprep.subr.bf16.mxu0 %v9160_v3 }
 0x1a3   :  { %1277 = vmatpush2.bf16.msra.mxu1 %v8441_v40  ;;  %v8461_v40 = vld [vmem:[%s11077_s25 + $0x274] ss:$8 sps:$4 sm:$0xff]  }
 0x1a4   :  { %1278 = vmatprep.subr.bf16.mxu1 %v8446_v41 }
 0x1a5   :  { %1381 = vmatpush1.bf16.msra.mxu0 %v9161_v9 }
 0x1a6   :  { %1382 = vmatprep.subr.bf16.mxu0 %v9162_v11 }
 0x1a7   :  { %1279 = vmatpush2.bf16.msra.mxu1 %v8444_v42 }
 0x1a8   :  { %1073 = vmatmul.mubr.bf16.gmra.mxu0 %v8406_v19  ;;  %1608 = vmatprep.subr.bf16.mxu1 %v8449_v43 }
 0x1a9   :  { %1383 = vmatpush1.bf16.msra.mxu0 %v9163_v12  ;;  %1402 = vmatprep.mubr.bf16.mxu0 %v9395_v0 }
 0x1aa   :  { %1384 = vmatprep.subr.bf16.mxu0 %v9164_v13 }
 0x1ad   :  { %1385 = vmatpush1.bf16.msra.mxu0 %v9165_v15 }
 0x1b0   :  { %1403 = vmatmul.mubr.bf16.vlgmr.msra.gmra.mxu0 %v8407_v20 }
 0x1b1   :  { %1412 = vmatprep.mubr.bf16.mxu0 %v9395_v0 }
 0x1b8   :  { %1413 = vmatmul.mubr.bf16.gmra.mxu0 %v8408_v23  ;;  %v8447_v23 = vld [vmem:[%s11077_s25 + $0x2b0] ss:$8 sps:$4 sm:$0xff]  }
 0x1b9   :  { %1422 = vmatprep.mubr.bf16.mxu0 %v9395_v0 }
 0x1c0   :  { %1423 = vmatmul.mubr.bf16.gmra.mxu0 %v8409_v28  ;;  %v8450_v28 = vld [vmem:[%s11077_s25 + $0x2a0] ss:$8 sps:$4 sm:$0xff]  }
 0x1c1   :  { %1432 = vmatprep.mubr.bf16.mxu0 %v9395_v0 }
 0x1c8   :  { %1433 = vmatmul.mubr.bf16.gmra.mxu0 %v8410_v33 }
 0x1c9   :  { %1789 = vmatprep.mubr.bf16.mxu0 %v9395_v0 }
 0x230   :  { %v733_v44 = vpop.f32.mrf.mxu0  ;;  %v938_v45 = vpop.f32.mrf.mxu1 }
 0x231   :  { %v9950_v46 = vadd.f32 %v938_v45, %v733_v44  ;;  %v8459_v44 = vld [vmem:[%s11077_s25 + $0x270] ss:$8 sps:$4 sm:$0xff]  }
 0x232   :  { %v9952_v47 = vpop.f32.mrf.mxu0  ;;  %v9954_v48 = vpop.f32.mrf.mxu1 }
 0x234   :  { %v737_v49 = vpop.f32.mrf.mxu0  ;;  %v942_v50 = vpop.f32.mrf.mxu1 }
 0x235   :  { %v9956_v51 = vadd.f32 %v942_v50, %v737_v49  ;;  %v8464_v49 = vld [vmem:[%s11077_s25 + $0x264] ss:$8 sps:$4 sm:$0xff]  }
 0x236   :  { %v9958_v52 = vpop.f32.mrf.mxu0  ;;  %v9960_v53 = vpop.f32.mrf.mxu1 }
 0x238   :  { %v743_v54 = vpop.f32.mrf.mxu0  ;;  %v948_v55 = vpop.f32.mrf.mxu1 }
 0x239   :  { %v9962_v56 = vadd.f32 %v948_v55, %v743_v54  ;;  %v8462_v54 = vld [vmem:[%s11077_s25 + $0x260] ss:$8 sps:$4 sm:$0xff]  }
 0x23a   :  { %v9964_v57 = vpop.f32.mrf.mxu0  ;;  %v9966_v58 = vpop.f32.mrf.mxu1 }
 0x23c   :  { %v747_v59 = vpop.f32.mrf.mxu0  ;;  %v952_v60 = vpop.f32.mrf.mxu1 }
 0x23d   :  { %v9968_v61 = vadd.f32 %v952_v60, %v747_v59  ;;  %v8467_v59 = vld [vmem:[%s11077_s25 + $0x254] ss:$8 sps:$4 sm:$0xff]  }
 0x23e   :  { %v9970_v62 = vpop.f32.mrf.mxu0  ;;  %v9972_v63 = vpop.f32.mrf.mxu1 }
 0x240   :  { %v753_v2 = vpop.f32.mrf.mxu0  ;;  %v958_v3 = vpop.f32.mrf.mxu1 }
 0x241   :  { %v9974_v4 = vadd.f32 %v958_v3, %v753_v2 }
 0x242   :  { %v9976_v5 = vpop.f32.mrf.mxu0  ;;  %v9978_v6 = vpop.f32.mrf.mxu1 }
 0x244   :  { %v757_v7 = vpop.f32.mrf.mxu0  ;;  %v962_v8 = vpop.f32.mrf.mxu1 }
 0x245   :  { %v9980_v9 = vadd.f32 %v962_v8, %v757_v7  ;;  %v8465_v7 = vld [vmem:[%s11077_s25 + $0x250] ss:$8 sps:$4 sm:$0xff]   ;;  %v8470_v8 = vld [vmem:[%s11077_s25 + $0x244] ss:$8 sps:$4 sm:$0xff]  }
 0x246   :  { %v759_v10 = vpop.f32.mrf.mxu0  ;;  %v964_v11 = vpop.f32.mrf.mxu1 }
 0x247   :  { %v9982_v12 = vadd.f32 %v964_v11, %v759_v10 }
 0x248   :  { %v763_v13 = vpop.f32.mrf.mxu0  ;;  %v968_v14 = vpop.f32.mrf.mxu1 }
 0x249   :  { %v9984_v15 = vadd.f32 %v968_v14, %v763_v13  ;;  %v8468_v13 = vld [vmem:[%s11077_s25 + $0x240] ss:$8 sps:$4 sm:$0xff]   ;;  %v8473_v14 = vld [vmem:[%s11077_s25 + $0x2f4] ss:$8 sps:$4 sm:$0xff]  }
 0x24a   :  { %v9986_v16 = vpop.f32.mrf.mxu0 }
 0x24c   :  { %v9988_v17 = vpop.f32.mrf.mxu0 }
 0x24e   :  { %v9990_v18 = vpop.f32.mrf.mxu0 }
 0x250   :  { %v1044_v19 = vpop.f32.mrf.mxu0 }
 0x252   :  { %v1046_v20 = vpop.f32.mrf.mxu0 }
 0x254   :  { %v1048_v21 = vpop.f32.mrf.mxu0 }
 0x255   :  { %v1083_v24 = vpack.c.bf16 %v1048_v21, %v1044_v19  ;;  %v8471_v21 = vld [vmem:[%s11077_s25 + $0x2f0] ss:$8 sps:$4 sm:$0xff]  }
 0x256   :  { %v1050_v1 = vpop.f32.mrf.mxu0 }
 0x257   :  { %v1084_v22 = vpack.c.bf16 %v1050_v1, %v1046_v20 }
 0x258   :  { %v1054_v25 = vpop.f32.mrf.mxu0 }
 0x259   :  { %7431 = vmatprep.mubr.msk.bf16.mxu1 %vm686_vm0, %v1084_v22  ;;  %v8476_v22 = vld [vmem:[%s11077_s25 + $0x2e4] ss:$8 sps:$4 sm:$0xff]  }
 0x25a   :  { %v1056_v27 = vpop.f32.mrf.mxu0  ;;  %1281 = vmatmul.mubr.bf16.vlgmr.msra.gmra.mxu1 %v1083_v24 }
 0x25b   :  { %1609 = vmatpush1.bf16.msra.mxu1 %v8447_v23 }
 0x25c   :  { %v1058_v29 = vpop.f32.mrf.mxu0  ;;  %1610 = vmatprep.subr.bf16.mxu1 %v8452_v26  ;;  %v8479_v26 = vld [vmem:[%s11077_s25 + $0x2d4] ss:$8 sps:$4 sm:$0xff]  }
 0x25d   :  { %v1085_v31 = vpack.c.bf16 %v1058_v29, %v1054_v25  ;;  %v8474_v25 = vld [vmem:[%s11077_s25 + $0x2e0] ss:$8 sps:$4 sm:$0xff]   ;;  %v8477_v29 = vld [vmem:[%s11077_s25 + $0x2d0] ss:$8 sps:$4 sm:$0xff]  }
 0x25e   :  { %v1060_v32 = vpop.f32.mrf.mxu0 }
 0x25f   :  { %v1086_v33 = vpack.c.bf16 %v1060_v32, %v1056_v27  ;;  %1611 = vmatpush1.bf16.msra.mxu1 %v8450_v28 }
 0x260   :  { %v1064_v35 = vpop.f32.mrf.mxu0  ;;  %1612 = vmatprep.subr.bf16.mxu1 %v8455_v30  ;;  %v8482_v30 = vld [vmem:[%s11077_s25 + $0x2c4] ss:$8 sps:$4 sm:$0xff]  }
 0x261   :  { %7432 = vmatprep.mubr.msk.bf16.mxu1 %vm686_vm0, %v1086_v33  ;;  %v8480_v33 = vld [vmem:[%s11077_s25 + $0x2c0] ss:$8 sps:$4 sm:$0xff]  }
 0x262   :  { %v1066_v37 = vpop.f32.mrf.mxu0  ;;  %1291 = vmatmul.mubr.bf16.gmra.mxu1 %v1085_v31 }
 0x263   :  { %1613 = vmatpush1.bf16.msra.mxu1 %v8453_v34 }
 0x264   :  { %v1068_v39 = vpop.f32.mrf.mxu0  ;;  %1614 = vmatprep.subr.bf16.mxu1 %v8458_v36 }
 0x265   :  { %v1087_v41 = vpack.c.bf16 %v1068_v39, %v1064_v35 }
 0x266   :  { %v1070_v42 = vpop.f32.mrf.mxu0 }
 0x267   :  { %v1088_v43 = vpack.c.bf16 %v1070_v42, %v1066_v37  ;;  %1615 = vmatpush1.bf16.msra.mxu1 %v8456_v38 }
 0x268   :  { %v1074_v45 = vpop.f32.mrf.mxu0  ;;  %1616 = vmatprep.subr.bf16.mxu1 %v8461_v40 }
 0x269   :  { %7433 = vmatprep.mubr.msk.bf16.mxu1 %vm686_vm0, %v1088_v43 }
 0x26a   :  { %v1076_v50 = vpop.f32.mrf.mxu0  ;;  %1301 = vmatmul.mubr.bf16.gmra.mxu1 %v1087_v41 }
 0x26b   :  { %1617 = vmatpush1.bf16.msra.mxu1 %v8459_v44 }
 0x26c   :  { %v1078_v55 = vpop.f32.mrf.mxu0  ;;  %1618 = vmatprep.subr.bf16.mxu1 %v8464_v49 }
 0x26d   :  { %v1089_v60 = vpack.c.bf16 %v1078_v55, %v1074_v45  ;;  %v8488_v55 = vld [vmem:[%s11079_s27 + $0x164] ss:$8 sps:$4 sm:$0xff]  }
 0x26e   :  { %v1080_v2 = vpop.f32.mrf.mxu0 }
 0x26f   :  { %v1090_v3 = vpack.c.bf16 %v1080_v2, %v1076_v50  ;;  %1619 = vmatpush1.bf16.msra.mxu1 %v8462_v54  ;;  %v8485_v50 = vld [vmem:[%s11079_s27 + $0x174] ss:$8 sps:$4 sm:$0xff]   ;;  %v8483_v54 = vld [vmem:[%s11079_s27 + $0x170] ss:$8 sps:$4 sm:$0xff]  }
 0x270   :  { %1620 = vmatprep.subr.bf16.mxu1 %v8467_v59  ;;  %v1404_v10 = vpop.f32.mrf.mxu0  ;;  %v8486_v59 = vld [vmem:[%s11079_s27 + $0x160] ss:$8 sps:$4 sm:$0xff]   ;;  %v8491_v2 = vld [vmem:[%s11079_s27 + $0x154] ss:$8 sps:$4 sm:$0xff]  }
 0x271   :  { %7434 = vmatprep.mubr.msk.bf16.mxu1 %vm686_vm0, %v1090_v3  ;;  %v8494_v3 = vld [vmem:[%s11079_s27 + $0x144] ss:$8 sps:$4 sm:$0xff]  }
 0x272   :  { %1311 = vmatmul.mubr.bf16.gmra.mxu1 %v1089_v60  ;;  %v1406_v11 = vpop.f32.mrf.mxu0  ;;  %v8489_v60 = vld [vmem:[%s11079_s27 + $0x150] ss:$8 sps:$4 sm:$0xff]  }
 0x273   :  { %1621 = vmatpush1.bf16.msra.mxu1 %v8465_v7  ;;  %v8492_v7 = vld [vmem:[%s11079_s27 + $0x140] ss:$8 sps:$4 sm:$0xff]  }
 0x274   :  { %1622 = vmatprep.subr.bf16.mxu1 %v8470_v8  ;;  %v1408_v19 = vpop.f32.mrf.mxu0  ;;  %v8497_v8 = vld [vmem:[%s11079_s27 + $0x134] ss:$8 sps:$4 sm:$0xff]  }
 0x275   :  { %v1443_v37 = vpack.c.bf16 %v1408_v19, %v1404_v10  ;;  %v8495_v10 = vld [vmem:[%s11079_s27 + $0x130] ss:$8 sps:$4 sm:$0xff]  }
 0x276   :  { %v1410_v20 = vpop.f32.mrf.mxu0  ;;  %v8501_v19 = vld [vmem:[%s11079_s27 + $0x110] ss:$8 sps:$4 sm:$0xff]  }
 0x277   :  { %1623 = vmatpush1.bf16.msra.mxu1 %v8468_v13  ;;  %v1444_v1 = vpack.c.bf16 %v1410_v20, %v1406_v11  ;;  %v8500_v11 = vld [vmem:[%s11079_s27 + $0x124] ss:$8 sps:$4 sm:$0xff]   ;;  %v8498_v13 = vld [vmem:[%s11079_s27 + $0x120] ss:$8 sps:$4 sm:$0xff]  }
 0x278   :  { %1632 = vmatprep.subr.bf16.mxu1 %v8473_v14  ;;  %v1414_v23 = vpop.f32.mrf.mxu0  ;;  %v8503_v14 = vld [vmem:[%s11079_s27 + $0x114] ss:$8 sps:$4 sm:$0xff]   ;;  %v8506_v20 = vld [vmem:[%s11079_s27 + $0x104] ss:$8 sps:$4 sm:$0xff]  }
 0x279   :  { %7495 = vmatprep.mubr.msk.bf16.mxu1 %vm686_vm0, %v1444_v1  ;;  %v8509_v1 = vld [vmem:[%s11079_s27 + $0x1f4] ss:$8 sps:$4 sm:$0xff]  }
 0x27a   :  { %v1416_v24 = vpop.f32.mrf.mxu0 }
 0x27b   :  { %1633 = vmatpush2.bf16.msra.mxu1 %v8471_v21  ;;  %v8504_v21 = vld [vmem:[%s11079_s27 + $0x100] ss:$8 sps:$4 sm:$0xff]  }
 0x27c   :  { %1634 = vmatprep.subr.bf16.mxu1 %v8476_v22  ;;  %v1418_v27 = vpop.f32.mrf.mxu0  ;;  %v8507_v22 = vld [vmem:[%s11079_s27 + $0x1f0] ss:$8 sps:$4 sm:$0xff]  }
 0x27d   :  { %v1445_v41 = vpack.c.bf16 %v1418_v27, %v1414_v23  ;;  %v8512_v23 = vld [vmem:[%s11079_s27 + $0x1e4] ss:$8 sps:$4 sm:$0xff]  }
 0x27e   :  { %v1420_v28 = vpop.f32.mrf.mxu0  ;;  %v8518_v27 = vld [vmem:[%s11079_s27 + $0x1c4] ss:$8 sps:$4 sm:$0xff]  }
 0x27f   :  { %1635 = vmatpush2.bf16.msra.mxu1 %v8474_v25  ;;  %v1446_v36 = vpack.c.bf16 %v1420_v28, %v1416_v24  ;;  %v8510_v24 = vld [vmem:[%s11079_s27 + $0x1e0] ss:$8 sps:$4 sm:$0xff]   ;;  %v8515_v25 = vld [vmem:[%s11079_s27 + $0x1d4] ss:$8 sps:$4 sm:$0xff]  }
 0x280   :  { %1636 = vmatprep.subr.bf16.mxu1 %v8479_v26  ;;  %v1424_v31 = vpop.f32.mrf.mxu0  ;;  %v8513_v26 = vld [vmem:[%s11079_s27 + $0x1d0] ss:$8 sps:$4 sm:$0xff]   ;;  %v8516_v28 = vld [vmem:[%s11079_s27 + $0x1c0] ss:$8 sps:$4 sm:$0xff]  }
 0x282   :  { %v1426_v32 = vpop.f32.mrf.mxu0 }
 0x283   :  { %1637 = vmatpush2.bf16.msra.mxu1 %v8477_v29  ;;  %v8521_v29 = vld [vmem:[%s11079_s27 + $0x1b4] ss:$8 sps:$4 sm:$0xff]  }
 0x284   :  { %1638 = vmatprep.subr.bf16.mxu1 %v8482_v30  ;;  %v1428_v34 = vpop.f32.mrf.mxu0  ;;  %v8519_v30 = vld [vmem:[%s11079_s27 + $0x1b0] ss:$8 sps:$4 sm:$0xff]  }
 0x285   :  { %v1447_v45 = vpack.c.bf16 %v1428_v34, %v1424_v31  ;;  %v8524_v31 = vld [vmem:[%s11079_s27 + $0x1a4] ss:$8 sps:$4 sm:$0xff]   ;;  %v8525_v34 = vld [vmem:[%s11079_s27 + $0x190] ss:$8 sps:$4 sm:$0xff]  }
 0x286   :  { %v1430_v35 = vpop.f32.mrf.mxu0 }
 0x287   :  { %1639 = vmatpush2.bf16.msra.mxu1 %v8480_v33  ;;  %v1448_v40 = vpack.c.bf16 %v1430_v35, %v1426_v32  ;;  %v8522_v32 = vld [vmem:[%s11079_s27 + $0x1a0] ss:$8 sps:$4 sm:$0xff]   ;;  %v8527_v33 = vld [vmem:[%s11079_s27 + $0x194] ss:$8 sps:$4 sm:$0xff]   ;;  %v8530_v35 = vld [vmem:[%s11079_s27 + $0x184] ss:$8 sps:$4 sm:$0xff]  }
 0x288   :  { %v1434_v38 = vpop.f32.mrf.mxu0  ;;  %2117 = vmatprep.subr.bf16.mxu1 %v8485_v50 }
 0x28a   :  { %1641 = vmatmul.mubr.bf16.vlgmr.msra.gmra.mxu1 %v1443_v37  ;;  %v1436_v39 = vpop.f32.mrf.mxu0  ;;  %v10165_v37 = vpop.f32.mrf.mxu1 }
 0x28b   :  { %7496 = vmatprep.mubr.msk.bf16.mxu1 %vm686_vm0, %v1446_v36  ;;  %2118 = vmatpush1.bf16.msra.mxu1 %v8483_v54  ;;  %v8528_v36 = vld [vmem:[%s11079_s27 + $0x180] ss:$8 sps:$4 sm:$0xff]  }
 0x28c   :  { %v1438_v42 = vpop.f32.mrf.mxu0  ;;  %2119 = vmatprep.subr.bf16.mxu1 %v8488_v55 }
 0x28d   :  { %v1449_v49 = vpack.c.bf16 %v1438_v42, %v1434_v38  ;;  %v10167_v38 = vpop.f32.mrf.mxu1 }
 0x28e   :  { %v1440_v43 = vpop.f32.mrf.mxu0 }
 0x28f   :  { %v1450_v44 = vpack.c.bf16 %v1440_v43, %v1436_v39  ;;  %2120 = vmatpush1.bf16.msra.mxu1 %v8486_v59  ;;  %v10169_v39 = vpop.f32.mrf.mxu1 }
 0x290   :  { %2121 = vmatprep.subr.bf16.mxu1 %v8491_v2 }
 0x292   :  { %1651 = vmatmul.mubr.bf16.gmra.mxu1 %v1445_v41 }
 0x293   :  { %7497 = vmatprep.mubr.msk.bf16.mxu1 %vm686_vm0, %v1448_v40  ;;  %2122 = vmatpush1.bf16.msra.mxu1 %v8489_v60 }
 0x294   :  { %2123 = vmatprep.subr.bf16.mxu1 %v8494_v3 }
 0x297   :  { %2124 = vmatpush1.bf16.msra.mxu1 %v8492_v7 }
 0x298   :  { %2125 = vmatprep.subr.bf16.mxu1 %v8497_v8 }
 0x29a   :  { %1661 = vmatmul.mubr.bf16.gmra.mxu1 %v1447_v45 }
 0x29b   :  { %7498 = vmatprep.mubr.msk.bf16.mxu1 %vm686_vm0, %v1450_v44  ;;  %2126 = vmatpush1.bf16.msra.mxu1 %v8495_v10  ;;  %v945_v44 = vadd.f32 %v9960_v53, %v9958_v52 }
 0x29c   :  { %2127 = vmatprep.subr.bf16.mxu1 %v8500_v11 }
 0x29f   :  { %2128 = vmatpush1.bf16.msra.mxu1 %v8498_v13 }
 0x2a0   :  { %2129 = vmatprep.subr.bf16.mxu1 %v8503_v14 }
 0x2a2   :  { %1671 = vmatmul.mubr.bf16.gmra.mxu1 %v1449_v49 }
 0x2a3   :  { %2130 = vmatpush1.bf16.msra.mxu1 %v8501_v19 }
 0x2a4   :  { %2131 = vmatprep.subr.bf16.mxu1 %v8506_v20 }
 0x2a7   :  { %2132 = vmatpush1.bf16.msra.mxu1 %v8504_v21 }
 0x2a8   :  { %2133 = vmatprep.subr.bf16.mxu1 %v8509_v1 }
 0x2ab   :  { %2134 = vmatpush2.bf16.msra.mxu1 %v8507_v22 }
 0x2ac   :  { %2135 = vmatprep.subr.bf16.mxu1 %v8512_v23  ;;  %v951_v23 = vadd.f32 %v9966_v58, %v9964_v57 }
 0x2af   :  { %2136 = vmatpush2.bf16.msra.mxu1 %v8510_v24 }
 0x2b0   :  { %2137 = vmatprep.subr.bf16.mxu1 %v8515_v25 }
 0x2b3   :  { %2138 = vmatpush2.bf16.msra.mxu1 %v8513_v26 }
 0x2b4   :  { %2139 = vmatprep.subr.bf16.mxu1 %v8518_v27 }
 0x2b7   :  { %2140 = vmatpush2.bf16.msra.mxu1 %v8516_v28 }
 0x2b8   :  { %2141 = vmatprep.subr.bf16.mxu1 %v8521_v29 }
 0x2bb   :  { %2142 = vmatpush2.bf16.msra.mxu1 %v8519_v30 }
 0x2bc   :  { %2143 = vmatprep.subr.bf16.mxu1 %v8524_v31 }
 0x2bf   :  { %2144 = vmatpush2.bf16.msra.mxu1 %v8522_v32 }
 0x2c0   :  { %2145 = vmatprep.subr.bf16.mxu1 %v8527_v33  ;;  %v955_v33 = vadd.f32 %v9972_v63, %v9970_v62 }
 0x2c3   :  { %2146 = vmatpush2.bf16.msra.mxu1 %v8525_v34 }
 0x2c4   :  { %2147 = vmatprep.subr.bf16.mxu1 %v8530_v35 }
 0x2c7   :  { %2148 = vmatpush2.bf16.msra.mxu1 %v8528_v36 }
 0x31a   :  { %v1282_v40 = vpop.f32.mrf.mxu1 }
 0x31b   :  { %v1321_v41 = vadd.f32 %v1282_v40, %v9950_v46 }
 0x31c   :  { %v1284_v42 = vpop.f32.mrf.mxu1 }
 0x31e   :  { %v1286_v43 = vpop.f32.mrf.mxu1 }
 0x31f   :  { %v1323_v45 = vadd.f32 %v1286_v43, %v9956_v51  ;;  %v941_v51 = vadd.f32 %v9954_v48, %v9952_v47 }
 0x320   :  { %v1288_v49 = vpop.f32.mrf.mxu1 }
 0x321   :  { %v1324_v50 = vadd.f32 %v1288_v49, %v945_v44  ;;  %v1322_v13 = vadd.f32 %v1284_v42, %v941_v51 }
 0x322   :  { %v1292_v54 = vpop.f32.mrf.mxu1 }
 0x323   :  { %v1325_v25 = vadd.f32 %v1292_v54, %v9962_v56 }
 0x324   :  { %v1294_v55 = vpop.f32.mrf.mxu1 }
 0x325   :  { %v1326_v29 = vadd.f32 %v1294_v55, %v951_v23 }
 0x326   :  { %v1296_v59 = vpop.f32.mrf.mxu1 }
 0x327   :  { %v1327_v34 = vadd.f32 %v1296_v59, %v9968_v61 }
 0x328   :  { %v1298_v60 = vpop.f32.mrf.mxu1 }
 0x32a   :  { %v1302_v2 = vpop.f32.mrf.mxu1 }
 0x32b   :  { %v1329_v49 = vadd.f32 %v1302_v2, %v9974_v4 }
 0x32c   :  { %v10175_v3 = vpop.f32.mrf.mxu1 }
 0x32e   :  { %v1306_v7 = vpop.f32.mrf.mxu1 }
 0x330   :  { %v10177_v8 = vpop.f32.mrf.mxu1 }
 0x332   :  { %v1312_v46 = vpop.f32.mrf.mxu1 }
 0x333   :  { %v1333_v23 = vadd.f32 %v1312_v46, %v9984_v15 }
 0x334   :  { %v10179_v10 = vpop.f32.mrf.mxu1 }
 0x336   :  { %v10181_v11 = vpop.f32.mrf.mxu1 }
 0x338   :  { %v10183_v52 = vpop.f32.mrf.mxu1 }
 0x34a   :  { %v1642_v53 = vpop.f32.mrf.mxu1 }
 0x34b   :  { %v1681_v14 = vadd.f32 %v1642_v53, %v1321_v41  ;;  %v1328_v41 = vadd.f32 %v1298_v60, %v955_v33 }
 0x34c   :  { %v1644_v19 = vpop.f32.mrf.mxu1 }
 0x34d   :  { %v1682_v20 = vadd.f32 %v1644_v19, %v1322_v13  ;;  %v1697_v1 = vmul.f32 0.2, %v1681_v14  ;;  %v1331_v13 = vadd.f32 %v1306_v7, %v9980_v9  ;;  %v973_v9 = vadd.f32 %v10167_v38, %v9988_v17 }
 0x34e   :  { %v1646_v21 = vpop.f32.mrf.mxu1  ;;  %v1332_v7 = vadd.f32 %v10177_v8, %v9982_v12 }
 0x34f   :  { %v1683_v22 = vadd.f32 %v1646_v21, %v1323_v45  ;;  %v1698_v26 = vmul.f32 0.2, %v1682_v20  ;;  %v1713_v47 = vmax.f32 %v1681_v14, %v1697_v1 }
 0x350   :  { %v1648_v24 = vpop.f32.mrf.mxu1 }
 0x351   :  { %v1699_v27 = vmul.f32 0.2, %v1683_v22  ;;  %v1684_v28 = vadd.f32 %v1648_v24, %v1324_v50  ;;  %v1714_v36 = vmax.f32 %v1682_v20, %v1698_v26 }
 0x352   :  { %v1652_v30 = vpop.f32.mrf.mxu1 }
 0x353   :  { %v1715_v48 = vmax.f32 %v1683_v22, %v1699_v27  ;;  %v1700_v31 = vmul.f32 0.2, %v1684_v28  ;;  %v1685_v32 = vadd.f32 %v1652_v30, %v1325_v25  ;;  %v971_v22 = vadd.f32 %v10165_v37, %v9986_v16 }
 0x354   :  { %v1654_v35 = vpop.f32.mrf.mxu1  ;;  %v961_v25 = vadd.f32 %v9978_v6, %v9976_v5  ;;  %v975_v16 = vadd.f32 %v10169_v39, %v9990_v18  ;;  %v1335_v5 = vadd.f32 %v10181_v11, %v973_v9  ;;  %v8567_v9 = vld [vmem:[%s11079_s27 + $0xd4] ss:$8 sps:$4 sm:$0xff]  }
 0x355   :  { %v10193_v57 = vpack.c.bf16 %v1715_v48, %v1713_v47  ;;  %v1716_v58 = vmax.f32 %v1684_v28, %v1700_v31  ;;  %v1686_v56 = vadd.f32 %v1654_v35, %v1326_v29  ;;  %v1701_v43 = vmul.f32 0.2, %v1685_v32 }
 0x356   :  { %v1656_v40 = vpop.f32.mrf.mxu1  ;;  %v1334_v27 = vadd.f32 %v10179_v10, %v971_v22  ;;  %v1330_v15 = vadd.f32 %v10175_v3, %v961_v25  ;;  %v1336_v12 = vadd.f32 %v10183_v52, %v975_v16  ;;  %v8561_v22 = vld [vmem:[%s11079_s27 + $0xf4] ss:$8 sps:$4 sm:$0xff]   ;;  %v8562_v25 = vld [vmem:[%s11079_s27 + $0xe0] ss:$8 sps:$4 sm:$0xff]  }
 0x357   :  { %v10195_v42 = vpack.c.bf16 %v1716_v58, %v1714_v36  ;;  %v1687_v44 = vadd.f32 %v1656_v40, %v1327_v34  ;;  %v1702_v50 = vmul.f32 0.2, %v1686_v56  ;;  %v1717_v61 = vmax.f32 %v1685_v32, %v1701_v43  ;;  %v8531_v43 = vld [vmem:[%s11080_s24] sm:$0xff]  }
 0x358   :  { %v1658_v45 = vpop.f32.mrf.mxu1  ;;  %v8574_v16 = vld [vmem:[%s11079_s27 + $0xa0] ss:$8 sps:$4 sm:$0xff]  }
 0x359   :  { %v1703_v54 = vmul.f32 0.2, %v1687_v44  ;;  %v1688_v62 = vadd.f32 %v1658_v45, %v1328_v41  ;;  %v1718_v14 = vmax.f32 %v1686_v56, %v1702_v50  ;;  %v8537_v45 = vld [vmem:[%s11079_s27 + $0x74] ss:$8 sps:$4 sm:$0xff]   ;;  %v8535_v50 = vld [vmem:[%s11079_s27 + $0x70] ss:$8 sps:$4 sm:$0xff]  }
 0x35a   :  { %v1662_v63 = vpop.f32.mrf.mxu1 }
 0x35b   :  { %v1719_v55 = vmax.f32 %v1687_v44, %v1703_v54  ;;  %v1704_v59 = vmul.f32 0.2, %v1688_v62  ;;  %v1689_v51 = vadd.f32 %v1662_v63, %v1329_v49  ;;  %v8532_v44 = vld [vmem:[%s11080_s24 + $0x8] sm:$0xff]   ;;  %v8533_v49 = vld [vmem:[%s11080_s24 + $0x10] sm:$0xff]  }
 0x35c   :  { %v1664_v53 = vpop.f32.mrf.mxu1  ;;  %v8540_v54 = vld [vmem:[%s11079_s27 + $0x64] ss:$8 sps:$4 sm:$0xff]   ;;  %v8543_v63 = vld [vmem:[%s11079_s27 + $0x54] ss:$8 sps:$4 sm:$0xff]  }
 0x35d   :  { %v10199_v60 = vpack.c.bf16 %v1719_v55, %v1717_v61  ;;  %v1720_v19 = vmax.f32 %v1688_v62, %v1704_v59  ;;  %v1705_v1 = vmul.f32 0.2, %v1689_v51  ;;  %v1690_v8 = vadd.f32 %v1664_v53, %v1330_v15  ;;  %v8538_v62 = vld [vmem:[%s11079_s27 + $0x60] ss:$8 sps:$4 sm:$0xff]   ;;  %v8534_v61 = vld [vmem:[%s11080_s24 + $0x18] sm:$0xff]  }
 0x35e   :  { %v1666_v20 = vpop.f32.mrf.mxu1  ;;  %v8541_v55 = vld [vmem:[%s11079_s27 + $0x50] ss:$8 sps:$4 sm:$0xff]   ;;  %v8546_v59 = vld [vmem:[%s11079_s27 + $0x44] ss:$8 sps:$4 sm:$0xff]   ;;  %v8549_v53 = vld [vmem:[%s11079_s27 + $0x34] ss:$8 sps:$4 sm:$0xff]  }
 0x35f   :  { %v10201_v21 = vpack.c.bf16 %v1720_v19, %v1718_v14  ;;  %v1691_v4 = vadd.f32 %v1666_v20, %v1331_v13  ;;  %v1721_v28 = vmax.f32 %v1689_v51, %v1705_v1  ;;  %v1706_v39 = vmul.f32 0.2, %v1690_v8  ;;  %v8544_v51 = vld [vmem:[%s11079_s27 + $0x40] ss:$8 sps:$4 sm:$0xff]   ;;  %v8547_v13 = vld [vmem:[%s11079_s27 + $0x30] ss:$8 sps:$4 sm:$0xff]  }
 0x360   :  { %v1668_v2 = vpop.f32.mrf.mxu1  ;;  %v8552_v14 = vld [vmem:[%s11079_s27 + $0x24] ss:$8 sps:$4 sm:$0xff]   ;;  %v8550_v19 = vld [vmem:[%s11079_s27 + $0x20] ss:$8 sps:$4 sm:$0xff]   ;;  %v8555_v20 = vld [vmem:[%s11079_s27 + $0x14] ss:$8 sps:$4 sm:$0xff]  }
 0x361   :  { %v1707_v24 = vmul.f32 0.2, %v1691_v4  ;;  %v1692_v17 = vadd.f32 %v1668_v2, %v1332_v7  ;;  %v1722_v40 = vmax.f32 %v1690_v8, %v1706_v39  ;;  %v8553_v1 = vld [vmem:[%s11079_s27 + $0x10] ss:$8 sps:$4 sm:$0xff]   ;;  %v8556_v2 = vld [vmem:[%s11079_s27] ss:$8 sps:$4 sm:$0xff]  }
 0x362   :  { %v1672_v26 = vpop.f32.mrf.mxu1  ;;  %v8565_v7 = vld [vmem:[%s11079_s27 + $0xd0] ss:$8 sps:$4 sm:$0xff]   ;;  %v8579_v15 = vld [vmem:[%s11079_s27 + $0x94] ss:$8 sps:$4 sm:$0xff]   ;;  %v8590_v39 = vld [vmem:[%s11079_s27 + $0x260] ss:$8 sps:$4 sm:$0xff]  }
 0x363   :  { %v1723_v29 = vmax.f32 %v1691_v4, %v1707_v24  ;;  %v1693_v30 = vadd.f32 %v1672_v26, %v1333_v23  ;;  %v1708_v31 = vmul.f32 0.2, %v1692_v17  ;;  %v8558_v4 = vld [vmem:[%s11079_s27 + $0x4] ss:$8 sps:$4 sm:$0xff]   ;;  %v8559_v23 = vld [vmem:[%s11079_s27 + $0xf0] ss:$8 sps:$4 sm:$0xff]  }
 0x364   :  { %v1674_v37 = vpop.f32.mrf.mxu1  ;;  %v8564_v24 = vld [vmem:[%s11079_s27 + $0xe4] ss:$8 sps:$4 sm:$0xff]  }
 0x365   :  { %v10217_v6 = vpack.c.bf16 %v1723_v29, %v1721_v28  ;;  %v1694_v38 = vadd.f32 %v1674_v37, %v1334_v27  ;;  %v1709_v10 = vmul.f32 0.2, %v1693_v30  ;;  %v1724_v11 = vmax.f32 %v1692_v17, %v1708_v31  ;;  %v8570_v26 = vld [vmem:[%s11079_s27 + $0xc4] ss:$8 sps:$4 sm:$0xff]   ;;  %v8568_v27 = vld [vmem:[%s11079_s27 + $0xc0] ss:$8 sps:$4 sm:$0xff]  }
 0x366   :  { %v1676_v46 = vpop.f32.mrf.mxu1  ;;  %v8573_v28 = vld [vmem:[%s11079_s27 + $0xb4] ss:$8 sps:$4 sm:$0xff]   ;;  %v8571_v29 = vld [vmem:[%s11079_s27 + $0xb0] ss:$8 sps:$4 sm:$0xff]   ;;  %v8580_v17 = vld [vmem:[%s11079_s27 + $0x80] ss:$8 sps:$4 sm:$0xff]  }
 0x367   :  { %v1695_v47 = vadd.f32 %v1676_v46, %v1335_v5  ;;  %v1710_v32 = vmul.f32 0.2, %v1694_v38  ;;  %v1725_v3 = vmax.f32 %v1693_v30, %v1709_v10  ;;  %v10224_v52 = vpack.c.bf16 %v1724_v11, %v1722_v40  ;;  %v8576_v30 = vld [vmem:[%s11079_s27 + $0xa4] ss:$8 sps:$4 sm:$0xff]   ;;  %v8577_v37 = vld [vmem:[%s11079_s27 + $0x90] ss:$8 sps:$4 sm:$0xff]  }
 0x368   :  { %v1678_v48 = vpop.f32.mrf.mxu1  ;;  %v8582_v5 = vld [vmem:[%s11079_s27 + $0x84] ss:$8 sps:$4 sm:$0xff]  }
 0x369   :  { %v1711_v33 = vmul.f32 0.2, %v1695_v47  ;;  %v1696_v18 = vadd.f32 %v1678_v48, %v1336_v12  ;;  %v1726_v36 = vmax.f32 %v1694_v38, %v1710_v32  ;;  %v8589_v38 = vld [vmem:[%s11079_s27 + $0x274] ss:$8 sps:$4 sm:$0xff]   ;;  %v8587_v48 = vld [vmem:[%s11079_s27 + $0x270] ss:$8 sps:$4 sm:$0xff]  }
 0x36b   :  { %v1727_v34 = vmax.f32 %v1695_v47, %v1711_v33  ;;  %v1712_v35 = vmul.f32 0.2, %v1696_v18  ;;  %v8592_v33 = vld [vmem:[%s11079_s27 + $0x264] ss:$8 sps:$4 sm:$0xff]  }
 0x36d   :  { %v10220_v58 = vpack.c.bf16 %v1727_v34, %v1725_v3  ;;  %v1728_v56 = vmax.f32 %v1696_v18, %v1712_v35  ;;  %v8595_v34 = vld [vmem:[%s11079_s27 + $0x254] ss:$8 sps:$4 sm:$0xff]  }
 0x36f   :  { %v10222_v41 = vpack.c.bf16 %v1728_v56, %v1726_v36  ;;  %v8593_v36 = vld [vmem:[%s11079_s27 + $0x250] ss:$8 sps:$4 sm:$0xff]  }
 0x371   :  { %1765 = vmatprep.subr.bf16.mxu0 %v10222_v41  ;;  %2412 = vmatprep.subr.bf16.mxu1 %v10222_v41 }
 0x372   :  { %1766 = vmatpush1.bf16.msra.mxu0 %v10220_v58 }
 0x373   :  { %1767 = vmatprep.subr.bf16.mxu0 %v10224_v52 }
 0x376   :  { %1768 = vmatpush1.bf16.msra.mxu0 %v10217_v6 }
 0x377   :  { %1769 = vmatprep.subr.bf16.mxu0 %v10201_v21 }
 0x37a   :  { %1770 = vmatpush1.bf16.msra.mxu0 %v10199_v60 }
 0x37b   :  { %1771 = vmatprep.subr.bf16.mxu0 %v10195_v42 }
 0x37e   :  { %1772 = vmatpush1.bf16.msra.mxu0 %v10193_v57 }
 0x37f   :  { %1875 = vmatprep.subr.bf16.mxu0 %v10222_v41 }
 0x381   :  { %7501 = vmatmul.mubr.msk.bf16.vlgmr.msra.gmra.mxu0 %vm686_vm0, %v8531_v43  ;;  %v8598_v43 = vld [vmem:[%s11079_s27 + $0x244] ss:$8 sps:$4 sm:$0xff]  }
 0x382   :  { %1876 = vmatpush1.bf16.msra.mxu0 %v10220_v58  ;;  %1799 = vmatprep.mubr.bf16.mxu0 %v9395_v0 }
 0x383   :  { %1877 = vmatprep.subr.bf16.mxu0 %v10224_v52 }
 0x386   :  { %1878 = vmatpush1.bf16.msra.mxu0 %v10217_v6 }
 0x387   :  { %1879 = vmatprep.subr.bf16.mxu0 %v10201_v21 }
 0x389   :  { %7502 = vmatmul.mubr.msk.bf16.gmra.mxu0 %vm686_vm0, %v8532_v44 }
 0x38a   :  { %1880 = vmatpush1.bf16.msra.mxu0 %v10199_v60  ;;  %1899 = vmatprep.mubr.bf16.mxu0 %v9395_v0 }
 0x38b   :  { %1881 = vmatprep.subr.bf16.mxu0 %v10195_v42 }
 0x38e   :  { %1882 = vmatpush1.bf16.msra.mxu0 %v10193_v57 }
 0x38f   :  { %2330 = vmatprep.subr.bf16.mxu0 %v8537_v45  ;;  %v8596_v45 = vld [vmem:[%s11079_s27 + $0x240] ss:$8 sps:$4 sm:$0xff]  }
 0x391   :  { %7509 = vmatmul.mubr.msk.bf16.vlgmr.msra.gmra.mxu0 %vm686_vm0, %v8533_v49 }
 0x392   :  { %1909 = vmatprep.mubr.bf16.mxu0 %v9395_v0  ;;  %2331 = vmatpush1.bf16.msra.mxu0 %v8535_v50  ;;  %v8601_v50 = vld [vmem:[%s11079_s27 + $0x234] ss:$8 sps:$4 sm:$0xff]  }
 0x393   :  { %2332 = vmatprep.subr.bf16.mxu0 %v8540_v54 }
 0x396   :  { %2333 = vmatpush1.bf16.msra.mxu0 %v8538_v62 }
 0x397   :  { %2334 = vmatprep.subr.bf16.mxu0 %v8543_v63  ;;  %v8599_v63 = vld [vmem:[%s11079_s27 + $0x230] ss:$8 sps:$4 sm:$0xff]  }
 0x399   :  { %7510 = vmatmul.mubr.msk.bf16.gmra.mxu0 %vm686_vm0, %v8534_v61 }
 0x39a   :  { %2335 = vmatpush1.bf16.msra.mxu0 %v8541_v55 }
 0x39b   :  { %2336 = vmatprep.subr.bf16.mxu0 %v8546_v59  ;;  %v8607_v59 = vld [vmem:[%s11079_s27 + $0x224] ss:$8 sps:$4 sm:$0xff]  }
 0x39e   :  { %2337 = vmatpush1.bf16.msra.mxu0 %v8544_v51 }
 0x39f   :  { %2338 = vmatprep.subr.bf16.mxu0 %v8549_v53  ;;  %v8605_v53 = vld [vmem:[%s11079_s27 + $0x220] ss:$8 sps:$4 sm:$0xff]  }
 0x3a2   :  { %2339 = vmatpush1.bf16.msra.mxu0 %v8547_v13 }
 0x3a3   :  { %2340 = vmatprep.subr.bf16.mxu0 %v8552_v14  ;;  %v8613_v14 = vld [vmem:[%s11079_s27 + $0x214] ss:$8 sps:$4 sm:$0xff]  }
 0x3a6   :  { %2341 = vmatpush1.bf16.msra.mxu0 %v8550_v19 }
 0x3a7   :  { %2342 = vmatprep.subr.bf16.mxu0 %v8555_v20 }
 0x3aa   :  { %2343 = vmatpush1.bf16.msra.mxu0 %v8553_v1 }
 0x3ab   :  { %2344 = vmatprep.subr.bf16.mxu0 %v8558_v4  ;;  %v8611_v4 = vld [vmem:[%s11079_s27 + $0x210] ss:$8 sps:$4 sm:$0xff]  }
 0x3ae   :  { %2345 = vmatpush1.bf16.msra.mxu0 %v8556_v2  ;;  %v8583_v2 = vld [vmem:[%s11080_s24 + $0x20] sm:$0xff]  }
 0x3af   :  { %2346 = vmatprep.subr.bf16.mxu0 %v8561_v22  ;;  %v8584_v22 = vld [vmem:[%s11080_s24 + $0x28] sm:$0xff]  }
 0x3b2   :  { %2347 = vmatpush2.bf16.msra.mxu0 %v8559_v23  ;;  %v8617_v23 = vld [vmem:[%s11079_s27 + $0x200] ss:$8 sps:$4 sm:$0xff]  }
 0x3b3   :  { %2348 = vmatprep.subr.bf16.mxu0 %v8564_v24  ;;  %v8619_v24 = vld [vmem:[%s11079_s27 + $0x204] ss:$8 sps:$4 sm:$0xff]  }
 0x3b6   :  { %2349 = vmatpush2.bf16.msra.mxu0 %v8562_v25  ;;  %v8620_v25 = vld [vmem:[%s11079_s27 + $0x340] ss:$8 sps:$4 sm:$0xff]  }
 0x3b7   :  { %2350 = vmatprep.subr.bf16.mxu0 %v8567_v9  ;;  %v8622_v9 = vld [vmem:[%s11079_s27 + $0x344] ss:$8 sps:$4 sm:$0xff]  }
 0x3ba   :  { %2351 = vmatpush2.bf16.msra.mxu0 %v8565_v7  ;;  %v8623_v7 = vld [vmem:[%s11079_s27 + $0x2f0] ss:$8 sps:$4 sm:$0xff]  }
 0x3bb   :  { %2352 = vmatprep.subr.bf16.mxu0 %v8570_v26  ;;  %v8625_v26 = vld [vmem:[%s11079_s27 + $0x2f4] ss:$8 sps:$4 sm:$0xff]  }
 0x3be   :  { %2353 = vmatpush2.bf16.msra.mxu0 %v8568_v27  ;;  %v8626_v27 = vld [vmem:[%s11079_s27 + $0x330] ss:$8 sps:$4 sm:$0xff]  }
 0x3bf   :  { %2354 = vmatprep.subr.bf16.mxu0 %v8573_v28  ;;  %v8628_v28 = vld [vmem:[%s11079_s27 + $0x334] ss:$8 sps:$4 sm:$0xff]  }
 0x3c2   :  { %2355 = vmatpush2.bf16.msra.mxu0 %v8571_v29  ;;  %v8629_v29 = vld [vmem:[%s11079_s27 + $0x2e0] ss:$8 sps:$4 sm:$0xff]  }
 0x3c3   :  { %2356 = vmatprep.subr.bf16.mxu0 %v8576_v30  ;;  %v8631_v30 = vld [vmem:[%s11079_s27 + $0x2e4] ss:$8 sps:$4 sm:$0xff]  }
 0x3c6   :  { %2357 = vmatpush2.bf16.msra.mxu0 %v8574_v16  ;;  %v8632_v16 = vld [vmem:[%s11079_s27 + $0x320] ss:$8 sps:$4 sm:$0xff]  }
 0x3c7   :  { %2358 = vmatprep.subr.bf16.mxu0 %v8579_v15  ;;  %v8634_v15 = vld [vmem:[%s11079_s27 + $0x324] ss:$8 sps:$4 sm:$0xff]  }
 0x3ca   :  { %2359 = vmatpush2.bf16.msra.mxu0 %v8577_v37  ;;  %v8637_v37 = vld [vmem:[%s11079_s27 + $0x2d4] ss:$8 sps:$4 sm:$0xff]  }
 0x3cb   :  { %2360 = vmatprep.subr.bf16.mxu0 %v8582_v5  ;;  %v8640_v5 = vld [vmem:[%s11079_s27 + $0x314] ss:$8 sps:$4 sm:$0xff]  }
 0x3ce   :  { %2361 = vmatpush2.bf16.msra.mxu0 %v8580_v17  ;;  %v8635_v17 = vld [vmem:[%s11079_s27 + $0x2d0] ss:$8 sps:$4 sm:$0xff]  }
 0x3cf   :  { %2654 = vmatprep.subr.bf16.mxu0 %v8589_v38  ;;  %v8638_v38 = vld [vmem:[%s11079_s27 + $0x310] ss:$8 sps:$4 sm:$0xff]  }
 0x441   :  { %v1791_v46 = vpop.f32.mrf.mxu0 }
 0x443   :  { %v1793_v12 = vpop.f32.mrf.mxu0 }
 0x445   :  { %v1795_v8 = vpop.f32.mrf.mxu0 }
 0x446   :  { %v1810_v31 = vpack.c.bf16 %v1795_v8, %v1791_v46  ;;  %v8643_v46 = vld [vmem:[%s11079_s27 + $0x2c4] ss:$8 sps:$4 sm:$0xff]   ;;  %v8641_v8 = vld [vmem:[%s11079_s27 + $0x2c0] ss:$8 sps:$4 sm:$0xff]  }
 0x447   :  { %v1797_v10 = vpop.f32.mrf.mxu0 }
 0x448   :  { %v1811_v47 = vpack.c.bf16 %v1797_v10, %v1793_v12  ;;  %v8646_v12 = vld [vmem:[%s11079_s27 + $0x304] ss:$8 sps:$4 sm:$0xff]   ;;  %v8644_v10 = vld [vmem:[%s11079_s27 + $0x300] ss:$8 sps:$4 sm:$0xff]  }
 0x449   :  { %v1801_v32 = vpop.f32.mrf.mxu0 }
 0x44a   :  { %2362 = vmatprep.mubr.bf16.mxu0 %v1811_v47  ;;  %v8649_v47 = vld [vmem:[%s11079_s27 + $0x2b4] ss:$8 sps:$4 sm:$0xff]  }
 0x44b   :  { %v1803_v18 = vpop.f32.mrf.mxu0  ;;  %2363 = vmatmul.mubr.bf16.vlgmr.msra.gmra.mxu0 %v1810_v31  ;;  %v8647_v31 = vld [vmem:[%s11079_s27 + $0x2b0] ss:$8 sps:$4 sm:$0xff]  }
 0x44c   :  { %2655 = vmatpush1.bf16.msra.mxu0 %v8587_v48  ;;  %v8652_v48 = vld [vmem:[%s11079_s27 + $0x3f4] ss:$8 sps:$4 sm:$0xff]  }
 0x44d   :  { %v1805_v3 = vpop.f32.mrf.mxu0  ;;  %2656 = vmatprep.subr.bf16.mxu0 %v8592_v33  ;;  %v8655_v33 = vld [vmem:[%s11079_s27 + $0x2a4] ss:$8 sps:$4 sm:$0xff]  }
 0x44e   :  { %v1812_v56 = vpack.c.bf16 %v1805_v3, %v1801_v32  ;;  %v8650_v32 = vld [vmem:[%s11079_s27 + $0x3f0] ss:$8 sps:$4 sm:$0xff]   ;;  %v8656_v3 = vld [vmem:[%s11079_s27 + $0x3e0] ss:$8 sps:$4 sm:$0xff]  }
 0x44f   :  { %v1807_v35 = vpop.f32.mrf.mxu0 }
 0x450   :  { %v1813_v11 = vpack.c.bf16 %v1807_v35, %v1803_v18  ;;  %2657 = vmatpush1.bf16.msra.mxu0 %v8590_v39  ;;  %v8658_v18 = vld [vmem:[%s11079_s27 + $0x3e4] ss:$8 sps:$4 sm:$0xff]   ;;  %v8653_v39 = vld [vmem:[%s11079_s27 + $0x2a0] ss:$8 sps:$4 sm:$0xff]   ;;  %v8664_v35 = vld [vmem:[%s11079_s27 + $0x3d4] ss:$8 sps:$4 sm:$0xff]  }
 0x451   :  { %v1901_v40 = vpop.f32.mrf.mxu0  ;;  %2658 = vmatprep.subr.bf16.mxu0 %v8595_v34  ;;  %v8661_v34 = vld [vmem:[%s11079_s27 + $0x294] ss:$8 sps:$4 sm:$0xff]  }
 0x452   :  { %2372 = vmatprep.mubr.bf16.mxu0 %v1813_v11  ;;  %v8659_v11 = vld [vmem:[%s11079_s27 + $0x290] ss:$8 sps:$4 sm:$0xff]  }
 0x453   :  { %v1903_v44 = vpop.f32.mrf.mxu0  ;;  %2373 = vmatmul.mubr.bf16.gmra.mxu0 %v1812_v56  ;;  %v8667_v56 = vld [vmem:[%s11079_s27 + $0x284] ss:$8 sps:$4 sm:$0xff]  }
 0x454   :  { %2659 = vmatpush1.bf16.msra.mxu0 %v8593_v36  ;;  %v8662_v36 = vld [vmem:[%s11079_s27 + $0x3d0] ss:$8 sps:$4 sm:$0xff]  }
 0x455   :  { %v1905_v49 = vpop.f32.mrf.mxu0  ;;  %2660 = vmatprep.subr.bf16.mxu0 %v8598_v43  ;;  %v8665_v43 = vld [vmem:[%s11079_s27 + $0x280] ss:$8 sps:$4 sm:$0xff]  }
 0x456   :  { %v1920_v61 = vpack.c.bf16 %v1905_v49, %v1901_v40  ;;  %v8670_v40 = vld [vmem:[%s11079_s27 + $0x3c4] ss:$8 sps:$4 sm:$0xff]   ;;  %v8671_v49 = vld [vmem:[%s11079_s27 + $0x3b0] ss:$8 sps:$4 sm:$0xff]  }
 0x457   :  { %v1907_v54 = vpop.f32.mrf.mxu0 }
 0x458   :  { %v1921_v62 = vpack.c.bf16 %v1907_v54, %v1903_v44  ;;  %2661 = vmatpush1.bf16.msra.mxu0 %v8596_v45  ;;  %v8668_v44 = vld [vmem:[%s11079_s27 + $0x3c0] ss:$8 sps:$4 sm:$0xff]   ;;  %v8673_v45 = vld [vmem:[%s11079_s27 + $0x3b4] ss:$8 sps:$4 sm:$0xff]  }
 0x459   :  { %v1911_v55 = vpop.f32.mrf.mxu0  ;;  %2662 = vmatprep.subr.bf16.mxu0 %v8601_v50  ;;  %v8676_v50 = vld [vmem:[%s11079_s27 + $0x3a4] ss:$8 sps:$4 sm:$0xff]   ;;  %v8674_v54 = vld [vmem:[%s11079_s27 + $0x3a0] ss:$8 sps:$4 sm:$0xff]  }
 0x45a   :  { %2149 = vmatprep.mubr.bf16.mxu1 %v1921_v62  ;;  %v8679_v62 = vld [vmem:[%s11079_s27 + $0x394] ss:$8 sps:$4 sm:$0xff]  }
 0x45b   :  { %v1913_v51 = vpop.f32.mrf.mxu0  ;;  %2150 = vmatmul.mubr.bf16.vlgmr.msra.gmra.mxu1 %v1920_v61  ;;  %v8682_v61 = vld [vmem:[%s11079_s27 + $0x384] ss:$8 sps:$4 sm:$0xff]  }
 0x45c   :  { %2413 = vmatpush1.bf16.msra.mxu1 %v10220_v58  ;;  %2663 = vmatpush1.bf16.msra.mxu0 %v8599_v63  ;;  %v8677_v63 = vld [vmem:[%s11079_s27 + $0x390] ss:$8 sps:$4 sm:$0xff]  }
 0x45d   :  { %2414 = vmatprep.subr.bf16.mxu1 %v10224_v52  ;;  %v1915_v13 = vpop.f32.mrf.mxu0  ;;  %2664 = vmatprep.subr.bf16.mxu0 %v8607_v59  ;;  %v3126_v59 = vld [vmem:[#allocation2 + $0xf8] sm:$0xff] }
 0x45e   :  { %v1922_v1 = vpack.c.bf16 %v1915_v13, %v1911_v55  ;;  %v8680_v55 = vld [vmem:[%s11079_s27 + $0x380] ss:$8 sps:$4 sm:$0xff]  }
 0x45f   :  { %v1917_v19 = vpop.f32.mrf.mxu0 }
 0x460   :  { %v1923_v20 = vpack.c.bf16 %v1917_v19, %v1913_v51  ;;  %2415 = vmatpush1.bf16.msra.mxu1 %v10217_v6  ;;  %2665 = vmatpush1.bf16.msra.mxu0 %v8605_v53 }
 0x461   :  { %2416 = vmatprep.subr.bf16.mxu1 %v10201_v21  ;;  %2666 = vmatprep.subr.bf16.mxu0 %v8613_v14 }
 0x462   :  { %2159 = vmatprep.mubr.bf16.mxu1 %v1923_v20 }
 0x463   :  { %2160 = vmatmul.mubr.bf16.gmra.mxu1 %v1922_v1 }
 0x464   :  { %2417 = vmatpush1.bf16.msra.mxu1 %v10199_v60  ;;  %2436 = vmatprep.mubr.bf16.mxu1 %v9395_v0 }
 0x465   :  { %2418 = vmatprep.subr.bf16.mxu1 %v10195_v42  ;;  %2667 = vmatpush1.bf16.msra.mxu0 %v8611_v4 }
 0x466   :  { %2668 = vmatprep.subr.bf16.mxu0 %v8619_v24  ;;  %v3122_v24 = vld [vmem:[#allocation2 + $0xd8] sm:$0xff] }
 0x468   :  { %2419 = vmatpush1.bf16.msra.mxu1 %v10193_v57 }
 0x469   :  { %2744 = vmatprep.subr.bf16.mxu1 %v10222_v41  ;;  %v8585_v41 = vld [vmem:[%s11080_s24 + $0x30] sm:$0xff]   ;;  %2669 = vmatpush1.bf16.msra.mxu0 %v8617_v23  ;;  %v3123_v23 = vld [vmem:[#allocation2 + $0xe0] sm:$0xff] }
 0x46a   :  { %2670 = vmatprep.subr.bf16.mxu0 %v8625_v26 }
 0x46b   :  { %7613 = vmatmul.mubr.msk.bf16.vlgmr.msra.gmra.mxu1 %vm686_vm0, %v8583_v2 }
 0x46c   :  { %2745 = vmatpush1.bf16.msra.mxu1 %v10220_v58  ;;  %2446 = vmatprep.mubr.bf16.mxu1 %v9395_v0  ;;  %v8604_v58 = vld [vmem:[%s11079_s27 + $0x374] ss:$8 sps:$4 sm:$0xff]  }
 0x46d   :  { %2746 = vmatprep.subr.bf16.mxu1 %v10224_v52  ;;  %v8614_v52 = vld [vmem:[%s11079_s27 + $0x350] ss:$8 sps:$4 sm:$0xff]   ;;  %2671 = vmatpush2.bf16.msra.mxu0 %v8623_v7  ;;  %v3120_v7 = vld [vmem:[#allocation2 + $0xc8] sm:$0xff] }
 0x46e   :  { %2672 = vmatprep.subr.bf16.mxu0 %v8631_v30 }
 0x470   :  { %2747 = vmatpush1.bf16.msra.mxu1 %v10217_v6  ;;  %v8586_v6 = vld [vmem:[%s11080_s24 + $0x38] sm:$0xff]  }
 0x471   :  { %2748 = vmatprep.subr.bf16.mxu1 %v10201_v21  ;;  %v8602_v21 = vld [vmem:[%s11079_s27 + $0x370] ss:$8 sps:$4 sm:$0xff]   ;;  %2673 = vmatpush2.bf16.msra.mxu0 %v8629_v29 }
 0x472   :  { %2674 = vmatprep.subr.bf16.mxu0 %v8637_v37  ;;  %v3118_v29 = vld [vmem:[#allocation2 + $0xb8] sm:$0xff]  ;;  %v3116_v37 = vld [vmem:[#allocation2 + $0xa8] sm:$0xff] }
 0x473   :  { %7614 = vmatmul.mubr.msk.bf16.gmra.mxu1 %vm686_vm0, %v8584_v22 }
 0x474   :  { %2749 = vmatpush1.bf16.msra.mxu1 %v10199_v60  ;;  %2768 = vmatprep.mubr.bf16.mxu1 %v9395_v0  ;;  %v8610_v60 = vld [vmem:[%s11079_s27 + $0x364] ss:$8 sps:$4 sm:$0xff]  }
 0x475   :  { %2750 = vmatprep.subr.bf16.mxu1 %v10195_v42  ;;  %v8608_v42 = vld [vmem:[%s11079_s27 + $0x360] ss:$8 sps:$4 sm:$0xff]   ;;  %2675 = vmatpush2.bf16.msra.mxu0 %v8635_v17 }
 0x476   :  { %2676 = vmatprep.subr.bf16.mxu0 %v8643_v46  ;;  %v3115_v17 = vld [vmem:[#allocation2 + $0xa0] sm:$0xff] }
 0x478   :  { %2751 = vmatpush1.bf16.msra.mxu1 %v10193_v57  ;;  %v8616_v57 = vld [vmem:[%s11079_s27 + $0x354] ss:$8 sps:$4 sm:$0xff]  }
 0x479   :  { %2986 = vmatprep.subr.bf16.mxu1 %v8604_v58  ;;  %2677 = vmatpush2.bf16.msra.mxu0 %v8641_v8 }
 0x47a   :  { %2678 = vmatprep.subr.bf16.mxu0 %v8649_v47 }
 0x47b   :  { %7685 = vmatmul.mubr.msk.bf16.vlgmr.msra.gmra.mxu1 %vm686_vm0, %v8585_v41 }
 0x47c   :  { %2778 = vmatprep.mubr.bf16.mxu1 %v9395_v0  ;;  %2987 = vmatpush1.bf16.msra.mxu1 %v8602_v21 }
 0x47d   :  { %2988 = vmatprep.subr.bf16.mxu1 %v8610_v60  ;;  %2679 = vmatpush2.bf16.msra.mxu0 %v8647_v31 }
 0x47e   :  { %2680 = vmatprep.subr.bf16.mxu0 %v8655_v33 }
 0x480   :  { %2989 = vmatpush1.bf16.msra.mxu1 %v8608_v42 }
 0x481   :  { %2990 = vmatprep.subr.bf16.mxu1 %v8616_v57  ;;  %2681 = vmatpush2.bf16.msra.mxu0 %v8653_v39  ;;  %v3125_v57 = vld [vmem:[#allocation2 + $0xf0] sm:$0xff] }
 0x482   :  { %2682 = vmatprep.subr.bf16.mxu0 %v8661_v34  ;;  %v3111_v34 = vld [vmem:[#allocation2 + $0x80] sm:$0xff] }
 0x483   :  { %7686 = vmatmul.mubr.msk.bf16.gmra.mxu1 %vm686_vm0, %v8586_v6  ;;  %v3124_v6 = vld [vmem:[#allocation2 + $0xe8] sm:$0xff] }
 0x484   :  { %2991 = vmatpush1.bf16.msra.mxu1 %v8614_v52 }
 0x485   :  { %2992 = vmatprep.subr.bf16.mxu1 %v8622_v9  ;;  %2683 = vmatpush2.bf16.msra.mxu0 %v8659_v11  ;;  %v3121_v9 = vld [vmem:[#allocation2 + $0xd0] sm:$0xff] }
 0x486   :  { %2684 = vmatprep.subr.bf16.mxu0 %v8667_v56  ;;  %v3109_v11 = vld [vmem:[#allocation2 + $0x70] sm:$0xff]  ;;  %v3107_v56 = vld [vmem:[#allocation2 + $0x60] sm:$0xff] }
 0x488   :  { %2993 = vmatpush1.bf16.msra.mxu1 %v8620_v25 }
 0x489   :  { %2994 = vmatprep.subr.bf16.mxu1 %v8628_v28  ;;  %2685 = vmatpush2.bf16.msra.mxu0 %v8665_v43  ;;  %v3105_v43 = vld [vmem:[#allocation2 + $0x50] sm:$0xff] }
 0x48a   :  { %3159 = vmatprep.subr.mxu0 %v3126_v59 }
 0x48c   :  { %2995 = vmatpush1.bf16.msra.mxu1 %v8626_v27  ;;  %v3119_v27 = vld [vmem:[#allocation2 + $0xc0] sm:$0xff] }
 0x48d   :  { %2996 = vmatprep.subr.bf16.mxu1 %v8634_v15  ;;  %v3117_v15 = vld [vmem:[#allocation2 + $0xb0] sm:$0xff] }
 0x490   :  { %2997 = vmatpush1.bf16.msra.mxu1 %v8632_v16 }
 0x491   :  { %2998 = vmatprep.subr.bf16.mxu1 %v8640_v5 }
 0x494   :  { %2999 = vmatpush1.bf16.msra.mxu1 %v8638_v38  ;;  %v3114_v38 = vld [vmem:[#allocation2 + $0x98] sm:$0xff] }
 0x495   :  { %3000 = vmatprep.subr.bf16.mxu1 %v8646_v12  ;;  %v3113_v12 = vld [vmem:[#allocation2 + $0x90] sm:$0xff] }
 0x498   :  { %3001 = vmatpush1.bf16.msra.mxu1 %v8644_v10 }
 0x499   :  { %3002 = vmatprep.subr.bf16.mxu1 %v8652_v48 }
 0x49c   :  { %3003 = vmatpush2.bf16.msra.mxu1 %v8650_v32 }
 0x49d   :  { %3004 = vmatprep.subr.bf16.mxu1 %v8658_v18 }
 0x4a0   :  { %3005 = vmatpush2.bf16.msra.mxu1 %v8656_v3  ;;  %v3112_v3 = vld [vmem:[#allocation2 + $0x88] sm:$0xff] }
 0x4a1   :  { %3006 = vmatprep.subr.bf16.mxu1 %v8664_v35  ;;  %v3110_v35 = vld [vmem:[#allocation2 + $0x78] sm:$0xff] }
 0x4a4   :  { %3007 = vmatpush2.bf16.msra.mxu1 %v8662_v36  ;;  %v3108_v36 = vld [vmem:[#allocation2 + $0x68] sm:$0xff] }
 0x4a5   :  { %3008 = vmatprep.subr.bf16.mxu1 %v8670_v40  ;;  %v3106_v40 = vld [vmem:[#allocation2 + $0x58] sm:$0xff] }
 0x4a8   :  { %3009 = vmatpush2.bf16.msra.mxu1 %v8668_v44  ;;  %v3104_v44 = vld [vmem:[#allocation2 + $0x48] sm:$0xff] }
 0x4a9   :  { %3010 = vmatprep.subr.bf16.mxu1 %v8673_v45  ;;  %v3103_v45 = vld [vmem:[#allocation2 + $0x40] sm:$0xff] }
 0x4ac   :  { %3011 = vmatpush2.bf16.msra.mxu1 %v8671_v49  ;;  %v3102_v49 = vld [vmem:[#allocation2 + $0x38] sm:$0xff] }
 0x4ad   :  { %3012 = vmatprep.subr.bf16.mxu1 %v8676_v50  ;;  %v3101_v50 = vld [vmem:[#allocation2 + $0x30] sm:$0xff] }
 0x4b0   :  { %3013 = vmatpush2.bf16.msra.mxu1 %v8674_v54  ;;  %v3100_v54 = vld [vmem:[#allocation2 + $0x28] sm:$0xff] }
 0x4b1   :  { %3014 = vmatprep.subr.bf16.mxu1 %v8679_v62  ;;  %v3099_v62 = vld [vmem:[#allocation2 + $0x20] sm:$0xff] }
 0x4b4   :  { %3015 = vmatpush2.bf16.msra.mxu1 %v8677_v63  ;;  %v3098_v63 = vld [vmem:[#allocation2 + $0x18] sm:$0xff] }
 0x4b5   :  { %3016 = vmatprep.subr.bf16.mxu1 %v8682_v61  ;;  %v3097_v61 = vld [vmem:[#allocation2 + $0x10] sm:$0xff] }
 0x4b8   :  { %3017 = vmatpush2.bf16.msra.mxu1 %v8680_v55  ;;  %v3096_v55 = vld [vmem:[#allocation2 + $0x8] sm:$0xff] }
 0x4b9   :  { %3230 = vmatprep.subr.mxu1 %v3126_v59  ;;  %v3095_v59 = vld [vmem:[#allocation2] sm:$0xff] }
 0x51b   :  { %v10585_v51 = vpop.f32.mrf.mxu1 }
 0x51d   :  { %v10587_v53 = vpop.f32.mrf.mxu1 }
 0x51f   :  { %v10589_v13 = vpop.f32.mrf.mxu1 }
 0x521   :  { %v10591_v14 = vpop.f32.mrf.mxu1 }
 0x523   :  { %v10593_v19 = vpop.f32.mrf.mxu1 }
 0x525   :  { %v10595_v20 = vpop.f32.mrf.mxu1 }
 0x527   :  { %v10597_v1 = vpop.f32.mrf.mxu1 }
 0x529   :  { %v10599_v4 = vpop.f32.mrf.mxu1 }
 0x52b   :  { %v2438_v2 = vpop.f32.mrf.mxu1 }
 0x52d   :  { %v2440_v22 = vpop.f32.mrf.mxu1 }
 0x52f   :  { %v2442_v58 = vpop.f32.mrf.mxu1 }
 0x530   :  { %v2457_v60 = vpack.c.bf16 %v2442_v58, %v2438_v2  ;;  %v3158_v2 = vld [vmem:[#allocation2 + $0x1f8] sm:$0xff]  ;;  %v3156_v58 = vld [vmem:[#allocation2 + $0x1e8] sm:$0xff] }
 0x531   :  { %v2444_v41 = vpop.f32.mrf.mxu1 }
 0x532   :  { %v2458_v21 = vpack.c.bf16 %v2444_v41, %v2440_v22  ;;  %v3157_v22 = vld [vmem:[#allocation2 + $0x1f0] sm:$0xff]  ;;  %v3155_v41 = vld [vmem:[#allocation2 + $0x1e0] sm:$0xff] }
 0x533   :  { %v2448_v42 = vpop.f32.mrf.mxu1 }
 0x534   :  { %2686 = vmatprep.mubr.bf16.mxu0 %v2458_v21  ;;  %v3154_v21 = vld [vmem:[#allocation2 + $0x1d8] sm:$0xff] }
 0x535   :  { %v2450_v52 = vpop.f32.mrf.mxu1  ;;  %2687 = vmatmul.mubr.bf16.vlgmr.msra.gmra.mxu0 %v2457_v60  ;;  %v3153_v60 = vld [vmem:[#allocation2 + $0x1d0] sm:$0xff] }
 0x536   :  { %3160 = vmatpush1.msra.mxu0 %v3125_v57 }
 0x537   :  { %v2452_v25 = vpop.f32.mrf.mxu1  ;;  %3161 = vmatprep.subr.mxu0 %v3124_v6 }
 0x538   :  { %3162 = vmatpush1.msra.mxu0 %v3123_v23  ;;  %v2459_v30 = vpack.c.bf16 %v2452_v25, %v2448_v42  ;;  %v3152_v42 = vld [vmem:[#allocation2 + $0x1c8] sm:$0xff]  ;;  %v3146_v25 = vld [vmem:[#allocation2 + $0x198] sm:$0xff] }
 0x539   :  { %v2454_v26 = vpop.f32.mrf.mxu1  ;;  %3163 = vmatprep.subr.mxu0 %v3122_v24 }
 0x53a   :  { %v2460_v28 = vpack.c.bf16 %v2454_v26, %v2450_v52  ;;  %3164 = vmatpush1.msra.mxu0 %v3121_v9  ;;  %v3149_v52 = vld [vmem:[#allocation2 + $0x1b0] sm:$0xff]  ;;  %v3143_v26 = vld [vmem:[#allocation2 + $0x180] sm:$0xff] }
 0x53b   :  { %v2770_v16 = vpop.f32.mrf.mxu1  ;;  %3165 = vmatprep.subr.mxu0 %v3120_v7 }
 0x53c   :  { %2696 = vmatprep.mubr.bf16.mxu0 %v2460_v28  ;;  %3166 = vmatpush1.msra.mxu0 %v3119_v27  ;;  %v3141_v28 = vld [vmem:[#allocation2 + $0x170] sm:$0xff] }
 0x53d   :  { %2697 = vmatmul.mubr.bf16.gmra.mxu0 %v2459_v30  ;;  %v2772_v5 = vpop.f32.mrf.mxu1  ;;  %3167 = vmatprep.subr.mxu0 %v3118_v29  ;;  %v3139_v30 = vld [vmem:[#allocation2 + $0x160] sm:$0xff] }
 0x53e   :  { %3168 = vmatpush1.msra.mxu0 %v3117_v15 }
 0x53f   :  { %v2774_v46 = vpop.f32.mrf.mxu1  ;;  %3169 = vmatprep.subr.mxu0 %v3116_v37 }
 0x540   :  { %3170 = vmatpush1.msra.mxu0 %v3115_v17  ;;  %v2789_v47 = vpack.c.bf16 %v2774_v46, %v2770_v16  ;;  %v3138_v16 = vld [vmem:[#allocation2 + $0x158] sm:$0xff]  ;;  %v3132_v46 = vld [vmem:[#allocation2 + $0x128] sm:$0xff] }
 0x541   :  { %v2776_v8 = vpop.f32.mrf.mxu1  ;;  %3171 = vmatprep.subr.mxu0 %v3114_v38 }
 0x542   :  { %v2790_v10 = vpack.c.bf16 %v2776_v8, %v2772_v5  ;;  %3172 = vmatpush1.msra.mxu0 %v3113_v12  ;;  %v3135_v5 = vld [vmem:[#allocation2 + $0x140] sm:$0xff]  ;;  %v3130_v8 = vld [vmem:[#allocation2 + $0x118] sm:$0xff] }
 0x543   :  { %v2780_v48 = vpop.f32.mrf.mxu1  ;;  %3173 = vmatprep.subr.mxu0 %v3112_v3 }
 0x544   :  { %3018 = vmatprep.mubr.bf16.mxu1 %v2790_v10  ;;  %3174 = vmatpush1.msra.mxu0 %v3111_v34  ;;  %v3129_v10 = vld [vmem:[#allocation2 + $0x110] sm:$0xff] }
 0x545   :  { %v2782_v31 = vpop.f32.mrf.mxu1  ;;  %3019 = vmatmul.mubr.bf16.vlgmr.msra.gmra.mxu1 %v2789_v47  ;;  %3175 = vmatprep.subr.mxu0 %v3110_v35  ;;  %v3128_v47 = vld [vmem:[#allocation2 + $0x108] sm:$0xff] }
 0x546   :  { %3231 = vmatpush1.msra.mxu1 %v3125_v57  ;;  %3176 = vmatpush1.msra.mxu0 %v3109_v11  ;;  %v3151_v57 = vld [vmem:[#allocation2 + $0x1c0] sm:$0xff] }
 0x547   :  { %v2784_v32 = vpop.f32.mrf.mxu1  ;;  %3232 = vmatprep.subr.mxu1 %v3124_v6  ;;  %3177 = vmatprep.subr.mxu0 %v3108_v36  ;;  %v3150_v6 = vld [vmem:[#allocation2 + $0x1b8] sm:$0xff] }
 0x548   :  { %3233 = vmatpush1.msra.mxu1 %v3123_v23  ;;  %v2791_v39 = vpack.c.bf16 %v2784_v32, %v2780_v48  ;;  %3178 = vmatpush1.msra.mxu0 %v3107_v56  ;;  %v3148_v23 = vld [vmem:[#allocation2 + $0x1a8] sm:$0xff]  ;;  %v3127_v48 = vld [vmem:[#allocation2 + $0x100] sm:$0xff] }
 0x549   :  { %v2786_v33 = vpop.f32.mrf.mxu1  ;;  %3234 = vmatprep.subr.mxu1 %v3122_v24  ;;  %3179 = vmatprep.subr.mxu0 %v3106_v40  ;;  %v3147_v24 = vld [vmem:[#allocation2 + $0x1a0] sm:$0xff] }
 0x54a   :  { %v2792_v18 = vpack.c.bf16 %v2786_v33, %v2782_v31  ;;  %3235 = vmatpush1.msra.mxu1 %v3121_v9  ;;  %3180 = vmatpush1.msra.mxu0 %v3105_v43  ;;  %v3145_v9 = vld [vmem:[#allocation2 + $0x190] sm:$0xff]  ;;  %v2364_v31 = vpop.f32.mrf.mxu0 }
 0x54b   :  { %3236 = vmatprep.subr.mxu1 %v3120_v7  ;;  %3181 = vmatprep.subr.mxu0 %v3104_v44  ;;  %v3144_v7 = vld [vmem:[#allocation2 + $0x188] sm:$0xff] }
 0x54c   :  { %3028 = vmatprep.mubr.bf16.mxu1 %v2792_v18  ;;  %3237 = vmatpush1.msra.mxu1 %v3119_v27  ;;  %v3142_v27 = vld [vmem:[#allocation2 + $0x178] sm:$0xff]  ;;  %v2366_v32 = vpop.f32.mrf.mxu0 }
 0x54d   :  { %3029 = vmatmul.mubr.bf16.gmra.mxu1 %v2791_v39  ;;  %3238 = vmatprep.subr.mxu1 %v3118_v29  ;;  %v3140_v29 = vld [vmem:[#allocation2 + $0x168] sm:$0xff] }
 0x54e   :  { %3239 = vmatpush1.msra.mxu1 %v3117_v15  ;;  %3182 = vmatpush1.msra.mxu0 %v3103_v45  ;;  %v3137_v15 = vld [vmem:[#allocation2 + $0x150] sm:$0xff]  ;;  %v2368_v33 = vpop.f32.mrf.mxu0 }
 0x54f   :  { %3240 = vmatprep.subr.mxu1 %v3116_v37  ;;  %3183 = vmatprep.subr.mxu0 %v3102_v49  ;;  %v3136_v37 = vld [vmem:[#allocation2 + $0x148] sm:$0xff] }
 0x550   :  { %3241 = vmatpush1.msra.mxu1 %v3115_v17  ;;  %3184 = vmatpush1.msra.mxu0 %v3101_v50  ;;  %v3134_v17 = vld [vmem:[#allocation2 + $0x138] sm:$0xff]  ;;  %v2370_v18 = vpop.f32.mrf.mxu0 }
 0x551   :  { %3242 = vmatprep.subr.mxu1 %v3114_v38  ;;  %3185 = vmatprep.subr.mxu0 %v3100_v54  ;;  %v3133_v38 = vld [vmem:[#allocation2 + $0x130] sm:$0xff] }
 0x552   :  { %3243 = vmatpush1.msra.mxu1 %v3113_v12  ;;  %3186 = vmatpush1.msra.mxu0 %v3099_v62  ;;  %v3131_v12 = vld [vmem:[#allocation2 + $0x120] sm:$0xff]  ;;  %v2374_v39 = vpop.f32.mrf.mxu0 }
 0x553   :  { %3244 = vmatprep.subr.mxu1 %v3112_v3  ;;  %3187 = vmatprep.subr.mxu0 %v3098_v63 }
 0x554   :  { %3245 = vmatpush1.msra.mxu1 %v3111_v34  ;;  %3188 = vmatpush1.msra.mxu0 %v3097_v61  ;;  %v2376_v3 = vpop.f32.mrf.mxu0 }
 0x555   :  { %3246 = vmatprep.subr.mxu1 %v3110_v35  ;;  %3189 = vmatprep.subr.mxu0 %v3096_v55 }
 0x556   :  { %3247 = vmatpush1.msra.mxu1 %v3109_v11  ;;  %3190 = vmatpush1.msra.mxu0 %v3095_v59  ;;  %v2378_v34 = vpop.f32.mrf.mxu0 }
 0x557   :  { %3248 = vmatprep.subr.mxu1 %v3108_v36  ;;  %3191 = vmatprep.subr.mxu0 %v3158_v2 }
 0x558   :  { %3249 = vmatpush1.msra.mxu1 %v3107_v56  ;;  %3192 = vmatpush2.msra.mxu0 %v3157_v22  ;;  %v2380_v35 = vpop.f32.mrf.mxu0 }
 0x559   :  { %3250 = vmatprep.subr.mxu1 %v3106_v40  ;;  %3193 = vmatprep.subr.mxu0 %v3156_v58 }
 0x55a   :  { %3251 = vmatpush1.msra.mxu1 %v3105_v43  ;;  %3194 = vmatpush2.msra.mxu0 %v3155_v41 }
 0x55b   :  { %3252 = vmatprep.subr.mxu1 %v3104_v44  ;;  %3195 = vmatprep.subr.mxu0 %v3154_v21 }
 0x55c   :  { %3253 = vmatpush1.msra.mxu1 %v3103_v45  ;;  %3196 = vmatpush2.msra.mxu0 %v3153_v60  ;;  %v2369_v45 = vadd.f32 %v2368_v33, %v10589_v13 }
 0x55d   :  { %3254 = vmatprep.subr.mxu1 %v3102_v49  ;;  %3197 = vmatprep.subr.mxu0 %v3152_v42 }
 0x55e   :  { %3255 = vmatpush1.msra.mxu1 %v3101_v50  ;;  %3198 = vmatpush2.msra.mxu0 %v3151_v57  ;;  %v2365_v50 = vadd.f32 %v2364_v31, %v10585_v51  ;;  %v2377_v51 = vadd.f32 %v2376_v3, %v10595_v20 }
 0x55f   :  { %3256 = vmatprep.subr.mxu1 %v3100_v54  ;;  %3199 = vmatprep.subr.mxu0 %v3150_v6 }
 0x560   :  { %3257 = vmatpush1.msra.mxu1 %v3099_v62  ;;  %3200 = vmatpush2.msra.mxu0 %v3149_v52  ;;  %v2371_v62 = vadd.f32 %v2370_v18, %v10591_v14 }
 0x561   :  { %3258 = vmatprep.subr.mxu1 %v3098_v63  ;;  %3201 = vmatprep.subr.mxu0 %v3148_v23 }
 0x562   :  { %3259 = vmatpush1.msra.mxu1 %v3097_v61  ;;  %3202 = vmatpush2.msra.mxu0 %v3147_v24  ;;  %v2367_v61 = vadd.f32 %v2366_v32, %v10587_v53 }
 0x563   :  { %3260 = vmatprep.subr.mxu1 %v3096_v55  ;;  %3203 = vmatprep.subr.mxu0 %v3146_v25 }
 0x564   :  { %3261 = vmatpush1.msra.mxu1 %v3095_v59  ;;  %3204 = vmatpush2.msra.mxu0 %v3145_v9 }
 0x565   :  { %3262 = vmatprep.subr.mxu1 %v3158_v2  ;;  %3205 = vmatprep.subr.mxu0 %v3144_v7  ;;  %v2375_v2 = vadd.f32 %v2374_v39, %v10593_v19  ;;  %v2379_v19 = vadd.f32 %v2378_v34, %v10597_v1 }
 0x566   :  { %3263 = vmatpush2.msra.mxu1 %v3157_v22  ;;  %3206 = vmatpush2.msra.mxu0 %v3143_v26 }
 0x567   :  { %3264 = vmatprep.subr.mxu1 %v3156_v58  ;;  %3207 = vmatprep.subr.mxu0 %v3142_v27 }
 0x568   :  { %3265 = vmatpush2.msra.mxu1 %v3155_v41  ;;  %3208 = vmatpush2.msra.mxu0 %v3141_v28 }
 0x569   :  { %3266 = vmatprep.subr.mxu1 %v3154_v21  ;;  %3209 = vmatprep.subr.mxu0 %v3140_v29 }
 0x56a   :  { %3267 = vmatpush2.msra.mxu1 %v3153_v60  ;;  %3210 = vmatpush2.msra.mxu0 %v3139_v30 }
 0x56b   :  { %3268 = vmatprep.subr.mxu1 %v3152_v42  ;;  %3211 = vmatprep.subr.mxu0 %v3138_v16 }
 0x56c   :  { %3269 = vmatpush2.msra.mxu1 %v3151_v57  ;;  %3212 = vmatpush2.msra.mxu0 %v3137_v15 }
 0x56d   :  { %3270 = vmatprep.subr.mxu1 %v3150_v6  ;;  %3213 = vmatprep.subr.mxu0 %v3136_v37 }
 0x56e   :  { %3271 = vmatpush2.msra.mxu1 %v3149_v52  ;;  %3214 = vmatpush2.msra.mxu0 %v3135_v5 }
 0x56f   :  { %3272 = vmatprep.subr.mxu1 %v3148_v23  ;;  %3215 = vmatprep.subr.mxu0 %v3134_v17 }
 0x570   :  { %3273 = vmatpush2.msra.mxu1 %v3147_v24  ;;  %3216 = vmatpush2.msra.mxu0 %v3133_v38 }
 0x571   :  { %3274 = vmatprep.subr.mxu1 %v3146_v25  ;;  %3217 = vmatprep.subr.mxu0 %v3132_v46  ;;  %v2381_v25 = vadd.f32 %v2380_v35, %v10599_v4 }
 0x572   :  { %3275 = vmatpush2.msra.mxu1 %v3145_v9  ;;  %3218 = vmatpush2.msra.mxu0 %v3131_v12 }
 0x573   :  { %3276 = vmatprep.subr.mxu1 %v3144_v7  ;;  %3219 = vmatprep.subr.mxu0 %v3130_v8 }
 0x574   :  { %3277 = vmatpush2.msra.mxu1 %v3143_v26  ;;  %3220 = vmatpush2.msra.mxu0 %v3129_v10 }
 0x575   :  { %3278 = vmatprep.subr.mxu1 %v3142_v27  ;;  %3221 = vmatprep.subr.mxu0 %v3128_v47 }
 0x576   :  { %3279 = vmatpush2.msra.mxu1 %v3141_v28  ;;  %3222 = vmatpush2.msra.mxu0 %v3127_v48 }
 0x577   :  { %3280 = vmatprep.subr.mxu1 %v3140_v29 }
 0x578   :  { %3281 = vmatpush2.msra.mxu1 %v3139_v30 }
 0x579   :  { %3282 = vmatprep.subr.mxu1 %v3138_v16 }
 0x57a   :  { %3283 = vmatpush2.msra.mxu1 %v3137_v15 }
 0x57b   :  { %3284 = vmatprep.subr.mxu1 %v3136_v37 }
 0x57c   :  { %3285 = vmatpush2.msra.mxu1 %v3135_v5 }
 0x57d   :  { %3286 = vmatprep.subr.mxu1 %v3134_v17 }
 0x57e   :  { %3287 = vmatpush2.msra.mxu1 %v3133_v38 }
 0x57f   :  { %3288 = vmatprep.subr.mxu1 %v3132_v46 }
 0x580   :  { %3289 = vmatpush2.msra.mxu1 %v3131_v12 }
 0x581   :  { %3290 = vmatprep.subr.mxu1 %v3130_v8 }
 0x582   :  { %3291 = vmatpush2.msra.mxu1 %v3129_v10 }
 0x583   :  { %3292 = vmatprep.subr.mxu1 %v3128_v47 }
 0x584   :  { %3293 = vmatpush2.msra.mxu1 %v3127_v48 }
 0x5f5   :  { %v2688_v11 = vpop.f32.mrf.mxu0 }
 0x5f6   :  { %v2707_v55 = vadd.f32 %v2688_v11, %v2365_v50 }
 0x5f7   :  { %v2690_v36 = vpop.f32.mrf.mxu0 }
 0x5f8   :  { %v2708_v21 = vadd.f32 %v2690_v36, %v2367_v61 }
 0x5f9   :  { %v2692_v56 = vpop.f32.mrf.mxu0 }
 0x5fa   :  { %v2709_v63 = vadd.f32 %v2692_v56, %v2369_v45 }
 0x5fb   :  { %v2694_v40 = vpop.f32.mrf.mxu0 }
 0x5fc   :  { %v2710_v22 = vadd.f32 %v2694_v40, %v2371_v62 }
 0x5fd   :  { %v2698_v43 = vpop.f32.mrf.mxu0 }
 0x5fe   :  { %v2711_v42 = vadd.f32 %v2698_v43, %v2375_v2 }
 0x5ff   :  { %v2700_v49 = vpop.f32.mrf.mxu0 }
 0x600   :  { %v2712_v52 = vadd.f32 %v2700_v49, %v2377_v51 }
 0x601   :  { %v2702_v58 = vpop.f32.mrf.mxu0 }
 0x602   :  { %v2713_v26 = vadd.f32 %v2702_v58, %v2379_v19 }
 0x603   :  { %v2704_v23 = vpop.f32.mrf.mxu0 }
 0x604   :  { %v2714_v29 = vadd.f32 %v2704_v23, %v2381_v25 }
 0x605   :  { %v3020_v44 = vpop.f32.mrf.mxu1 }
 0x606   :  { %v10608_v60 = vadd.f32 %v3020_v44, %v2707_v55 }
 0x607   :  { %v3022_v54 = vpop.f32.mrf.mxu1 }
 0x608   :  { %v10613_v14 = vadd.f32 %v3022_v54, %v2708_v21  ;;  %v3067_v20 = vmul.f32 %v10608_v60, %v10608_v60 }
 0x609   :  { %v3024_v59 = vpop.f32.mrf.mxu1 }
 0x60a   :  { %v10606_v41 = vadd.f32 %v3024_v59, %v2709_v63  ;;  %v3068_v4 = vmul.f32 %v10613_v14, %v10613_v14 }
 0x60b   :  { %v3026_v13 = vpop.f32.mrf.mxu1 }
 0x60c   :  { %v10611_v57 = vadd.f32 %v3026_v13, %v2710_v22  ;;  %v3069_v53 = vmul.f32 %v10606_v41, %v10606_v41  ;;  %v3047_v27 = vadd.f32 %v10606_v41, %v10608_v60 }
 0x60d   :  { %v3030_v6 = vpop.f32.mrf.mxu1 }
 0x60e   :  { %v10618_v24 = vadd.f32 %v3030_v6, %v2711_v42  ;;  %v3070_v9 = vmul.f32 %v10611_v57, %v10611_v57  ;;  %v3075_v30 = vadd.f32 %v3069_v53, %v3067_v20  ;;  %v3056_v15 = vadd.f32 %v10611_v57, %v10613_v14 }
 0x60f   :  { %v3032_v7 = vpop.f32.mrf.mxu1 }
 0x610   :  { %v3071_v1 = vmul.f32 %v10618_v24, %v10618_v24  ;;  %v10629_v28 = vadd.f32 %v3032_v7, %v2712_v52  ;;  %v3048_v37 = vadd.f32 %v3047_v27, %v10618_v24  ;;  %v3084_v38 = vadd.f32 %v3070_v9, %v3068_v4 }
 0x611   :  { %v3034_v16 = vpop.f32.mrf.mxu1  ;;  %v9396_v4 = vmov 1966171168  }
 0x612   :  { %v3072_v5 = vmul.f32 %v10629_v28, %v10629_v28  ;;  %v10638_v17 = vadd.f32 %v3034_v16, %v2713_v26  ;;  %v3076_v46 = vadd.f32 %v3075_v30, %v3071_v1  ;;  %v3057_v8 = vadd.f32 %v3056_v15, %v10629_v28 }
 0x613   :  { %v3036_v12 = vpop.f32.mrf.mxu1  ;;  %v3314_v30 = vunpack.c.l.s4 %v9396_v4  ;;  %v3316_v16 = vlaneseq }
 0x614   :  { %v3049_v10 = vadd.f32 %v3048_v37, %v10638_v17  ;;  %v3073_v47 = vmul.f32 %v10638_v17, %v10638_v17  ;;  %v10644_v48 = vadd.f32 %v3036_v12, %v2714_v29  ;;  %v3085_v31 = vadd.f32 %v3084_v38, %v3072_v5 }
 0x615   :  { %v3315_v15 = vunpack.c.0.s8 %v3314_v30  ;;  %v3317_v37 = vshrl.u32 %v3316_v16, 7  ;;  %v8683_v30 = vld [vmem:[#allocation6 + $0x8] sm:$0xff]   ;;  %v8687_v16 = vld [vmem:[#allocation6] sm:$0xff]  }
 0x616   :  { %v3050_v32 = vrot.slane %v3049_v10, 4  ;;  %v3077_v33 = vadd.f32 %v3076_v46, %v3073_v47  ;;  %v3058_v18 = vadd.f32 %v3057_v8, %v10644_v48  ;;  %v3074_v39 = vmul.f32 %v10644_v48, %v10644_v48 }
 0x617   :  { %v10651_v38 = vsub.s32 %v3315_v15, %v3317_v37  ;;  %v8684_v15 = vld [vmem:[#allocation7 + $0x170] ss:$8 sps:$4 sm:$0xff]  }
 0x618   :  { %v3051_v3 = vadd.f32 %v3050_v32, %v3049_v10  ;;  %v3078_v34 = vrot.slane %v3077_v33, 4  ;;  %v3059_v35 = vrot.slane %v3058_v18, 4  ;;  %v3086_v11 = vadd.f32 %v3085_v31, %v3074_v39  ;;  %v3305_v10 = vld [vmem:[%s11051_s6] sm:$0x3] }
 0x619   :  { %v10658_v31 = vsub.s32 0, %v3317_v37  ;;  %v10660_v32 = vsub.s32 1, %v3317_v37  ;;  %v8733_v37 = vld [vmem:[#allocation7 + $0x70] ss:$8 sps:$4 sm:$0xff]  }
 0x61a   :  { %v3052_v36 = vrot.slane %v3051_v3, 2  ;;  %v3079_v56 = vadd.f32 %v3078_v34, %v3077_v33  ;;  %v3060_v40 = vadd.f32 %v3059_v35, %v3058_v18  ;;  %v3087_v43 = vrot.slane %v3086_v11, 4 }
 0x61c   :  { %v3053_v44 = vadd.f32 %v3052_v36, %v3051_v3  ;;  %v3080_v45 = vrot.slane %v3079_v56, 2  ;;  %v3061_v49 = vrot.slane %v3060_v40, 2  ;;  %v3088_v50 = vadd.f32 %v3087_v43, %v3086_v11  ;;  %v3329_v36 = vld [vmem:[#allocation4] sm:$0x3] }
 0x61e   :  { %v3054_v54 = vrot.slane %v3053_v44, 1  ;;  %v3081_v62 = vadd.f32 %v3080_v45, %v3079_v56  ;;  %v3062_v63 = vadd.f32 %v3061_v49, %v3060_v40  ;;  %v3089_v61 = vrot.slane %v3088_v50, 2 }
 0x620   :  { %v3082_v55 = vrot.slane %v3081_v62, 1  ;;  %v3063_v59 = vrot.slane %v3062_v63, 1  ;;  %v3090_v2 = vadd.f32 %v3089_v61, %v3088_v50  ;;  %v3055_v22 = vadd.f32 %v3054_v54, %v3053_v44 }
 0x622   :  { %v3064_v58 = vadd.f32 %v3063_v59, %v3062_v63  ;;  %v3091_v21 = vrot.slane %v3090_v2, 1  ;;  %v3083_v13 = vadd.f32 %v3082_v55, %v3081_v62  ;;  %v3065_v53 = vmul.f32 0.03125, %v3055_v22 }
 0x624   :  { %v3066_v51 = vmul.f32 0.03125, %v3064_v58  ;;  %v3092_v42 = vadd.f32 %v3091_v21, %v3090_v2  ;;  %v3093_v19 = vmul.f32 0.03125, %v3083_v13 }
 0x626   :  { %3223 = vmatprep.mubr.f32.mxu0 %v3066_v51  ;;  %v3094_v6 = vmul.f32 0.03125, %v3092_v42 }
 0x627   :  { %3224 = vmatmul.mubr.f32.vlgmr.msra.gmra.mxu0 %v3065_v53 }
 0x628   :  { %3294 = vmatprep.mubr.f32.mxu1 %v3094_v6  ;;  %3540 = vmatprep.mubr.bf16.mxu0 %v9395_v0 }
 0x629   :  { %3295 = vmatmul.mubr.f32.vlgmr.msra.gmra.mxu1 %v3093_v19 }
 0x62a   :  { %3452 = vmatprep.mubr.bf16.mxu1 %v9395_v0 }
 0x6e7   :  { %v3225_v52 = vpop.f32.mrf.mxu0 }
 0x6e8   :  { %v3301_v23 = vmul.f32 %v3225_v52, %v3225_v52 }
 0x6e9   :  { %v3227_v25 = vpop.f32.mrf.mxu0  ;;  %v3296_v20 = vpop.f32.mrf.mxu1 }
 0x6ea   :  { %v3302_v9 = vmul.f32 %v3227_v25, %v3227_v25  ;;  %v3303_v7 = vsub.f32 %v3296_v20, %v3301_v23 }
 0x6eb   :  { %v3298_v26 = vpop.f32.mrf.mxu1 }
 0x6ec   :  { %v3306_v27 = vadd.f32 1e-05, %v3303_v7  ;;  %v3304_v1 = vsub.f32 %v3298_v26, %v3302_v9 }
 0x6ee   :  { %v3307_v29 = vadd.f32 1e-05, %v3304_v1  ;;  %9135 = vrsqrt.f32 %v3306_v27  ;;  %v8686_v1 = vld [vmem:[#allocation7 + $0x174] ss:$8 sps:$4 sm:$0xff]  }
 0x6f0   :  { %9137 = vrsqrt.f32 %v3307_v29  ;;  %v8735_v29 = vld [vmem:[#allocation7 + $0x74] ss:$8 sps:$4 sm:$0xff]  }
 0x6fb   :  { %v9136_v5 = vpop.eup %9135 }
 0x6fd   :  { %v9138_v46 = vpop.eup %9137 }
 0x6fe   :  { %v3312_v12 = vcombine.low %v9136_v5, %v9138_v46  ;;  %v8690_v5 = vld [vmem:[#allocation7 + $0x164] ss:$8 sps:$4 sm:$0xff]  }
 0x6ff   :  { %v8738_v46 = vld [vmem:[#allocation7 + $0x64] ss:$8 sps:$4 sm:$0xff]  }
 0x700   :  { %v3319_v8 = vrot.slane %v3312_v12, %v10651_v38  ;;  %v8688_v12 = vld [vmem:[#allocation7 + $0x160] ss:$8 sps:$4 sm:$0xff]  }
 0x702   :  { %v3326_v47 = vrot.slane %v3319_v8, %v10651_v38  ;;  %v8736_v8 = vld [vmem:[#allocation7 + $0x60] ss:$8 sps:$4 sm:$0xff]  }
 0x704   :  { %v3328_v33 = vmul.f32 %v3326_v47, %v3305_v10  ;;  %v8693_v10 = vld [vmem:[#allocation7 + $0x154] ss:$8 sps:$4 sm:$0xff]  }
 0x705   :  { %v8741_v47 = vld [vmem:[#allocation7 + $0x54] ss:$8 sps:$4 sm:$0xff]  }
 0x706   :  { %v3334_v18 = vrot.slane %v3328_v33, %v10658_v31  ;;  %v3338_v39 = vrot.slane %v3328_v33, %v10660_v32  ;;  %v8691_v33 = vld [vmem:[#allocation7 + $0x150] ss:$8 sps:$4 sm:$0xff]  }
 0x708   :  { %v3341_v3 = vmul.f32 %v3334_v18, %v3225_v52  ;;  %v3342_v34 = vmul.f32 %v3338_v39, %v3227_v25  ;;  %v3367_v43 = vmul.f32 %v3338_v39, %v10629_v28  ;;  %v3369_v44 = vmul.f32 %v3338_v39, %v10644_v48 }
 0x709   :  { %v3366_v49 = vmul.f32 %v3334_v18, %v10618_v24  ;;  %v3368_v50 = vmul.f32 %v3334_v18, %v10638_v17  ;;  %v3363_v62 = vmul.f32 %v3338_v39, %v10613_v14  ;;  %v3365_v63 = vmul.f32 %v3338_v39, %v10611_v57  ;;  %v8696_v39 = vld [vmem:[#allocation7 + $0x144] ss:$8 sps:$4 sm:$0xff]  }
 0x70a   :  { %v3345_v35 = vcombine.low %v3341_v3, %v3342_v34  ;;  %v3362_v61 = vmul.f32 %v3334_v18, %v10608_v60  ;;  %v3364_v55 = vmul.f32 %v3334_v18, %v10606_v41  ;;  %v8739_v18 = vld [vmem:[#allocation7 + $0x50] ss:$8 sps:$4 sm:$0xff]   ;;  %v8744_v3 = vld [vmem:[#allocation7 + $0x44] ss:$8 sps:$4 sm:$0xff]   ;;  %v8694_v34 = vld [vmem:[#allocation7 + $0x140] ss:$8 sps:$4 sm:$0xff]  }
 0x70c   :  { %v3352_v11 = vrot.slane %v3345_v35, %v10651_v38  ;;  %v8742_v35 = vld [vmem:[#allocation7 + $0x40] ss:$8 sps:$4 sm:$0xff]  }
 0x70e   :  { %v3359_v56 = vrot.slane %v3352_v11, %v10651_v38  ;;  %v8699_v11 = vld [vmem:[#allocation7 + $0x134] ss:$8 sps:$4 sm:$0xff]  }
 0x710   :  { %v3361_v40 = vsub.f32 %v3329_v36, %v3359_v56  ;;  %v8747_v36 = vld [vmem:[#allocation7 + $0x34] ss:$8 sps:$4 sm:$0xff]   ;;  %v8697_v56 = vld [vmem:[#allocation7 + $0x130] ss:$8 sps:$4 sm:$0xff]  }
 0x712   :  { %v3378_v45 = vrot.slane %v3361_v40, %v10660_v32  ;;  %v3374_v54 = vrot.slane %v3361_v40, %v10658_v31  ;;  %v8745_v40 = vld [vmem:[#allocation7 + $0x30] ss:$8 sps:$4 sm:$0xff]  }
 0x714   :  { %v3386_v59 = vadd.f32 %v3378_v45, %v3367_v43  ;;  %v3388_v28 = vadd.f32 %v3378_v45, %v3369_v44  ;;  %v3385_v2 = vadd.f32 %v3374_v54, %v3366_v49  ;;  %v3387_v48 = vadd.f32 %v3374_v54, %v3368_v50  ;;  %v8702_v43 = vld [vmem:[#allocation7 + $0x124] ss:$8 sps:$4 sm:$0xff]   ;;  %v8748_v49 = vld [vmem:[#allocation7 + $0x20] ss:$8 sps:$4 sm:$0xff]   ;;  %v8705_v50 = vld [vmem:[#allocation7 + $0x114] ss:$8 sps:$4 sm:$0xff]  }
 0x715   :  { %v3382_v22 = vadd.f32 %v3378_v45, %v3363_v62  ;;  %v3384_v58 = vadd.f32 %v3378_v45, %v3365_v63  ;;  %v3381_v21 = vadd.f32 %v3374_v54, %v3362_v61  ;;  %v3383_v24 = vadd.f32 %v3374_v54, %v3364_v55  ;;  %v8750_v44 = vld [vmem:[#allocation7 + $0x24] ss:$8 sps:$4 sm:$0xff]   ;;  %v8700_v45 = vld [vmem:[#allocation7 + $0x120] ss:$8 sps:$4 sm:$0xff]   ;;  %v8753_v54 = vld [vmem:[#allocation7 + $0x14] ss:$8 sps:$4 sm:$0xff]  }
 0x716   :  { %v3394_v13 = vmul.f32 0.2, %v3386_v59  ;;  %v3396_v17 = vmul.f32 0.2, %v3388_v28  ;;  %v3393_v51 = vmul.f32 0.2, %v3385_v2 }
 0x717   :  { %v3395_v42 = vmul.f32 0.2, %v3387_v48  ;;  %v3390_v53 = vmul.f32 0.2, %v3382_v22  ;;  %v3392_v14 = vmul.f32 0.2, %v3384_v58 }
 0x718   :  { %v3402_v6 = vmax.f32 %v3386_v59, %v3394_v13  ;;  %v3404_v57 = vmax.f32 %v3388_v28, %v3396_v17  ;;  %v3401_v19 = vmax.f32 %v3385_v2, %v3393_v51  ;;  %v3389_v60 = vmul.f32 0.2, %v3381_v21  ;;  %v8703_v62 = vld [vmem:[#allocation7 + $0x110] ss:$8 sps:$4 sm:$0xff]   ;;  %v8708_v61 = vld [vmem:[#allocation7 + $0x104] ss:$8 sps:$4 sm:$0xff]  }
 0x719   :  { %v3403_v52 = vmax.f32 %v3387_v48, %v3395_v42  ;;  %v3398_v41 = vmax.f32 %v3382_v22, %v3390_v53  ;;  %v3400_v23 = vmax.f32 %v3384_v58, %v3392_v14  ;;  %v3391_v25 = vmul.f32 0.2, %v3383_v24  ;;  %v8751_v63 = vld [vmem:[#allocation7 + $0x10] ss:$8 sps:$4 sm:$0xff]   ;;  %v8756_v55 = vld [vmem:[#allocation7 + $0x4] ss:$8 sps:$4 sm:$0xff]  }
 0x71a   :  { %v10676_v20 = vpack.c.bf16 %v3404_v57, %v3402_v6  ;;  %v3397_v7 = vmax.f32 %v3381_v21, %v3389_v60  ;;  %v8706_v59 = vld [vmem:[#allocation7 + $0x100] ss:$8 sps:$4 sm:$0xff]   ;;  %v8711_v2 = vld [vmem:[#allocation7 + $0x1f4] ss:$8 sps:$4 sm:$0xff]   ;;  %v8709_v22 = vld [vmem:[#allocation7 + $0x1f0] ss:$8 sps:$4 sm:$0xff]  }
 0x71b   :  { %v10678_v9 = vpack.c.bf16 %v3403_v52, %v3401_v19  ;;  %v3399_v26 = vmax.f32 %v3383_v24, %v3391_v25  ;;  %v10682_v27 = vpack.c.bf16 %v3400_v23, %v3398_v41  ;;  %v8754_v28 = vld [vmem:[#allocation7] ss:$8 sps:$4 sm:$0xff]   ;;  %v8759_v48 = vld [vmem:[#allocation7 + $0xf4] ss:$8 sps:$4 sm:$0xff]   ;;  %v8757_v58 = vld [vmem:[#allocation7 + $0xf0] ss:$8 sps:$4 sm:$0xff]  }
 0x71c   :  { %3432 = vmatprep.subr.bf16.mxu1 %v10676_v20  ;;  %3520 = vmatprep.subr.bf16.mxu0 %v10676_v20  ;;  %v8714_v21 = vld [vmem:[#allocation7 + $0x1e4] ss:$8 sps:$4 sm:$0xff]   ;;  %v8712_v13 = vld [vmem:[#allocation7 + $0x1e0] ss:$8 sps:$4 sm:$0xff]   ;;  %v8717_v51 = vld [vmem:[#allocation7 + $0x1d4] ss:$8 sps:$4 sm:$0xff]  }
 0x71d   :  { %3433 = vmatpush1.bf16.msra.mxu1 %v10678_v9  ;;  %3521 = vmatpush1.bf16.msra.mxu0 %v10678_v9  ;;  %v10688_v4 = vpack.c.bf16 %v3399_v26, %v3397_v7  ;;  %v8762_v24 = vld [vmem:[#allocation7 + $0xe4] ss:$8 sps:$4 sm:$0xff]   ;;  %v8760_v17 = vld [vmem:[#allocation7 + $0xe0] ss:$8 sps:$4 sm:$0xff]   ;;  %v8765_v42 = vld [vmem:[#allocation7 + $0xd4] ss:$8 sps:$4 sm:$0xff]  }
 0x71e   :  { %3434 = vmatprep.subr.bf16.mxu1 %v10682_v27  ;;  %3522 = vmatprep.subr.bf16.mxu0 %v10682_v27  ;;  %v8715_v53 = vld [vmem:[#allocation7 + $0x1d0] ss:$8 sps:$4 sm:$0xff]   ;;  %v8720_v6 = vld [vmem:[#allocation7 + $0x1c4] ss:$8 sps:$4 sm:$0xff]   ;;  %v8718_v19 = vld [vmem:[#allocation7 + $0x1c0] ss:$8 sps:$4 sm:$0xff]  }
 0x71f   :  { %v8763_v14 = vld [vmem:[#allocation7 + $0xd0] ss:$8 sps:$4 sm:$0xff]   ;;  %v8768_v57 = vld [vmem:[#allocation7 + $0xc4] ss:$8 sps:$4 sm:$0xff]   ;;  %v8766_v60 = vld [vmem:[#allocation7 + $0xc0] ss:$8 sps:$4 sm:$0xff]  }
 0x720   :  { %v8723_v52 = vld [vmem:[#allocation7 + $0x1b4] ss:$8 sps:$4 sm:$0xff]   ;;  %v8721_v23 = vld [vmem:[#allocation7 + $0x1b0] ss:$8 sps:$4 sm:$0xff]   ;;  %v8726_v7 = vld [vmem:[#allocation7 + $0x1a4] ss:$8 sps:$4 sm:$0xff]  }
 0x721   :  { %3435 = vmatpush1.bf16.msra.mxu1 %v10688_v4  ;;  %3523 = vmatpush1.bf16.msra.mxu0 %v10688_v4  ;;  %v8771_v41 = vld [vmem:[#allocation7 + $0xb4] ss:$8 sps:$4 sm:$0xff]   ;;  %v8769_v25 = vld [vmem:[#allocation7 + $0xb0] ss:$8 sps:$4 sm:$0xff]   ;;  %v8724_v26 = vld [vmem:[#allocation7 + $0x1a0] ss:$8 sps:$4 sm:$0xff]  }
 0x722   :  { %3746 = vmatprep.subr.bf16.mxu0 %v8686_v1  ;;  %3949 = vmatprep.subr.bf16.mxu1 %v8735_v29  ;;  %v8729_v1 = vld [vmem:[#allocation7 + $0x194] ss:$8 sps:$4 sm:$0xff]   ;;  %v8727_v29 = vld [vmem:[#allocation7 + $0x190] ss:$8 sps:$4 sm:$0xff]  }
 0x724   :  { %7754 = vmatmul.mubr.msk.bf16.vlgmr.msra.gmra.mxu0 %vm3416_vm1, %v8683_v30  ;;  %7752 = vmatmul.mubr.msk.bf16.vlgmr.msra.gmra.mxu1 %vm3416_vm1, %v8687_v16  ;;  %v8732_v30 = vld [vmem:[#allocation7 + $0x184] ss:$8 sps:$4 sm:$0xff]   ;;  %v8730_v16 = vld [vmem:[#allocation7 + $0x180] ss:$8 sps:$4 sm:$0xff]  }
 0x725   :  { %3747 = vmatpush1.bf16.msra.mxu0 %v8684_v15  ;;  %3950 = vmatpush1.bf16.msra.mxu1 %v8733_v37  ;;  %v8774_v15 = vld [vmem:[#allocation7 + $0xa4] ss:$8 sps:$4 sm:$0xff]   ;;  %v8772_v37 = vld [vmem:[#allocation7 + $0xa0] ss:$8 sps:$4 sm:$0xff]  }
 0x726   :  { %3748 = vmatprep.subr.bf16.mxu0 %v8690_v5  ;;  %3951 = vmatprep.subr.bf16.mxu1 %v8738_v46  ;;  %v8777_v5 = vld [vmem:[#allocation7 + $0x94] ss:$8 sps:$4 sm:$0xff]   ;;  %v8775_v46 = vld [vmem:[#allocation7 + $0x90] ss:$8 sps:$4 sm:$0xff]  }
 0x729   :  { %3749 = vmatpush1.bf16.msra.mxu0 %v8688_v12  ;;  %3952 = vmatpush1.bf16.msra.mxu1 %v8736_v8  ;;  %v8780_v12 = vld [vmem:[#allocation7 + $0x84] ss:$8 sps:$4 sm:$0xff]   ;;  %v8778_v8 = vld [vmem:[#allocation7 + $0x80] ss:$8 sps:$4 sm:$0xff]  }
 0x72a   :  { %3750 = vmatprep.subr.bf16.mxu0 %v8693_v10  ;;  %3953 = vmatprep.subr.bf16.mxu1 %v8741_v47  ;;  %v8785_v10 = vld [vmem:[#allocation7 + $0x274] ss:$8 sps:$4 sm:$0xff]  }
 0x72d   :  { %3751 = vmatpush1.bf16.msra.mxu0 %v8691_v33  ;;  %3954 = vmatpush1.bf16.msra.mxu1 %v8739_v18 }
 0x72e   :  { %3752 = vmatprep.subr.bf16.mxu0 %v8696_v39  ;;  %3955 = vmatprep.subr.bf16.mxu1 %v8744_v3 }
 0x731   :  { %3753 = vmatpush1.bf16.msra.mxu0 %v8694_v34  ;;  %3956 = vmatpush1.bf16.msra.mxu1 %v8742_v35 }
 0x732   :  { %3754 = vmatprep.subr.bf16.mxu0 %v8699_v11  ;;  %3957 = vmatprep.subr.bf16.mxu1 %v8747_v36 }
 0x735   :  { %3755 = vmatpush1.bf16.msra.mxu0 %v8697_v56  ;;  %3958 = vmatpush1.bf16.msra.mxu1 %v8745_v40 }
 0x736   :  { %3756 = vmatprep.subr.bf16.mxu0 %v8702_v43  ;;  %3959 = vmatprep.subr.bf16.mxu1 %v8750_v44  ;;  %v8783_v44 = vld [vmem:[#allocation7 + $0x270] ss:$8 sps:$4 sm:$0xff]  }
 0x739   :  { %3757 = vmatpush1.bf16.msra.mxu0 %v8700_v45  ;;  %3960 = vmatpush1.bf16.msra.mxu1 %v8748_v49  ;;  %v8788_v45 = vld [vmem:[#allocation7 + $0x264] ss:$8 sps:$4 sm:$0xff]   ;;  %v8786_v49 = vld [vmem:[#allocation7 + $0x260] ss:$8 sps:$4 sm:$0xff]  }
 0x73a   :  { %3758 = vmatprep.subr.bf16.mxu0 %v8705_v50  ;;  %3961 = vmatprep.subr.bf16.mxu1 %v8753_v54  ;;  %v8791_v50 = vld [vmem:[#allocation7 + $0x254] ss:$8 sps:$4 sm:$0xff]  }
 0x73b   :  { %v8781_v54 = vld [vmem:[#allocation6 + $0x10] sm:$0xff]  }
 0x73d   :  { %3759 = vmatpush1.bf16.msra.mxu0 %v8703_v62  ;;  %3962 = vmatpush1.bf16.msra.mxu1 %v8751_v63  ;;  %v8789_v62 = vld [vmem:[#allocation7 + $0x250] ss:$8 sps:$4 sm:$0xff]   ;;  %v8797_v63 = vld [vmem:[#allocation7 + $0x244] ss:$8 sps:$4 sm:$0xff]  }
 0x73e   :  { %3760 = vmatprep.subr.bf16.mxu0 %v8708_v61  ;;  %3963 = vmatprep.subr.bf16.mxu1 %v8756_v55  ;;  %v8794_v61 = vld [vmem:[#allocation7 + $0x374] ss:$8 sps:$4 sm:$0xff]   ;;  %v8795_v55 = vld [vmem:[#allocation7 + $0x240] ss:$8 sps:$4 sm:$0xff]  }
 0x741   :  { %3761 = vmatpush1.bf16.msra.mxu0 %v8706_v59  ;;  %3964 = vmatpush1.bf16.msra.mxu1 %v8754_v28  ;;  %v8803_v59 = vld [vmem:[#allocation7 + $0x234] ss:$8 sps:$4 sm:$0xff]  }
 0x742   :  { %3762 = vmatprep.subr.bf16.mxu0 %v8711_v2  ;;  %3965 = vmatprep.subr.bf16.mxu1 %v8759_v48  ;;  %v8782_v28 = vld [vmem:[#allocation6 + $0x18] sm:$0xff]   ;;  %v8800_v2 = vld [vmem:[#allocation7 + $0x364] ss:$8 sps:$4 sm:$0xff]  }
 0x743   :  { %v8801_v48 = vld [vmem:[#allocation7 + $0x230] ss:$8 sps:$4 sm:$0xff]  }
 0x745   :  { %3763 = vmatpush2.bf16.msra.mxu0 %v8709_v22  ;;  %3966 = vmatpush2.bf16.msra.mxu1 %v8757_v58  ;;  %v8809_v22 = vld [vmem:[#allocation7 + $0x224] ss:$8 sps:$4 sm:$0xff]   ;;  %v8807_v58 = vld [vmem:[#allocation7 + $0x220] ss:$8 sps:$4 sm:$0xff]  }
 0x746   :  { %3764 = vmatprep.subr.bf16.mxu0 %v8714_v21  ;;  %3967 = vmatprep.subr.bf16.mxu1 %v8762_v24  ;;  %v8815_v21 = vld [vmem:[#allocation7 + $0x214] ss:$8 sps:$4 sm:$0xff]   ;;  %v8804_v24 = vld [vmem:[#allocation7 + $0x350] ss:$8 sps:$4 sm:$0xff]  }
 0x749   :  { %3765 = vmatpush2.bf16.msra.mxu0 %v8712_v13  ;;  %3968 = vmatpush2.bf16.msra.mxu1 %v8760_v17  ;;  %v8813_v13 = vld [vmem:[#allocation7 + $0x210] ss:$8 sps:$4 sm:$0xff]   ;;  %v8821_v17 = vld [vmem:[#allocation7 + $0x204] ss:$8 sps:$4 sm:$0xff]  }
 0x74a   :  { %3766 = vmatprep.subr.bf16.mxu0 %v8717_v51  ;;  %3969 = vmatprep.subr.bf16.mxu1 %v8765_v42  ;;  %v8810_v51 = vld [vmem:[#allocation7 + $0x340] ss:$8 sps:$4 sm:$0xff]   ;;  %v8818_v42 = vld [vmem:[#allocation7 + $0x334] ss:$8 sps:$4 sm:$0xff]  }
 0x74d   :  { %3767 = vmatpush2.bf16.msra.mxu0 %v8715_v53  ;;  %3970 = vmatpush2.bf16.msra.mxu1 %v8763_v14  ;;  %v8819_v53 = vld [vmem:[#allocation7 + $0x200] ss:$8 sps:$4 sm:$0xff]   ;;  %v8827_v14 = vld [vmem:[#allocation7 + $0x2f4] ss:$8 sps:$4 sm:$0xff]  }
 0x74e   :  { %3768 = vmatprep.subr.bf16.mxu0 %v8720_v6  ;;  %3971 = vmatprep.subr.bf16.mxu1 %v8768_v57  ;;  %v8816_v6 = vld [vmem:[#allocation7 + $0x330] ss:$8 sps:$4 sm:$0xff]   ;;  %v8824_v57 = vld [vmem:[#allocation7 + $0x324] ss:$8 sps:$4 sm:$0xff]  }
 0x751   :  { %3769 = vmatpush2.bf16.msra.mxu0 %v8718_v19  ;;  %3972 = vmatpush2.bf16.msra.mxu1 %v8766_v60  ;;  %v8825_v19 = vld [vmem:[#allocation7 + $0x2f0] ss:$8 sps:$4 sm:$0xff]   ;;  %v8833_v60 = vld [vmem:[#allocation7 + $0x2e4] ss:$8 sps:$4 sm:$0xff]  }
 0x752   :  { %3770 = vmatprep.subr.bf16.mxu0 %v8723_v52  ;;  %3973 = vmatprep.subr.bf16.mxu1 %v8771_v41  ;;  %v8822_v52 = vld [vmem:[#allocation7 + $0x320] ss:$8 sps:$4 sm:$0xff]   ;;  %v8830_v41 = vld [vmem:[#allocation7 + $0x314] ss:$8 sps:$4 sm:$0xff]  }
 0x755   :  { %3771 = vmatpush2.bf16.msra.mxu0 %v8721_v23  ;;  %3974 = vmatpush2.bf16.msra.mxu1 %v8769_v25  ;;  %v8831_v23 = vld [vmem:[#allocation7 + $0x2e0] ss:$8 sps:$4 sm:$0xff]   ;;  %v8839_v25 = vld [vmem:[#allocation7 + $0x2d4] ss:$8 sps:$4 sm:$0xff]  }
 0x756   :  { %3772 = vmatprep.subr.bf16.mxu0 %v8726_v7  ;;  %3975 = vmatprep.subr.bf16.mxu1 %v8774_v15  ;;  %v8828_v7 = vld [vmem:[#allocation7 + $0x310] ss:$8 sps:$4 sm:$0xff]   ;;  %v8843_v15 = vld [vmem:[#allocation7 + $0x2c0] ss:$8 sps:$4 sm:$0xff]  }
 0x759   :  { %3773 = vmatpush2.bf16.msra.mxu0 %v8724_v26  ;;  %3976 = vmatpush2.bf16.msra.mxu1 %v8772_v37  ;;  %v8836_v26 = vld [vmem:[#allocation7 + $0x304] ss:$8 sps:$4 sm:$0xff]   ;;  %v8840_v37 = vld [vmem:[#allocation7 + $0x3f0] ss:$8 sps:$4 sm:$0xff]  }
 0x75a   :  { %3774 = vmatprep.subr.bf16.mxu0 %v8729_v1  ;;  %3977 = vmatprep.subr.bf16.mxu1 %v8777_v5  ;;  %v8837_v1 = vld [vmem:[#allocation7 + $0x2d0] ss:$8 sps:$4 sm:$0xff]   ;;  %v8848_v5 = vld [vmem:[#allocation7 + $0x3e4] ss:$8 sps:$4 sm:$0xff]  }
 0x75d   :  { %3775 = vmatpush2.bf16.msra.mxu0 %v8727_v29  ;;  %3978 = vmatpush2.bf16.msra.mxu1 %v8775_v46  ;;  %v8845_v29 = vld [vmem:[#allocation7 + $0x2c4] ss:$8 sps:$4 sm:$0xff]   ;;  %v8846_v46 = vld [vmem:[#allocation7 + $0x3e0] ss:$8 sps:$4 sm:$0xff]  }
 0x75e   :  { %3776 = vmatprep.subr.bf16.mxu0 %v8732_v30  ;;  %3979 = vmatprep.subr.bf16.mxu1 %v8780_v12  ;;  %v8834_v30 = vld [vmem:[#allocation7 + $0x300] ss:$8 sps:$4 sm:$0xff]   ;;  %v8849_v12 = vld [vmem:[#allocation7 + $0x2b0] ss:$8 sps:$4 sm:$0xff]  }
 0x761   :  { %3777 = vmatpush2.bf16.msra.mxu0 %v8730_v16  ;;  %3980 = vmatpush2.bf16.msra.mxu1 %v8778_v8  ;;  %v8842_v16 = vld [vmem:[#allocation7 + $0x3f4] ss:$8 sps:$4 sm:$0xff]  }
 0x762   :  { %4015 = vmatprep.subr.bf16.mxu0 %v10676_v20  ;;  %4241 = vmatprep.subr.bf16.mxu1 %v8785_v10  ;;  %v8851_v8 = vld [vmem:[#allocation7 + $0x2b4] ss:$8 sps:$4 sm:$0xff]   ;;  %v8852_v10 = vld [vmem:[#allocation7 + $0x3d0] ss:$8 sps:$4 sm:$0xff]  }
 0x7e4   :  { %v3542_v47 = vpop.f32.mrf.mxu0  ;;  %v3454_v33 = vpop.f32.mrf.mxu1 }
 0x7e6   :  { %v3544_v18 = vpop.f32.mrf.mxu0  ;;  %v3456_v39 = vpop.f32.mrf.mxu1 }
 0x7e8   :  { %v3546_v3 = vpop.f32.mrf.mxu0  ;;  %v3458_v34 = vpop.f32.mrf.mxu1 }
 0x7e9   :  { %v3463_v11 = vpack.c.bf16 %v3458_v34, %v3454_v33  ;;  %v3551_v43 = vpack.c.bf16 %v3546_v3, %v3542_v47  ;;  %v8854_v47 = vld [vmem:[#allocation7 + $0x3d4] ss:$8 sps:$4 sm:$0xff]   ;;  %v8855_v33 = vld [vmem:[#allocation7 + $0x2a0] ss:$8 sps:$4 sm:$0xff]   ;;  %v8860_v3 = vld [vmem:[#allocation7 + $0x3c4] ss:$8 sps:$4 sm:$0xff]  }
 0x7ea   :  { %v3548_v35 = vpop.f32.mrf.mxu0  ;;  %v3460_v36 = vpop.f32.mrf.mxu1  ;;  %v8861_v34 = vld [vmem:[#allocation7 + $0x290] ss:$8 sps:$4 sm:$0xff]  }
 0x7eb   :  { %v3552_v56 = vpack.c.bf16 %v3548_v35, %v3544_v18  ;;  %v3464_v40 = vpack.c.bf16 %v3460_v36, %v3456_v39  ;;  %v8857_v18 = vld [vmem:[#allocation7 + $0x2a4] ss:$8 sps:$4 sm:$0xff]   ;;  %v8858_v39 = vld [vmem:[#allocation7 + $0x3c0] ss:$8 sps:$4 sm:$0xff]   ;;  %v8863_v35 = vld [vmem:[#allocation7 + $0x294] ss:$8 sps:$4 sm:$0xff]  }
 0x7ec   :  { %v8866_v36 = vld [vmem:[#allocation7 + $0x3b4] ss:$8 sps:$4 sm:$0xff]  }
 0x7ed   :  { %3778 = vmatprep.mubr.bf16.mxu0 %v3552_v56  ;;  %3981 = vmatprep.mubr.bf16.mxu1 %v3464_v40  ;;  %v8867_v56 = vld [vmem:[#allocation7 + $0x280] ss:$8 sps:$4 sm:$0xff]   ;;  %v8869_v40 = vld [vmem:[#allocation7 + $0x284] ss:$8 sps:$4 sm:$0xff]  }
 0x7ee   :  { %3779 = vmatmul.mubr.bf16.vlgmr.msra.gmra.mxu0 %v3551_v43  ;;  %3982 = vmatmul.mubr.bf16.vlgmr.msra.gmra.mxu1 %v3463_v11  ;;  %v8864_v11 = vld [vmem:[#allocation7 + $0x3b0] ss:$8 sps:$4 sm:$0xff]   ;;  %v8870_v43 = vld [vmem:[#allocation7 + $0x3a0] ss:$8 sps:$4 sm:$0xff]  }
 0x7ef   :  { %4016 = vmatpush1.bf16.msra.mxu0 %v10678_v9  ;;  %4035 = vmatprep.mubr.bf16.mxu0 %v9395_v0 }
 0x7f0   :  { %4017 = vmatprep.subr.bf16.mxu0 %v10682_v27  ;;  %4242 = vmatpush1.bf16.msra.mxu1 %v8783_v44  ;;  %v8872_v44 = vld [vmem:[#allocation7 + $0x3a4] ss:$8 sps:$4 sm:$0xff]  }
 0x7f1   :  { %4243 = vmatprep.subr.bf16.mxu1 %v8788_v45  ;;  %v8875_v45 = vld [vmem:[#allocation7 + $0x394] ss:$8 sps:$4 sm:$0xff]  }
 0x7f3   :  { %4018 = vmatpush1.bf16.msra.mxu0 %v10688_v4 }
 0x7f4   :  { %4311 = vmatprep.subr.bf16.mxu0 %v10676_v20  ;;  %4244 = vmatpush1.bf16.msra.mxu1 %v8786_v49  ;;  %v8792_v20 = vld [vmem:[#allocation7 + $0x370] ss:$8 sps:$4 sm:$0xff]  }
 0x7f5   :  { %4245 = vmatprep.subr.bf16.mxu1 %v8791_v50  ;;  %v8873_v49 = vld [vmem:[#allocation7 + $0x390] ss:$8 sps:$4 sm:$0xff]   ;;  %v8876_v50 = vld [vmem:[#allocation7 + $0x380] ss:$8 sps:$4 sm:$0xff]  }
 0x7f6   :  { %7820 = vmatmul.mubr.msk.bf16.vlgmr.msra.gmra.mxu0 %vm3416_vm1, %v8781_v54  ;;  %v8878_v54 = vld [vmem:[#allocation7 + $0x384] ss:$8 sps:$4 sm:$0xff]  }
 0x7f7   :  { %4312 = vmatpush1.bf16.msra.mxu0 %v10678_v9  ;;  %4331 = vmatprep.mubr.bf16.mxu0 %v9395_v0  ;;  %v8798_v9 = vld [vmem:[#allocation7 + $0x360] ss:$8 sps:$4 sm:$0xff]  }
 0x7f8   :  { %4313 = vmatprep.subr.bf16.mxu0 %v10682_v27  ;;  %4246 = vmatpush1.bf16.msra.mxu1 %v8789_v62  ;;  %v8806_v27 = vld [vmem:[#allocation7 + $0x354] ss:$8 sps:$4 sm:$0xff]  }
 0x7f9   :  { %4247 = vmatprep.subr.bf16.mxu1 %v8797_v63  ;;  %v4651_v62 = vld [vmem:[#allocation9 + $0xf8] sm:$0xff] }
 0x7fb   :  { %4314 = vmatpush1.bf16.msra.mxu0 %v10688_v4  ;;  %v8812_v4 = vld [vmem:[#allocation7 + $0x344] ss:$8 sps:$4 sm:$0xff]  }
 0x7fc   :  { %4537 = vmatprep.subr.bf16.mxu0 %v8794_v61  ;;  %4248 = vmatpush1.bf16.msra.mxu1 %v8795_v55 }
 0x7fd   :  { %4249 = vmatprep.subr.bf16.mxu1 %v8803_v59 }
 0x7fe   :  { %7854 = vmatmul.mubr.msk.bf16.vlgmr.msra.gmra.mxu0 %vm3416_vm1, %v8782_v28 }
 0x7ff   :  { %4538 = vmatpush1.bf16.msra.mxu0 %v8792_v20 }
 0x800   :  { %4539 = vmatprep.subr.bf16.mxu0 %v8800_v2  ;;  %4250 = vmatpush1.bf16.msra.mxu1 %v8801_v48 }
 0x801   :  { %4251 = vmatprep.subr.bf16.mxu1 %v8809_v22 }
 0x803   :  { %4540 = vmatpush1.bf16.msra.mxu0 %v8798_v9 }
 0x804   :  { %4541 = vmatprep.subr.bf16.mxu0 %v8806_v27  ;;  %4252 = vmatpush1.bf16.msra.mxu1 %v8807_v58  ;;  %v4650_v58 = vld [vmem:[#allocation9 + $0xf0] sm:$0xff] }
 0x805   :  { %4253 = vmatprep.subr.bf16.mxu1 %v8815_v21  ;;  %v4649_v21 = vld [vmem:[#allocation9 + $0xe8] sm:$0xff] }
 0x807   :  { %4542 = vmatpush1.bf16.msra.mxu0 %v8804_v24 }
 0x808   :  { %4543 = vmatprep.subr.bf16.mxu0 %v8812_v4  ;;  %4254 = vmatpush1.bf16.msra.mxu1 %v8813_v13  ;;  %v4648_v4 = vld [vmem:[#allocation9 + $0xe0] sm:$0xff]  ;;  %v4647_v13 = vld [vmem:[#allocation9 + $0xd8] sm:$0xff] }
 0x809   :  { %4255 = vmatprep.subr.bf16.mxu1 %v8821_v17 }
 0x80b   :  { %4544 = vmatpush1.bf16.msra.mxu0 %v8810_v51  ;;  %v4646_v51 = vld [vmem:[#allocation9 + $0xd0] sm:$0xff] }
 0x80c   :  { %4545 = vmatprep.subr.bf16.mxu0 %v8818_v42  ;;  %4256 = vmatpush1.bf16.msra.mxu1 %v8819_v53  ;;  %v4645_v42 = vld [vmem:[#allocation9 + $0xc8] sm:$0xff] }
 0x80d   :  { %4257 = vmatprep.subr.bf16.mxu1 %v8827_v14  ;;  %v4644_v14 = vld [vmem:[#allocation9 + $0xc0] sm:$0xff] }
 0x80f   :  { %4546 = vmatpush1.bf16.msra.mxu0 %v8816_v6 }
 0x810   :  { %4547 = vmatprep.subr.bf16.mxu0 %v8824_v57  ;;  %4258 = vmatpush2.bf16.msra.mxu1 %v8825_v19  ;;  %v4643_v57 = vld [vmem:[#allocation9 + $0xb8] sm:$0xff] }
 0x811   :  { %4259 = vmatprep.subr.bf16.mxu1 %v8833_v60  ;;  %v4642_v60 = vld [vmem:[#allocation9 + $0xb0] sm:$0xff] }
 0x813   :  { %4548 = vmatpush1.bf16.msra.mxu0 %v8822_v52  ;;  %v4641_v52 = vld [vmem:[#allocation9 + $0xa8] sm:$0xff] }
 0x814   :  { %4549 = vmatprep.subr.bf16.mxu0 %v8830_v41  ;;  %4260 = vmatpush2.bf16.msra.mxu1 %v8831_v23  ;;  %v4640_v41 = vld [vmem:[#allocation9 + $0xa0] sm:$0xff]  ;;  %v4639_v23 = vld [vmem:[#allocation9 + $0x98] sm:$0xff] }
 0x815   :  { %4261 = vmatprep.subr.bf16.mxu1 %v8839_v25  ;;  %v4638_v25 = vld [vmem:[#allocation9 + $0x90] sm:$0xff] }
 0x817   :  { %4550 = vmatpush1.bf16.msra.mxu0 %v8828_v7  ;;  %v4637_v7 = vld [vmem:[#allocation9 + $0x88] sm:$0xff] }
 0x818   :  { %4551 = vmatprep.subr.bf16.mxu0 %v8836_v26  ;;  %4262 = vmatpush2.bf16.msra.mxu1 %v8837_v1  ;;  %v4636_v26 = vld [vmem:[#allocation9 + $0x80] sm:$0xff]  ;;  %v4635_v1 = vld [vmem:[#allocation9 + $0x78] sm:$0xff] }
 0x819   :  { %4263 = vmatprep.subr.bf16.mxu1 %v8845_v29  ;;  %v4634_v29 = vld [vmem:[#allocation9 + $0x70] sm:$0xff] }
 0x81b   :  { %4552 = vmatpush1.bf16.msra.mxu0 %v8834_v30  ;;  %v4633_v30 = vld [vmem:[#allocation9 + $0x68] sm:$0xff] }
 0x81c   :  { %4553 = vmatprep.subr.bf16.mxu0 %v8842_v16  ;;  %4264 = vmatpush2.bf16.msra.mxu1 %v8843_v15  ;;  %v4632_v16 = vld [vmem:[#allocation9 + $0x60] sm:$0xff]  ;;  %v4631_v15 = vld [vmem:[#allocation9 + $0x58] sm:$0xff] }
 0x81d   :  { %4265 = vmatprep.subr.bf16.mxu1 %v8851_v8  ;;  %v4626_v8 = vld [vmem:[#allocation9 + $0x30] sm:$0xff] }
 0x81f   :  { %4554 = vmatpush2.bf16.msra.mxu0 %v8840_v37  ;;  %v4630_v37 = vld [vmem:[#allocation9 + $0x50] sm:$0xff] }
 0x820   :  { %4555 = vmatprep.subr.bf16.mxu0 %v8848_v5  ;;  %4266 = vmatpush2.bf16.msra.mxu1 %v8849_v12  ;;  %v4629_v5 = vld [vmem:[#allocation9 + $0x48] sm:$0xff]  ;;  %v4627_v12 = vld [vmem:[#allocation9 + $0x38] sm:$0xff] }
 0x821   :  { %4267 = vmatprep.subr.bf16.mxu1 %v8857_v18  ;;  %v4622_v18 = vld [vmem:[#allocation9 + $0x10] sm:$0xff] }
 0x823   :  { %4556 = vmatpush2.bf16.msra.mxu0 %v8846_v46  ;;  %v4628_v46 = vld [vmem:[#allocation9 + $0x40] sm:$0xff] }
 0x824   :  { %4557 = vmatprep.subr.bf16.mxu0 %v8854_v47  ;;  %4268 = vmatpush2.bf16.msra.mxu1 %v8855_v33  ;;  %v4624_v47 = vld [vmem:[#allocation9 + $0x20] sm:$0xff]  ;;  %v4623_v33 = vld [vmem:[#allocation9 + $0x18] sm:$0xff] }
 0x825   :  { %4269 = vmatprep.subr.bf16.mxu1 %v8863_v35  ;;  %v4682_v35 = vld [vmem:[#allocation9 + $0x1f0] sm:$0xff] }
 0x827   :  { %4558 = vmatpush2.bf16.msra.mxu0 %v8852_v10  ;;  %v4625_v10 = vld [vmem:[#allocation9 + $0x28] sm:$0xff] }
 0x828   :  { %4559 = vmatprep.subr.bf16.mxu0 %v8860_v3  ;;  %4270 = vmatpush2.bf16.msra.mxu1 %v8861_v34  ;;  %v4620_v3 = vld [vmem:[#allocation9] sm:$0xff]  ;;  %v4683_v34 = vld [vmem:[#allocation9 + $0x1f8] sm:$0xff] }
 0x829   :  { %4271 = vmatprep.subr.bf16.mxu1 %v8869_v40  ;;  %v4678_v40 = vld [vmem:[#allocation9 + $0x1d0] sm:$0xff] }
 0x82b   :  { %4560 = vmatpush2.bf16.msra.mxu0 %v8858_v39  ;;  %v4621_v39 = vld [vmem:[#allocation9 + $0x8] sm:$0xff] }
 0x82c   :  { %4561 = vmatprep.subr.bf16.mxu0 %v8866_v36  ;;  %4272 = vmatpush2.bf16.msra.mxu1 %v8867_v56  ;;  %v4680_v36 = vld [vmem:[#allocation9 + $0x1e0] sm:$0xff]  ;;  %v4679_v56 = vld [vmem:[#allocation9 + $0x1d8] sm:$0xff] }
 0x82d   :  { %4684 = vmatprep.subr.mxu1 %v4651_v62 }
 0x82f   :  { %4562 = vmatpush2.bf16.msra.mxu0 %v8864_v11  ;;  %v4681_v11 = vld [vmem:[#allocation9 + $0x1e8] sm:$0xff] }
 0x830   :  { %4563 = vmatprep.subr.bf16.mxu0 %v8872_v44  ;;  %v4676_v44 = vld [vmem:[#allocation9 + $0x1c0] sm:$0xff] }
 0x833   :  { %4564 = vmatpush2.bf16.msra.mxu0 %v8870_v43  ;;  %v4677_v43 = vld [vmem:[#allocation9 + $0x1c8] sm:$0xff] }
 0x834   :  { %4565 = vmatprep.subr.bf16.mxu0 %v8875_v45  ;;  %v4675_v45 = vld [vmem:[#allocation9 + $0x1b8] sm:$0xff] }
 0x837   :  { %4566 = vmatpush2.bf16.msra.mxu0 %v8873_v49  ;;  %v4674_v49 = vld [vmem:[#allocation9 + $0x1b0] sm:$0xff] }
 0x838   :  { %4567 = vmatprep.subr.bf16.mxu0 %v8878_v54  ;;  %v4672_v54 = vld [vmem:[#allocation9 + $0x1a0] sm:$0xff] }
 0x83b   :  { %4568 = vmatpush2.bf16.msra.mxu0 %v8876_v50  ;;  %v4673_v50 = vld [vmem:[#allocation9 + $0x1a8] sm:$0xff] }
 0x83c   :  { %4755 = vmatprep.subr.mxu0 %v4651_v62  ;;  %v4671_v62 = vld [vmem:[#allocation9 + $0x198] sm:$0xff] }
 0x8ae   :  { %v10706_v63 = vpop.f32.mrf.mxu0 }
 0x8b0   :  { %v10708_v61 = vpop.f32.mrf.mxu0 }
 0x8b2   :  { %v10710_v55 = vpop.f32.mrf.mxu0 }
 0x8b4   :  { %v10712_v59 = vpop.f32.mrf.mxu0 }
 0x8b6   :  { %v4037_v28 = vpop.f32.mrf.mxu0 }
 0x8b8   :  { %v4039_v20 = vpop.f32.mrf.mxu0 }
 0x8ba   :  { %v4041_v2 = vpop.f32.mrf.mxu0 }
 0x8bb   :  { %v4046_v9 = vpack.c.bf16 %v4041_v2, %v4037_v28  ;;  %v4670_v28 = vld [vmem:[#allocation9 + $0x190] sm:$0xff]  ;;  %v4668_v2 = vld [vmem:[#allocation9 + $0x180] sm:$0xff] }
 0x8bc   :  { %v4043_v48 = vpop.f32.mrf.mxu0 }
 0x8bd   :  { %v4047_v22 = vpack.c.bf16 %v4043_v48, %v4039_v20  ;;  %v4669_v20 = vld [vmem:[#allocation9 + $0x188] sm:$0xff]  ;;  %v4667_v48 = vld [vmem:[#allocation9 + $0x178] sm:$0xff] }
 0x8be   :  { %v4333_v27 = vpop.f32.mrf.mxu0 }
 0x8bf   :  { %4273 = vmatprep.mubr.bf16.mxu1 %v4047_v22  ;;  %v4666_v22 = vld [vmem:[#allocation9 + $0x170] sm:$0xff] }
 0x8c0   :  { %4274 = vmatmul.mubr.bf16.vlgmr.msra.gmra.mxu1 %v4046_v9  ;;  %v4335_v24 = vpop.f32.mrf.mxu0  ;;  %v4665_v9 = vld [vmem:[#allocation9 + $0x168] sm:$0xff] }
 0x8c1   :  { %4685 = vmatpush1.msra.mxu1 %v4650_v58 }
 0x8c2   :  { %v4337_v17 = vpop.f32.mrf.mxu0  ;;  %4686 = vmatprep.subr.mxu1 %v4649_v21 }
 0x8c3   :  { %4687 = vmatpush1.msra.mxu1 %v4648_v4  ;;  %v4342_v19 = vpack.c.bf16 %v4337_v17, %v4333_v27  ;;  %v4664_v27 = vld [vmem:[#allocation9 + $0x160] sm:$0xff]  ;;  %v4658_v17 = vld [vmem:[#allocation9 + $0x130] sm:$0xff] }
 0x8c4   :  { %v4339_v53 = vpop.f32.mrf.mxu0  ;;  %4688 = vmatprep.subr.mxu1 %v4647_v13 }
 0x8c5   :  { %v4343_v6 = vpack.c.bf16 %v4339_v53, %v4335_v24  ;;  %4689 = vmatpush1.msra.mxu1 %v4646_v51  ;;  %v4661_v24 = vld [vmem:[#allocation9 + $0x148] sm:$0xff]  ;;  %v4655_v53 = vld [vmem:[#allocation9 + $0x118] sm:$0xff] }
 0x8c6   :  { %4690 = vmatprep.subr.mxu1 %v4645_v42 }
 0x8c7   :  { %4569 = vmatprep.mubr.bf16.mxu0 %v4343_v6  ;;  %4691 = vmatpush1.msra.mxu1 %v4644_v14  ;;  %v4653_v6 = vld [vmem:[#allocation9 + $0x108] sm:$0xff] }
 0x8c8   :  { %4570 = vmatmul.mubr.bf16.vlgmr.msra.gmra.mxu0 %v4342_v19  ;;  %4692 = vmatprep.subr.mxu1 %v4643_v57  ;;  %v3983_v19 = vpop.f32.mrf.mxu1 }
 0x8c9   :  { %4756 = vmatpush1.msra.mxu0 %v4650_v58  ;;  %4693 = vmatpush1.msra.mxu1 %v4642_v60  ;;  %v4663_v58 = vld [vmem:[#allocation9 + $0x158] sm:$0xff] }
 0x8ca   :  { %4757 = vmatprep.subr.mxu0 %v4649_v21  ;;  %4694 = vmatprep.subr.mxu1 %v4641_v52  ;;  %v4662_v21 = vld [vmem:[#allocation9 + $0x150] sm:$0xff] }
 0x8cb   :  { %4758 = vmatpush1.msra.mxu0 %v4648_v4  ;;  %4695 = vmatpush1.msra.mxu1 %v4640_v41  ;;  %v4660_v4 = vld [vmem:[#allocation9 + $0x140] sm:$0xff] }
 0x8cc   :  { %4759 = vmatprep.subr.mxu0 %v4647_v13  ;;  %4696 = vmatprep.subr.mxu1 %v4639_v23  ;;  %v4659_v13 = vld [vmem:[#allocation9 + $0x138] sm:$0xff] }
 0x8cd   :  { %4760 = vmatpush1.msra.mxu0 %v4646_v51  ;;  %4697 = vmatpush1.msra.mxu1 %v4638_v25  ;;  %v4657_v51 = vld [vmem:[#allocation9 + $0x128] sm:$0xff] }
 0x8ce   :  { %4761 = vmatprep.subr.mxu0 %v4645_v42  ;;  %4698 = vmatprep.subr.mxu1 %v4637_v7  ;;  %v4656_v42 = vld [vmem:[#allocation9 + $0x120] sm:$0xff] }
 0x8cf   :  { %4762 = vmatpush1.msra.mxu0 %v4644_v14  ;;  %4699 = vmatpush1.msra.mxu1 %v4636_v26  ;;  %v4654_v14 = vld [vmem:[#allocation9 + $0x110] sm:$0xff] }
 0x8d0   :  { %4763 = vmatprep.subr.mxu0 %v4643_v57  ;;  %4700 = vmatprep.subr.mxu1 %v4635_v1  ;;  %v4652_v57 = vld [vmem:[#allocation9 + $0x100] sm:$0xff] }
 0x8d1   :  { %4764 = vmatpush1.msra.mxu0 %v4642_v60  ;;  %4701 = vmatpush1.msra.mxu1 %v4634_v29  ;;  %v3985_v60 = vpop.f32.mrf.mxu1 }
 0x8d2   :  { %4765 = vmatprep.subr.mxu0 %v4641_v52  ;;  %4702 = vmatprep.subr.mxu1 %v4633_v30 }
 0x8d3   :  { %4766 = vmatpush1.msra.mxu0 %v4640_v41  ;;  %4703 = vmatpush1.msra.mxu1 %v4632_v16  ;;  %v3987_v52 = vpop.f32.mrf.mxu1 }
 0x8d4   :  { %4767 = vmatprep.subr.mxu0 %v4639_v23  ;;  %4704 = vmatprep.subr.mxu1 %v4631_v15 }
 0x8d5   :  { %4768 = vmatpush1.msra.mxu0 %v4638_v25  ;;  %4705 = vmatpush1.msra.mxu1 %v4630_v37  ;;  %v3989_v41 = vpop.f32.mrf.mxu1 }
 0x8d6   :  { %4769 = vmatprep.subr.mxu0 %v4637_v7  ;;  %4706 = vmatprep.subr.mxu1 %v4629_v5 }
 0x8d7   :  { %4770 = vmatpush1.msra.mxu0 %v4636_v26  ;;  %4707 = vmatpush1.msra.mxu1 %v4628_v46  ;;  %v3984_v26 = vadd.f32 %v3983_v19, %v10706_v63  ;;  %v8927_v19 = vld [vmem:[#allocation13 + $0x70] ss:$8 sps:$4 sm:$0xff]  }
 0x8d8   :  { %4771 = vmatprep.subr.mxu0 %v4635_v1  ;;  %4708 = vmatprep.subr.mxu1 %v4627_v12  ;;  %v3986_v1 = vadd.f32 %v3985_v60, %v10708_v61  ;;  %v8929_v60 = vld [vmem:[#allocation13 + $0x74] ss:$8 sps:$4 sm:$0xff]  }
 0x8d9   :  { %4772 = vmatpush1.msra.mxu0 %v4634_v29  ;;  %4709 = vmatpush1.msra.mxu1 %v4626_v8 }
 0x8da   :  { %4773 = vmatprep.subr.mxu0 %v4633_v30  ;;  %4710 = vmatprep.subr.mxu1 %v4625_v10  ;;  %v3988_v30 = vadd.f32 %v3987_v52, %v10710_v55 }
 0x8db   :  { %4774 = vmatpush1.msra.mxu0 %v4632_v16  ;;  %4711 = vmatpush1.msra.mxu1 %v4624_v47 }
 0x8dc   :  { %4775 = vmatprep.subr.mxu0 %v4631_v15  ;;  %4712 = vmatprep.subr.mxu1 %v4623_v33 }
 0x8dd   :  { %4776 = vmatpush1.msra.mxu0 %v4630_v37  ;;  %4713 = vmatpush1.msra.mxu1 %v4622_v18 }
 0x8de   :  { %4777 = vmatprep.subr.mxu0 %v4629_v5  ;;  %4714 = vmatprep.subr.mxu1 %v4621_v39 }
 0x8df   :  { %4778 = vmatpush1.msra.mxu0 %v4628_v46  ;;  %4715 = vmatpush1.msra.mxu1 %v4620_v3  ;;  %v3990_v46 = vadd.f32 %v3989_v41, %v10712_v59  ;;  %v8932_v41 = vld [vmem:[#allocation13 + $0x64] ss:$8 sps:$4 sm:$0xff]  }
 0x8e0   :  { %4779 = vmatprep.subr.mxu0 %v4627_v12  ;;  %4716 = vmatprep.subr.mxu1 %v4683_v34 }
 0x8e1   :  { %4780 = vmatpush1.msra.mxu0 %v4626_v8  ;;  %4717 = vmatpush2.msra.mxu1 %v4682_v35 }
 0x8e2   :  { %4781 = vmatprep.subr.mxu0 %v4625_v10  ;;  %4718 = vmatprep.subr.mxu1 %v4681_v11 }
 0x8e3   :  { %4782 = vmatpush1.msra.mxu0 %v4624_v47  ;;  %4719 = vmatpush2.msra.mxu1 %v4680_v36 }
 0x8e4   :  { %4783 = vmatprep.subr.mxu0 %v4623_v33  ;;  %4720 = vmatprep.subr.mxu1 %v4679_v56 }
 0x8e5   :  { %4784 = vmatpush1.msra.mxu0 %v4622_v18  ;;  %4721 = vmatpush2.msra.mxu1 %v4678_v40 }
 0x8e6   :  { %4785 = vmatprep.subr.mxu0 %v4621_v39  ;;  %4722 = vmatprep.subr.mxu1 %v4677_v43 }
 0x8e7   :  { %4786 = vmatpush1.msra.mxu0 %v4620_v3  ;;  %4723 = vmatpush2.msra.mxu1 %v4676_v44 }
 0x8e8   :  { %4787 = vmatprep.subr.mxu0 %v4683_v34  ;;  %4724 = vmatprep.subr.mxu1 %v4675_v45 }
 0x8e9   :  { %4788 = vmatpush2.msra.mxu0 %v4682_v35  ;;  %4725 = vmatpush2.msra.mxu1 %v4674_v49 }
 0x8ea   :  { %4789 = vmatprep.subr.mxu0 %v4681_v11  ;;  %4726 = vmatprep.subr.mxu1 %v4673_v50 }
 0x8eb   :  { %4790 = vmatpush2.msra.mxu0 %v4680_v36  ;;  %4727 = vmatpush2.msra.mxu1 %v4672_v54 }
 0x8ec   :  { %4791 = vmatprep.subr.mxu0 %v4679_v56  ;;  %4728 = vmatprep.subr.mxu1 %v4671_v62 }
 0x8ed   :  { %4792 = vmatpush2.msra.mxu0 %v4678_v40  ;;  %4729 = vmatpush2.msra.mxu1 %v4670_v28 }
 0x8ee   :  { %4793 = vmatprep.subr.mxu0 %v4677_v43  ;;  %4730 = vmatprep.subr.mxu1 %v4669_v20 }
 0x8ef   :  { %4794 = vmatpush2.msra.mxu0 %v4676_v44  ;;  %4731 = vmatpush2.msra.mxu1 %v4668_v2 }
 0x8f0   :  { %4795 = vmatprep.subr.mxu0 %v4675_v45  ;;  %4732 = vmatprep.subr.mxu1 %v4667_v48 }
 0x8f1   :  { %4796 = vmatpush2.msra.mxu0 %v4674_v49  ;;  %4733 = vmatpush2.msra.mxu1 %v4666_v22 }
 0x8f2   :  { %4797 = vmatprep.subr.mxu0 %v4673_v50  ;;  %4734 = vmatprep.subr.mxu1 %v4665_v9 }
 0x8f3   :  { %4798 = vmatpush2.msra.mxu0 %v4672_v54  ;;  %4735 = vmatpush2.msra.mxu1 %v4664_v27 }
 0x8f4   :  { %4799 = vmatprep.subr.mxu0 %v4671_v62  ;;  %4736 = vmatprep.subr.mxu1 %v4663_v58 }
 0x8f5   :  { %4800 = vmatpush2.msra.mxu0 %v4670_v28  ;;  %4737 = vmatpush2.msra.mxu1 %v4662_v21 }
 0x8f6   :  { %4801 = vmatprep.subr.mxu0 %v4669_v20  ;;  %4738 = vmatprep.subr.mxu1 %v4661_v24 }
 0x8f7   :  { %4802 = vmatpush2.msra.mxu0 %v4668_v2  ;;  %4739 = vmatpush2.msra.mxu1 %v4660_v4 }
 0x8f8   :  { %4803 = vmatprep.subr.mxu0 %v4667_v48  ;;  %4740 = vmatprep.subr.mxu1 %v4659_v13 }
 0x8f9   :  { %4804 = vmatpush2.msra.mxu0 %v4666_v22  ;;  %4741 = vmatpush2.msra.mxu1 %v4658_v17 }
 0x8fa   :  { %4805 = vmatprep.subr.mxu0 %v4665_v9  ;;  %4742 = vmatprep.subr.mxu1 %v4657_v51 }
 0x8fb   :  { %4806 = vmatpush2.msra.mxu0 %v4664_v27  ;;  %4743 = vmatpush2.msra.mxu1 %v4656_v42 }
 0x8fc   :  { %4807 = vmatprep.subr.mxu0 %v4663_v58  ;;  %4744 = vmatprep.subr.mxu1 %v4655_v53 }
 0x8fd   :  { %4808 = vmatpush2.msra.mxu0 %v4662_v21  ;;  %4745 = vmatpush2.msra.mxu1 %v4654_v14 }
 0x8fe   :  { %4809 = vmatprep.subr.mxu0 %v4661_v24  ;;  %4746 = vmatprep.subr.mxu1 %v4653_v6 }
 0x8ff   :  { %4810 = vmatpush2.msra.mxu0 %v4660_v4  ;;  %4747 = vmatpush2.msra.mxu1 %v4652_v57 }
 0x900   :  { %4811 = vmatprep.subr.mxu0 %v4659_v13 }
 0x901   :  { %4812 = vmatpush2.msra.mxu0 %v4658_v17 }
 0x902   :  { %4813 = vmatprep.subr.mxu0 %v4657_v51 }
 0x903   :  { %4814 = vmatpush2.msra.mxu0 %v4656_v42 }
 0x904   :  { %4815 = vmatprep.subr.mxu0 %v4655_v53 }
 0x905   :  { %4816 = vmatpush2.msra.mxu0 %v4654_v14 }
 0x906   :  { %4817 = vmatprep.subr.mxu0 %v4653_v6 }
 0x907   :  { %4818 = vmatpush2.msra.mxu0 %v4652_v57 }
 0x908   :  { %5438 = vmatprep.subr.bf16.mxu0 %v8929_v60 }
 0x980   :  { %v4275_v23 = vpop.f32.mrf.mxu1 }
 0x981   :  { %v4284_v16 = vadd.f32 %v4275_v23, %v3984_v26  ;;  %v8930_v26 = vld [vmem:[#allocation13 + $0x60] ss:$8 sps:$4 sm:$0xff]  }
 0x982   :  { %v4277_v25 = vpop.f32.mrf.mxu1 }
 0x983   :  { %v4285_v15 = vadd.f32 %v4277_v25, %v3986_v1 }
 0x984   :  { %v4279_v7 = vpop.f32.mrf.mxu1 }
 0x985   :  { %v4286_v12 = vadd.f32 %v4279_v7, %v3988_v30  ;;  %v8935_v30 = vld [vmem:[#allocation13 + $0x54] ss:$8 sps:$4 sm:$0xff]  }
 0x986   :  { %v4281_v37 = vpop.f32.mrf.mxu1 }
 0x987   :  { %v4287_v33 = vadd.f32 %v4281_v37, %v3990_v46 }
 0x988   :  { %v4571_v29 = vpop.f32.mrf.mxu0 }
 0x989   :  { %v10718_v8 = vadd.f32 %v4571_v29, %v4284_v16 }
 0x98a   :  { %v4573_v5 = vpop.f32.mrf.mxu0 }
 0x98b   :  { %v10720_v10 = vadd.f32 %v4573_v5, %v4285_v15  ;;  %v4600_v61 = vmul.f32 %v10718_v8, %v10718_v8  ;;  %v8933_v5 = vld [vmem:[#allocation13 + $0x50] ss:$8 sps:$4 sm:$0xff]  }
 0x98c   :  { %v4575_v47 = vpop.f32.mrf.mxu0 }
 0x98d   :  { %v10722_v18 = vadd.f32 %v4575_v47, %v4286_v12  ;;  %v4601_v3 = vmul.f32 %v10720_v10, %v10720_v10  ;;  %v8938_v12 = vld [vmem:[#allocation13 + $0x44] ss:$8 sps:$4 sm:$0xff]   ;;  %v8936_v47 = vld [vmem:[#allocation13 + $0x40] ss:$8 sps:$4 sm:$0xff]  }
 0x98e   :  { %v4577_v63 = vpop.f32.mrf.mxu0 }
 0x98f   :  { %v4584_v55 = vadd.f32 %v10722_v18, %v10718_v8  ;;  %v4602_v39 = vmul.f32 %v10722_v18, %v10722_v18  ;;  %v10730_v59 = vadd.f32 %v4577_v63, %v4287_v33  ;;  %v8941_v33 = vld [vmem:[#allocation13 + $0x34] ss:$8 sps:$4 sm:$0xff]   ;;  %v8939_v63 = vld [vmem:[#allocation13 + $0x30] ss:$8 sps:$4 sm:$0xff]  }
 0x991   :  { %v4585_v34 = vrot.slane %v4584_v55, 4  ;;  %v4604_v35 = vadd.f32 %v4602_v39, %v4600_v61  ;;  %v4591_v11 = vadd.f32 %v10730_v59, %v10720_v10  ;;  %v4603_v36 = vmul.f32 %v10730_v59, %v10730_v59  ;;  %v8944_v61 = vld [vmem:[#allocation13 + $0x24] ss:$8 sps:$4 sm:$0xff]   ;;  %v8947_v39 = vld [vmem:[#allocation13 + $0x14] ss:$8 sps:$4 sm:$0xff]  }
 0x993   :  { %v4586_v56 = vadd.f32 %v4585_v34, %v4584_v55  ;;  %v4605_v40 = vrot.slane %v4604_v35, 4  ;;  %v4592_v43 = vrot.slane %v4591_v11, 4  ;;  %v4611_v44 = vadd.f32 %v4603_v36, %v4601_v3  ;;  %v8942_v55 = vld [vmem:[#allocation13 + $0x20] ss:$8 sps:$4 sm:$0xff]   ;;  %v8950_v36 = vld [vmem:[#allocation13 + $0x4] ss:$8 sps:$4 sm:$0xff]  }
 0x995   :  { %v4587_v45 = vrot.slane %v4586_v56, 2  ;;  %v4606_v49 = vadd.f32 %v4605_v40, %v4604_v35  ;;  %v4593_v50 = vadd.f32 %v4592_v43, %v4591_v11  ;;  %v4612_v54 = vrot.slane %v4611_v44, 4  ;;  %v8945_v35 = vld [vmem:[#allocation13 + $0x10] ss:$8 sps:$4 sm:$0xff]   ;;  %v4830_v40 = vld [vmem:[#allocation10] sm:$0x3] }
 0x996   :  { %v8948_v43 = vld [vmem:[#allocation13] ss:$8 sps:$4 sm:$0xff]  }
 0x997   :  { %v4588_v62 = vadd.f32 %v4587_v45, %v4586_v56  ;;  %v4607_v28 = vrot.slane %v4606_v49, 2  ;;  %v4594_v20 = vrot.slane %v4593_v50, 2  ;;  %v4613_v2 = vadd.f32 %v4612_v54, %v4611_v44  ;;  %v8953_v45 = vld [vmem:[#allocation13 + $0xf4] ss:$8 sps:$4 sm:$0xff]  }
 0x999   :  { %v4608_v48 = vadd.f32 %v4607_v28, %v4606_v49  ;;  %v4595_v22 = vadd.f32 %v4594_v20, %v4593_v50  ;;  %v4589_v9 = vrot.slane %v4588_v62, 1  ;;  %v4614_v27 = vrot.slane %v4613_v2, 2  ;;  %v8951_v50 = vld [vmem:[#allocation13 + $0xf0] ss:$8 sps:$4 sm:$0xff]   ;;  %v8956_v28 = vld [vmem:[#allocation13 + $0xe4] ss:$8 sps:$4 sm:$0xff]  }
 0x99b   :  { %v4609_v58 = vrot.slane %v4608_v48, 1  ;;  %v4596_v21 = vrot.slane %v4595_v22, 1  ;;  %v4615_v24 = vadd.f32 %v4614_v27, %v4613_v2  ;;  %v4590_v4 = vadd.f32 %v4589_v9, %v4588_v62  ;;  %v8959_v9 = vld [vmem:[#allocation13 + $0xd4] ss:$8 sps:$4 sm:$0xff]  }
 0x99d   :  { %v4597_v13 = vadd.f32 %v4596_v21, %v4595_v22  ;;  %v4616_v17 = vrot.slane %v4615_v24, 1  ;;  %v4610_v51 = vadd.f32 %v4609_v58, %v4608_v48  ;;  %v4598_v14 = vmul.f32 0.0625, %v4590_v4  ;;  %v8954_v48 = vld [vmem:[#allocation13 + $0xe0] ss:$8 sps:$4 sm:$0xff]   ;;  %v4854_v58 = vld [vmem:[#allocation12] sm:$0x3] }
 0x99e   :  { %v8957_v21 = vld [vmem:[#allocation13 + $0xd0] ss:$8 sps:$4 sm:$0xff]   ;;  %v8962_v4 = vld [vmem:[#allocation13 + $0xc4] ss:$8 sps:$4 sm:$0xff]  }
 0x99f   :  { %v4599_v42 = vmul.f32 0.0625, %v4597_v13  ;;  %v4617_v53 = vadd.f32 %v4616_v17, %v4615_v24  ;;  %v4618_v57 = vmul.f32 0.0625, %v4610_v51 }
 0x9a1   :  { %4748 = vmatprep.mubr.f32.mxu1 %v4599_v42  ;;  %v4619_v6 = vmul.f32 0.0625, %v4617_v53  ;;  %v8960_v42 = vld [vmem:[#allocation13 + $0xc0] ss:$8 sps:$4 sm:$0xff]  }
 0x9a2   :  { %4749 = vmatmul.mubr.f32.vlgmr.msra.gmra.mxu1 %v4598_v14 }
 0x9a3   :  { %4819 = vmatprep.mubr.f32.mxu0 %v4619_v6  ;;  %4953 = vmatprep.mubr.bf16.mxu1 %v9395_v0 }
 0x9a4   :  { %4820 = vmatmul.mubr.f32.vlgmr.msra.gmra.mxu0 %v4618_v57 }
 0x9a5   :  { %5439 = vmatpush1.bf16.msra.mxu0 %v8927_v19  ;;  %v8965_v19 = vld [vmem:[#allocation13 + $0xb4] ss:$8 sps:$4 sm:$0xff]  }
 0x9a6   :  { %5440 = vmatprep.subr.bf16.mxu0 %v8932_v41 }
 0x9a9   :  { %5441 = vmatpush1.bf16.msra.mxu0 %v8930_v26 }
 0x9aa   :  { %5442 = vmatprep.subr.bf16.mxu0 %v8935_v30 }
 0x9ad   :  { %5443 = vmatpush1.bf16.msra.mxu0 %v8933_v5  ;;  %v8879_v5 = vld [vmem:[#allocation13 + $0x170] ss:$8 sps:$4 sm:$0xff]  }
 0x9ae   :  { %5444 = vmatprep.subr.bf16.mxu0 %v8938_v12  ;;  %v8884_v12 = vld [vmem:[#allocation13 + $0x164] ss:$8 sps:$4 sm:$0xff]  }
 0x9b1   :  { %5445 = vmatpush1.bf16.msra.mxu0 %v8936_v47  ;;  %v8882_v47 = vld [vmem:[#allocation13 + $0x160] ss:$8 sps:$4 sm:$0xff]  }
 0x9b2   :  { %5446 = vmatprep.subr.bf16.mxu0 %v8941_v33  ;;  %v8887_v33 = vld [vmem:[#allocation13 + $0x154] ss:$8 sps:$4 sm:$0xff]  }
 0x9b5   :  { %5447 = vmatpush1.bf16.msra.mxu0 %v8939_v63  ;;  %v8885_v63 = vld [vmem:[#allocation13 + $0x150] ss:$8 sps:$4 sm:$0xff]  }
 0x9b6   :  { %5448 = vmatprep.subr.bf16.mxu0 %v8944_v61  ;;  %v8890_v61 = vld [vmem:[#allocation13 + $0x144] ss:$8 sps:$4 sm:$0xff]  }
 0x9b9   :  { %5449 = vmatpush1.bf16.msra.mxu0 %v8942_v55  ;;  %v8888_v55 = vld [vmem:[#allocation13 + $0x140] ss:$8 sps:$4 sm:$0xff]  }
 0x9ba   :  { %5450 = vmatprep.subr.bf16.mxu0 %v8947_v39  ;;  %v8893_v39 = vld [vmem:[#allocation13 + $0x134] ss:$8 sps:$4 sm:$0xff]  }
 0x9bd   :  { %5451 = vmatpush1.bf16.msra.mxu0 %v8945_v35  ;;  %v8894_v35 = vld [vmem:[#allocation13 + $0x120] ss:$8 sps:$4 sm:$0xff]  }
 0x9be   :  { %5452 = vmatprep.subr.bf16.mxu0 %v8950_v36  ;;  %v8897_v36 = vld [vmem:[#allocation13 + $0x110] ss:$8 sps:$4 sm:$0xff]  }
 0x9c1   :  { %5453 = vmatpush1.bf16.msra.mxu0 %v8948_v43  ;;  %v8905_v43 = vld [vmem:[#allocation13 + $0x1f4] ss:$8 sps:$4 sm:$0xff]  }
 0x9c2   :  { %5454 = vmatprep.subr.bf16.mxu0 %v8953_v45  ;;  %v8908_v45 = vld [vmem:[#allocation13 + $0x1e4] ss:$8 sps:$4 sm:$0xff]  }
 0x9c5   :  { %5455 = vmatpush2.bf16.msra.mxu0 %v8951_v50  ;;  %v8911_v50 = vld [vmem:[#allocation13 + $0x1d4] ss:$8 sps:$4 sm:$0xff]  }
 0x9c6   :  { %5456 = vmatprep.subr.bf16.mxu0 %v8956_v28  ;;  %v8912_v28 = vld [vmem:[#allocation13 + $0x1c0] ss:$8 sps:$4 sm:$0xff]  }
 0x9c9   :  { %5457 = vmatpush2.bf16.msra.mxu0 %v8954_v48  ;;  %v8920_v48 = vld [vmem:[#allocation13 + $0x1a4] ss:$8 sps:$4 sm:$0xff]  }
 0x9ca   :  { %5458 = vmatprep.subr.bf16.mxu0 %v8959_v9  ;;  %v8923_v9 = vld [vmem:[#allocation13 + $0x194] ss:$8 sps:$4 sm:$0xff]  }
 0x9cd   :  { %5459 = vmatpush2.bf16.msra.mxu0 %v8957_v21  ;;  %v8921_v21 = vld [vmem:[#allocation13 + $0x190] ss:$8 sps:$4 sm:$0xff]  }
 0x9ce   :  { %5460 = vmatprep.subr.bf16.mxu0 %v8962_v4  ;;  %v8971_v4 = vld [vmem:[#allocation13 + $0x94] ss:$8 sps:$4 sm:$0xff]  }
 0x9d1   :  { %5461 = vmatpush2.bf16.msra.mxu0 %v8960_v42  ;;  %v8972_v42 = vld [vmem:[#allocation13 + $0x80] ss:$8 sps:$4 sm:$0xff]  }
 0x9d2   :  { %5462 = vmatprep.subr.bf16.mxu0 %v8965_v19  ;;  %v8975_v19 = vld [vmem:[#allocation13 + $0x270] ss:$8 sps:$4 sm:$0xff]  }
 0xa62   :  { %v4750_v52 = vpop.f32.mrf.mxu1 }
 0xa63   :  { %v4826_v23 = vmul.f32 %v4750_v52, %v4750_v52 }
 0xa64   :  { %v4752_v25 = vpop.f32.mrf.mxu1  ;;  %v4821_v7 = vpop.f32.mrf.mxu0 }
 0xa65   :  { %v4827_v1 = vmul.f32 %v4752_v25, %v4752_v25  ;;  %v4828_v29 = vsub.f32 %v4821_v7, %v4826_v23 }
 0xa66   :  { %v4823_v16 = vpop.f32.mrf.mxu0 }
 0xa67   :  { %v4831_v15 = vadd.f32 1e-05, %v4828_v29  ;;  %v4829_v37 = vsub.f32 %v4823_v16, %v4827_v1 }
 0xa69   :  { %v4832_v46 = vadd.f32 1e-05, %v4829_v37  ;;  %9139 = vrsqrt.f32 %v4831_v15  ;;  %v4916_v15 = vld [vmem:[%s11058_s13] sm:$0xf] }
 0xa6a   :  { %v8881_v37 = vld [vmem:[#allocation13 + $0x174] ss:$8 sps:$4 sm:$0xff]  }
 0xa6b   :  { %9141 = vrsqrt.f32 %v4832_v46  ;;  %v7888_v46 = vld [vmem:[%s11058_s13 + $0x4] sm:$0xf] }
 0xa76   :  { %v9140_v3 = vpop.eup %9139 }
 0xa78   :  { %v9142_v34 = vpop.eup %9141 }
 0xa79   :  { %v4837_v11 = vcombine.low %v9140_v3, %v9142_v34  ;;  %v8891_v3 = vld [vmem:[#allocation13 + $0x130] ss:$8 sps:$4 sm:$0xff]   ;;  %v8896_v34 = vld [vmem:[#allocation13 + $0x124] ss:$8 sps:$4 sm:$0xff]  }
 0xa7b   :  { %v4844_v56 = vrot.slane %v4837_v11, %v10651_v38  ;;  %v8899_v11 = vld [vmem:[#allocation13 + $0x114] ss:$8 sps:$4 sm:$0xff]  }
 0xa7d   :  { %v4851_v44 = vrot.slane %v4844_v56, %v10651_v38  ;;  %v8902_v56 = vld [vmem:[#allocation13 + $0x104] ss:$8 sps:$4 sm:$0xff]  }
 0xa7f   :  { %v4853_v49 = vmul.f32 %v4851_v44, %v4830_v40  ;;  %v8900_v40 = vld [vmem:[#allocation13 + $0x100] ss:$8 sps:$4 sm:$0xff]   ;;  %v8903_v44 = vld [vmem:[#allocation13 + $0x1f0] ss:$8 sps:$4 sm:$0xff]  }
 0xa81   :  { %v4859_v54 = vrot.slane %v4853_v49, %v10658_v31  ;;  %v4863_v62 = vrot.slane %v4853_v49, %v10660_v32  ;;  %v8906_v49 = vld [vmem:[#allocation13 + $0x1e0] ss:$8 sps:$4 sm:$0xff]  }
 0xa83   :  { %v4866_v20 = vmul.f32 %v4859_v54, %v4750_v52  ;;  %v4867_v2 = vmul.f32 %v4863_v62, %v4752_v25  ;;  %v4888_v17 = vmul.f32 %v4863_v62, %v10720_v10  ;;  %v4890_v51 = vmul.f32 %v4863_v62, %v10730_v59  ;;  %v8963_v10 = vld [vmem:[#allocation13 + $0xb0] ss:$8 sps:$4 sm:$0xff]   ;;  %v8914_v62 = vld [vmem:[#allocation13 + $0x1c4] ss:$8 sps:$4 sm:$0xff]  }
 0xa84   :  { %v4887_v14 = vmul.f32 %v4859_v54, %v10718_v8  ;;  %v4889_v6 = vmul.f32 %v4859_v54, %v10722_v18  ;;  %5463 = vmatpush2.bf16.msra.mxu0 %v8963_v10  ;;  %v8909_v54 = vld [vmem:[#allocation13 + $0x1d0] ss:$8 sps:$4 sm:$0xff]   ;;  %v8978_v10 = vld [vmem:[#allocation13 + $0x260] ss:$8 sps:$4 sm:$0xff]  }
 0xa85   :  { %v4870_v22 = vcombine.low %v4866_v20, %v4867_v2  ;;  %v8917_v20 = vld [vmem:[#allocation13 + $0x1b4] ss:$8 sps:$4 sm:$0xff]   ;;  %v8915_v2 = vld [vmem:[#allocation13 + $0x1b0] ss:$8 sps:$4 sm:$0xff]  }
 0xa87   :  { %v4877_v27 = vrot.slane %v4870_v22, %v10651_v38  ;;  %v8918_v22 = vld [vmem:[#allocation13 + $0x1a0] ss:$8 sps:$4 sm:$0xff]  }
 0xa89   :  { %v4884_v24 = vrot.slane %v4877_v27, %v10651_v38  ;;  %v8968_v27 = vld [vmem:[#allocation13 + $0xa4] ss:$8 sps:$4 sm:$0xff]  }
 0xa8a   :  { %5464 = vmatprep.subr.bf16.mxu0 %v8968_v27  ;;  %v9043_v27 = vld [vmem:[#allocation13 + $0x2b4] ss:$8 sps:$4 sm:$0xff]  }
 0xa8b   :  { %v4886_v13 = vsub.f32 %v4854_v58, %v4884_v24  ;;  %v8966_v58 = vld [vmem:[#allocation13 + $0xa0] ss:$8 sps:$4 sm:$0xff]   ;;  %v8926_v24 = vld [vmem:[#allocation13 + $0x184] ss:$8 sps:$4 sm:$0xff]  }
 0xa8c   :  { %5465 = vmatpush2.bf16.msra.mxu0 %v8966_v58  ;;  %v9020_v58 = vld [vmem:[#allocation13 + $0x310] ss:$8 sps:$4 sm:$0xff]  }
 0xa8d   :  { %v4899_v53 = vrot.slane %v4886_v13, %v10660_v32  ;;  %v4895_v57 = vrot.slane %v4886_v13, %v10658_v31  ;;  %v8969_v13 = vld [vmem:[#allocation13 + $0x90] ss:$8 sps:$4 sm:$0xff]   ;;  %5466 = vmatprep.subr.bf16.mxu0 %v8971_v4  ;;  %v9026_v4 = vld [vmem:[#allocation13 + $0x300] ss:$8 sps:$4 sm:$0xff]  }
 0xa8f   :  { %v4903_v60 = vadd.f32 %v4899_v53, %v4888_v17  ;;  %v4905_v52 = vadd.f32 %v4899_v53, %v4890_v51  ;;  %v4902_v41 = vadd.f32 %v4895_v57, %v4887_v14  ;;  %v4904_v23 = vadd.f32 %v4895_v57, %v4889_v6  ;;  %v8924_v17 = vld [vmem:[#allocation13 + $0x180] ss:$8 sps:$4 sm:$0xff]   ;;  %v8974_v51 = vld [vmem:[#allocation13 + $0x84] ss:$8 sps:$4 sm:$0xff]   ;;  %v8977_v53 = vld [vmem:[#allocation13 + $0x274] ss:$8 sps:$4 sm:$0xff]  }
 0xa90   :  { %5467 = vmatpush2.bf16.msra.mxu0 %v8969_v13  ;;  %v9034_v13 = vld [vmem:[#allocation13 + $0x3f4] ss:$8 sps:$4 sm:$0xff]  }
 0xa91   :  { %v4907_v25 = vmul.f32 0.2, %v4903_v60  ;;  %v4909_v59 = vmul.f32 0.2, %v4905_v52  ;;  %v4906_v7 = vmul.f32 0.2, %v4902_v41  ;;  %5468 = vmatprep.subr.bf16.mxu0 %v8974_v51 }
 0xa92   :  { %v4908_v26 = vmul.f32 0.2, %v4904_v23  ;;  %v9040_v51 = vld [vmem:[#allocation13 + $0x3e4] ss:$8 sps:$4 sm:$0xff]  }
 0xa93   :  { %v4911_v1 = vmax.f32 %v4903_v60, %v4907_v25  ;;  %v4913_v29 = vmax.f32 %v4905_v52, %v4909_v59  ;;  %v4910_v8 = vmax.f32 %v4902_v41, %v4906_v7  ;;  %v8980_v41 = vld [vmem:[#allocation13 + $0x264] ss:$8 sps:$4 sm:$0xff]   ;;  %v8983_v59 = vld [vmem:[#allocation13 + $0x254] ss:$8 sps:$4 sm:$0xff]  }
 0xa94   :  { %v4912_v30 = vmax.f32 %v4904_v23, %v4908_v26  ;;  %5469 = vmatpush2.bf16.msra.mxu0 %v8972_v42  ;;  %v9038_v42 = vld [vmem:[#allocation13 + $0x3e0] ss:$8 sps:$4 sm:$0xff]  }
 0xa95   :  { %v10751_v18 = vpack.c.bf16 %v4913_v29, %v4911_v1  ;;  %5720 = vmatprep.subr.bf16.mxu0 %v8977_v53  ;;  %v9046_v53 = vld [vmem:[#allocation13 + $0x3d4] ss:$8 sps:$4 sm:$0xff]  }
 0xa96   :  { %v10753_v16 = vpack.c.bf16 %v4912_v30, %v4910_v8  ;;  %v8981_v8 = vld [vmem:[#allocation13 + $0x250] ss:$8 sps:$4 sm:$0xff]   ;;  %v8989_v30 = vld [vmem:[#allocation13 + $0x244] ss:$8 sps:$4 sm:$0xff]  }
 0xa97   :  { %4935 = vmatprep.subr.bf16.mxu1 %v10751_v18 }
 0xa98   :  { %4936 = vmatpush1.bf16.msra.mxu1 %v10753_v16 }
 0xa99   :  { %5015 = vmatprep.subr.bf16.mxu1 %v10751_v18 }
 0xa9b   :  { %7887 = vmatmul.mubr.msk.bf16.vlgmr.msra.gmra.mxu1 %vm4917_vm2, %v4916_v15 }
 0xa9c   :  { %5016 = vmatpush1.bf16.msra.mxu1 %v10753_v16  ;;  %5033 = vmatprep.mubr.bf16.mxu1 %v9395_v0 }
 0xa9d   :  { %5237 = vmatprep.subr.bf16.mxu1 %v8881_v37  ;;  %v8987_v37 = vld [vmem:[#allocation13 + $0x240] ss:$8 sps:$4 sm:$0xff]  }
 0xaa3   :  { %7889 = vmatmul.mubr.msk.bf16.vlgmr.msra.gmra.mxu1 %vm4917_vm2, %v7888_v46  ;;  %v7954_v46 = vld [vmem:[%s11058_s13 + $0x8] sm:$0xf] }
 0xaa4   :  { %5238 = vmatpush1.bf16.msra.mxu1 %v8879_v5  ;;  %v8995_v5 = vld [vmem:[#allocation13 + $0x234] ss:$8 sps:$4 sm:$0xff]  }
 0xaa5   :  { %5239 = vmatprep.subr.bf16.mxu1 %v8884_v12  ;;  %v8986_v12 = vld [vmem:[#allocation13 + $0x374] ss:$8 sps:$4 sm:$0xff]  }
 0xaa8   :  { %5240 = vmatpush1.bf16.msra.mxu1 %v8882_v47  ;;  %v8993_v47 = vld [vmem:[#allocation13 + $0x230] ss:$8 sps:$4 sm:$0xff]  }
 0xaa9   :  { %5241 = vmatprep.subr.bf16.mxu1 %v8887_v33  ;;  %v9001_v33 = vld [vmem:[#allocation13 + $0x224] ss:$8 sps:$4 sm:$0xff]  }
 0xaac   :  { %5242 = vmatpush1.bf16.msra.mxu1 %v8885_v63  ;;  %v9007_v63 = vld [vmem:[#allocation13 + $0x214] ss:$8 sps:$4 sm:$0xff]  }
 0xaad   :  { %5243 = vmatprep.subr.bf16.mxu1 %v8890_v61  ;;  %v7988_v61 = vld [vmem:[%s11058_s13 + $0xc] sm:$0xf] }
 0xab0   :  { %5244 = vmatpush1.bf16.msra.mxu1 %v8888_v55  ;;  %v8984_v55 = vld [vmem:[#allocation13 + $0x370] ss:$8 sps:$4 sm:$0xff]  }
 0xab1   :  { %5245 = vmatprep.subr.bf16.mxu1 %v8893_v39  ;;  %v8992_v39 = vld [vmem:[#allocation13 + $0x364] ss:$8 sps:$4 sm:$0xff]  }
 0xab4   :  { %5246 = vmatpush1.bf16.msra.mxu1 %v8891_v3  ;;  %v9005_v3 = vld [vmem:[#allocation13 + $0x210] ss:$8 sps:$4 sm:$0xff]  }
 0xab5   :  { %5247 = vmatprep.subr.bf16.mxu1 %v8896_v34  ;;  %v9013_v34 = vld [vmem:[#allocation13 + $0x204] ss:$8 sps:$4 sm:$0xff]  }
 0xab8   :  { %5248 = vmatpush1.bf16.msra.mxu1 %v8894_v35  ;;  %v8998_v35 = vld [vmem:[#allocation13 + $0x354] ss:$8 sps:$4 sm:$0xff]  }
 0xab9   :  { %5249 = vmatprep.subr.bf16.mxu1 %v8899_v11  ;;  %v9011_v11 = vld [vmem:[#allocation13 + $0x200] ss:$8 sps:$4 sm:$0xff]  }
 0xabc   :  { %5250 = vmatpush1.bf16.msra.mxu1 %v8897_v36  ;;  %v9019_v36 = vld [vmem:[#allocation13 + $0x2f4] ss:$8 sps:$4 sm:$0xff]  }
 0xabd   :  { %5251 = vmatprep.subr.bf16.mxu1 %v8902_v56  ;;  %v8996_v56 = vld [vmem:[#allocation13 + $0x350] ss:$8 sps:$4 sm:$0xff]  }
 0xac0   :  { %5252 = vmatpush1.bf16.msra.mxu1 %v8900_v40  ;;  %v9004_v40 = vld [vmem:[#allocation13 + $0x344] ss:$8 sps:$4 sm:$0xff]  }
 0xac1   :  { %5253 = vmatprep.subr.bf16.mxu1 %v8905_v43  ;;  %v9017_v43 = vld [vmem:[#allocation13 + $0x2f0] ss:$8 sps:$4 sm:$0xff]  }
 0xac4   :  { %5254 = vmatpush2.bf16.msra.mxu1 %v8903_v44  ;;  %v9025_v44 = vld [vmem:[#allocation13 + $0x2e4] ss:$8 sps:$4 sm:$0xff]  }
 0xac5   :  { %5255 = vmatprep.subr.bf16.mxu1 %v8908_v45  ;;  %v9002_v45 = vld [vmem:[#allocation13 + $0x340] ss:$8 sps:$4 sm:$0xff]  }
 0xac8   :  { %5256 = vmatpush2.bf16.msra.mxu1 %v8906_v49  ;;  %v9010_v49 = vld [vmem:[#allocation13 + $0x334] ss:$8 sps:$4 sm:$0xff]  }
 0xac9   :  { %5257 = vmatprep.subr.bf16.mxu1 %v8911_v50  ;;  %v9023_v50 = vld [vmem:[#allocation13 + $0x2e0] ss:$8 sps:$4 sm:$0xff]  }
 0xacc   :  { %5258 = vmatpush2.bf16.msra.mxu1 %v8909_v54  ;;  %v9031_v54 = vld [vmem:[#allocation13 + $0x2d4] ss:$8 sps:$4 sm:$0xff]  }
 0xacd   :  { %5259 = vmatprep.subr.bf16.mxu1 %v8914_v62  ;;  %v9008_v62 = vld [vmem:[#allocation13 + $0x330] ss:$8 sps:$4 sm:$0xff]  }
 0xad0   :  { %5260 = vmatpush2.bf16.msra.mxu1 %v8912_v28  ;;  %v9016_v28 = vld [vmem:[#allocation13 + $0x324] ss:$8 sps:$4 sm:$0xff]  }
 0xad1   :  { %5261 = vmatprep.subr.bf16.mxu1 %v8917_v20  ;;  %v9029_v20 = vld [vmem:[#allocation13 + $0x2d0] ss:$8 sps:$4 sm:$0xff]  }
 0xad4   :  { %5262 = vmatpush2.bf16.msra.mxu1 %v8915_v2  ;;  %v9037_v2 = vld [vmem:[#allocation13 + $0x2c4] ss:$8 sps:$4 sm:$0xff]  }
 0xad5   :  { %5263 = vmatprep.subr.bf16.mxu1 %v8920_v48  ;;  %v9014_v48 = vld [vmem:[#allocation13 + $0x320] ss:$8 sps:$4 sm:$0xff]  }
 0xad8   :  { %5264 = vmatpush2.bf16.msra.mxu1 %v8918_v22  ;;  %v9022_v22 = vld [vmem:[#allocation13 + $0x314] ss:$8 sps:$4 sm:$0xff]  }
 0xad9   :  { %5265 = vmatprep.subr.bf16.mxu1 %v8923_v9  ;;  %v9035_v9 = vld [vmem:[#allocation13 + $0x2c0] ss:$8 sps:$4 sm:$0xff]  }
 0xadc   :  { %5266 = vmatpush2.bf16.msra.mxu1 %v8921_v21  ;;  %v9028_v21 = vld [vmem:[#allocation13 + $0x304] ss:$8 sps:$4 sm:$0xff]  }
 0xadd   :  { %5267 = vmatprep.subr.bf16.mxu1 %v8926_v24  ;;  %v9041_v24 = vld [vmem:[#allocation13 + $0x2b0] ss:$8 sps:$4 sm:$0xff]  }
 0xae0   :  { %5268 = vmatpush2.bf16.msra.mxu1 %v8924_v17  ;;  %v9032_v17 = vld [vmem:[#allocation13 + $0x3f0] ss:$8 sps:$4 sm:$0xff]  }
 0xae1   :  { %5498 = vmatprep.subr.bf16.mxu1 %v10751_v18 }
 0xb5b   :  { %v4955_v14 = vpop.f32.mrf.mxu1 }
 0xb5c   :  { %v4962_v60 = vpack.c.bf16 %v4955_v14, %v4955_v14  ;;  %v9044_v14 = vld [vmem:[#allocation13 + $0x3d0] ss:$8 sps:$4 sm:$0xff]  }
 0xb5d   :  { %v4957_v6 = vpop.f32.mrf.mxu1 }
 0xb5e   :  { %v4963_v57 = vpack.c.bf16 %v4957_v6, %v4957_v6  ;;  %v9047_v6 = vld [vmem:[#allocation13 + $0x2a0] ss:$8 sps:$4 sm:$0xff]  }
 0xb5f   :  { %v4959_v52 = vpop.f32.mrf.mxu1 }
 0xb60   :  { %5470 = vmatprep.mubr.bf16.mxu0 %v4963_v57  ;;  %v9049_v57 = vld [vmem:[#allocation13 + $0x2a4] ss:$8 sps:$4 sm:$0xff]   ;;  %v9053_v52 = vld [vmem:[#allocation13 + $0x290] ss:$8 sps:$4 sm:$0xff]  }
 0xb61   :  { %v4960_v23 = vpop.f32.mrf.mxu1  ;;  %5471 = vmatmul.mubr.bf16.vlgmr.msra.gmra.mxu0 %v4962_v60  ;;  %v9052_v60 = vld [vmem:[#allocation13 + $0x3c4] ss:$8 sps:$4 sm:$0xff]  }
 0xb62   :  { %5721 = vmatpush1.bf16.msra.mxu0 %v8975_v19  ;;  %v9050_v19 = vld [vmem:[#allocation13 + $0x3c0] ss:$8 sps:$4 sm:$0xff]   ;;  %v9056_v23 = vld [vmem:[#allocation13 + $0x3b0] ss:$8 sps:$4 sm:$0xff]  }
 0xb63   :  { %v5035_v25 = vpop.f32.mrf.mxu1  ;;  %5722 = vmatprep.subr.bf16.mxu0 %v8980_v41  ;;  %v9055_v41 = vld [vmem:[#allocation13 + $0x294] ss:$8 sps:$4 sm:$0xff]  }
 0xb64   :  { %v5042_v1 = vpack.c.bf16 %v5035_v25, %v5035_v25  ;;  %v9059_v25 = vld [vmem:[#allocation13 + $0x280] ss:$8 sps:$4 sm:$0xff]  }
 0xb65   :  { %v5037_v7 = vpop.f32.mrf.mxu1 }
 0xb66   :  { %v5043_v26 = vpack.c.bf16 %v5037_v7, %v5037_v7  ;;  %5723 = vmatpush1.bf16.msra.mxu0 %v8978_v10  ;;  %v9058_v10 = vld [vmem:[#allocation13 + $0x3b4] ss:$8 sps:$4 sm:$0xff]   ;;  %v9062_v7 = vld [vmem:[#allocation13 + $0x3a0] ss:$8 sps:$4 sm:$0xff]  }
 0xb67   :  { %v5039_v29 = vpop.f32.mrf.mxu1  ;;  %5724 = vmatprep.subr.bf16.mxu0 %v8983_v59  ;;  %v9061_v59 = vld [vmem:[#allocation13 + $0x284] ss:$8 sps:$4 sm:$0xff]  }
 0xb68   :  { %5269 = vmatprep.mubr.bf16.mxu1 %v5043_v26  ;;  %v9064_v26 = vld [vmem:[#allocation13 + $0x3a4] ss:$8 sps:$4 sm:$0xff]   ;;  %v9065_v29 = vld [vmem:[#allocation13 + $0x390] ss:$8 sps:$4 sm:$0xff]  }
 0xb69   :  { %5270 = vmatmul.mubr.bf16.vlgmr.msra.gmra.mxu1 %v5042_v1  ;;  %v5040_v15 = vpop.f32.mrf.mxu1  ;;  %v9067_v1 = vld [vmem:[#allocation13 + $0x394] ss:$8 sps:$4 sm:$0xff]  }
 0xb6a   :  { %5499 = vmatpush1.bf16.msra.mxu1 %v10753_v16  ;;  %5516 = vmatprep.mubr.bf16.mxu1 %v9395_v0  ;;  %v6108_v15 = vld [vmem:[#allocation15 + $0xf8] sm:$0xff] }
 0xb6b   :  { %5782 = vmatprep.subr.bf16.mxu1 %v10751_v18  ;;  %5725 = vmatpush1.bf16.msra.mxu0 %v8981_v8  ;;  %v8999_v18 = vld [vmem:[#allocation13 + $0x220] ss:$8 sps:$4 sm:$0xff]  }
 0xb6c   :  { %5726 = vmatprep.subr.bf16.mxu0 %v8989_v30  ;;  %v9068_v8 = vld [vmem:[#allocation13 + $0x380] ss:$8 sps:$4 sm:$0xff]   ;;  %v9070_v30 = vld [vmem:[#allocation13 + $0x384] ss:$8 sps:$4 sm:$0xff]  }
 0xb6f   :  { %5727 = vmatpush1.bf16.msra.mxu0 %v8987_v37 }
 0xb70   :  { %5728 = vmatprep.subr.bf16.mxu0 %v8995_v5 }
 0xb71   :  { %7955 = vmatmul.mubr.msk.bf16.vlgmr.msra.gmra.mxu1 %vm4917_vm2, %v7954_v46 }
 0xb72   :  { %5783 = vmatpush1.bf16.msra.mxu1 %v10753_v16  ;;  %5800 = vmatprep.mubr.bf16.mxu1 %v9395_v0  ;;  %v8990_v16 = vld [vmem:[#allocation13 + $0x360] ss:$8 sps:$4 sm:$0xff]  }
 0xb73   :  { %6004 = vmatprep.subr.bf16.mxu1 %v8986_v12  ;;  %5729 = vmatpush1.bf16.msra.mxu0 %v8993_v47 }
 0xb74   :  { %5730 = vmatprep.subr.bf16.mxu0 %v9001_v33 }
 0xb77   :  { %5731 = vmatpush1.bf16.msra.mxu0 %v8999_v18 }
 0xb78   :  { %5732 = vmatprep.subr.bf16.mxu0 %v9007_v63 }
 0xb79   :  { %7989 = vmatmul.mubr.msk.bf16.vlgmr.msra.gmra.mxu1 %vm4917_vm2, %v7988_v61 }
 0xb7a   :  { %6005 = vmatpush1.bf16.msra.mxu1 %v8984_v55 }
 0xb7b   :  { %6006 = vmatprep.subr.bf16.mxu1 %v8992_v39  ;;  %5733 = vmatpush1.bf16.msra.mxu0 %v9005_v3 }
 0xb7c   :  { %5734 = vmatprep.subr.bf16.mxu0 %v9013_v34 }
 0xb7e   :  { %6007 = vmatpush1.bf16.msra.mxu1 %v8990_v16 }
 0xb7f   :  { %6008 = vmatprep.subr.bf16.mxu1 %v8998_v35  ;;  %5735 = vmatpush1.bf16.msra.mxu0 %v9011_v11  ;;  %v6107_v11 = vld [vmem:[#allocation15 + $0xf0] sm:$0xff] }
 0xb80   :  { %5736 = vmatprep.subr.bf16.mxu0 %v9019_v36  ;;  %v6106_v36 = vld [vmem:[#allocation15 + $0xe8] sm:$0xff] }
 0xb82   :  { %6009 = vmatpush1.bf16.msra.mxu1 %v8996_v56 }
 0xb83   :  { %6010 = vmatprep.subr.bf16.mxu1 %v9004_v40  ;;  %5737 = vmatpush2.bf16.msra.mxu0 %v9017_v43  ;;  %v6105_v40 = vld [vmem:[#allocation15 + $0xe0] sm:$0xff]  ;;  %v6104_v43 = vld [vmem:[#allocation15 + $0xd8] sm:$0xff] }
 0xb84   :  { %5738 = vmatprep.subr.bf16.mxu0 %v9025_v44 }
 0xb86   :  { %6011 = vmatpush1.bf16.msra.mxu1 %v9002_v45  ;;  %v6103_v45 = vld [vmem:[#allocation15 + $0xd0] sm:$0xff] }
 0xb87   :  { %6012 = vmatprep.subr.bf16.mxu1 %v9010_v49  ;;  %5739 = vmatpush2.bf16.msra.mxu0 %v9023_v50  ;;  %v6102_v49 = vld [vmem:[#allocation15 + $0xc8] sm:$0xff] }
 0xb88   :  { %5740 = vmatprep.subr.bf16.mxu0 %v9031_v54  ;;  %v6101_v54 = vld [vmem:[#allocation15 + $0xc0] sm:$0xff] }
 0xb8a   :  { %6013 = vmatpush1.bf16.msra.mxu1 %v9008_v62 }
 0xb8b   :  { %6014 = vmatprep.subr.bf16.mxu1 %v9016_v28  ;;  %5741 = vmatpush2.bf16.msra.mxu0 %v9029_v20  ;;  %v6100_v28 = vld [vmem:[#allocation15 + $0xb8] sm:$0xff] }
 0xb8c   :  { %5742 = vmatprep.subr.bf16.mxu0 %v9037_v2 }
 0xb8e   :  { %6015 = vmatpush1.bf16.msra.mxu1 %v9014_v48  ;;  %v6099_v48 = vld [vmem:[#allocation15 + $0xb0] sm:$0xff] }
 0xb8f   :  { %6016 = vmatprep.subr.bf16.mxu1 %v9022_v22  ;;  %5743 = vmatpush2.bf16.msra.mxu0 %v9035_v9  ;;  %v6098_v22 = vld [vmem:[#allocation15 + $0xa8] sm:$0xff] }
 0xb90   :  { %5744 = vmatprep.subr.bf16.mxu0 %v9043_v27  ;;  %v6097_v27 = vld [vmem:[#allocation15 + $0xa0] sm:$0xff] }
 0xb92   :  { %6017 = vmatpush1.bf16.msra.mxu1 %v9020_v58  ;;  %v6096_v58 = vld [vmem:[#allocation15 + $0x98] sm:$0xff] }
 0xb93   :  { %6018 = vmatprep.subr.bf16.mxu1 %v9028_v21  ;;  %5745 = vmatpush2.bf16.msra.mxu0 %v9041_v24  ;;  %v6095_v21 = vld [vmem:[#allocation15 + $0x90] sm:$0xff]  ;;  %v6094_v24 = vld [vmem:[#allocation15 + $0x88] sm:$0xff] }
 0xb94   :  { %5746 = vmatprep.subr.bf16.mxu0 %v9049_v57  ;;  %v6085_v57 = vld [vmem:[#allocation15 + $0x40] sm:$0xff] }
 0xb96   :  { %6019 = vmatpush1.bf16.msra.mxu1 %v9026_v4  ;;  %v6093_v4 = vld [vmem:[#allocation15 + $0x80] sm:$0xff] }
 0xb97   :  { %6020 = vmatprep.subr.bf16.mxu1 %v9034_v13  ;;  %5747 = vmatpush2.bf16.msra.mxu0 %v9047_v6  ;;  %v6092_v13 = vld [vmem:[#allocation15 + $0x78] sm:$0xff]  ;;  %v6086_v6 = vld [vmem:[#allocation15 + $0x48] sm:$0xff] }
 0xb98   :  { %5748 = vmatprep.subr.bf16.mxu0 %v9055_v41  ;;  %v6081_v41 = vld [vmem:[#allocation15 + $0x20] sm:$0xff] }
 0xb9a   :  { %6021 = vmatpush2.bf16.msra.mxu1 %v9032_v17  ;;  %v6091_v17 = vld [vmem:[#allocation15 + $0x70] sm:$0xff] }
 0xb9b   :  { %6022 = vmatprep.subr.bf16.mxu1 %v9040_v51  ;;  %5749 = vmatpush2.bf16.msra.mxu0 %v9053_v52  ;;  %v6090_v51 = vld [vmem:[#allocation15 + $0x68] sm:$0xff] }
 0xb9c   :  { %5750 = vmatprep.subr.bf16.mxu0 %v9061_v59  ;;  %v6082_v52 = vld [vmem:[#allocation15 + $0x28] sm:$0xff]  ;;  %v6077_v59 = vld [vmem:[#allocation15] sm:$0xff] }
 0xb9e   :  { %6023 = vmatpush2.bf16.msra.mxu1 %v9038_v42  ;;  %v6089_v42 = vld [vmem:[#allocation15 + $0x60] sm:$0xff] }
 0xb9f   :  { %6024 = vmatprep.subr.bf16.mxu1 %v9046_v53  ;;  %5751 = vmatpush2.bf16.msra.mxu0 %v9059_v25  ;;  %v6088_v53 = vld [vmem:[#allocation15 + $0x58] sm:$0xff]  ;;  %v6078_v25 = vld [vmem:[#allocation15 + $0x8] sm:$0xff] }
 0xba0   :  { %6141 = vmatprep.subr.mxu0 %v6108_v15 }
 0xba2   :  { %6025 = vmatpush2.bf16.msra.mxu1 %v9044_v14  ;;  %v6087_v14 = vld [vmem:[#allocation15 + $0x50] sm:$0xff] }
 0xba3   :  { %6026 = vmatprep.subr.bf16.mxu1 %v9052_v60  ;;  %v6083_v60 = vld [vmem:[#allocation15 + $0x30] sm:$0xff] }
 0xba6   :  { %6027 = vmatpush2.bf16.msra.mxu1 %v9050_v19  ;;  %v6084_v19 = vld [vmem:[#allocation15 + $0x38] sm:$0xff] }
 0xba7   :  { %6028 = vmatprep.subr.bf16.mxu1 %v9058_v10  ;;  %v6079_v10 = vld [vmem:[#allocation15 + $0x10] sm:$0xff] }
 0xbaa   :  { %6029 = vmatpush2.bf16.msra.mxu1 %v9056_v23  ;;  %v6080_v23 = vld [vmem:[#allocation15 + $0x18] sm:$0xff] }
 0xbab   :  { %6030 = vmatprep.subr.bf16.mxu1 %v9064_v26  ;;  %v6139_v26 = vld [vmem:[#allocation15 + $0x1f0] sm:$0xff] }
 0xbae   :  { %6031 = vmatpush2.bf16.msra.mxu1 %v9062_v7  ;;  %v6140_v7 = vld [vmem:[#allocation15 + $0x1f8] sm:$0xff] }
 0xbaf   :  { %6032 = vmatprep.subr.bf16.mxu1 %v9067_v1  ;;  %v6138_v1 = vld [vmem:[#allocation15 + $0x1e8] sm:$0xff] }
 0xbb2   :  { %6033 = vmatpush2.bf16.msra.mxu1 %v9065_v29  ;;  %v6137_v29 = vld [vmem:[#allocation15 + $0x1e0] sm:$0xff] }
 0xbb3   :  { %6034 = vmatprep.subr.bf16.mxu1 %v9070_v30  ;;  %v6135_v30 = vld [vmem:[#allocation15 + $0x1d0] sm:$0xff] }
 0xbb6   :  { %6035 = vmatpush2.bf16.msra.mxu1 %v9068_v8  ;;  %v6136_v8 = vld [vmem:[#allocation15 + $0x1d8] sm:$0xff] }
 0xbb7   :  { %6212 = vmatprep.subr.mxu1 %v6108_v15  ;;  %v6134_v15 = vld [vmem:[#allocation15 + $0x1c8] sm:$0xff] }
 0xc21   :  { %v5472_v37 = vpop.f32.mrf.mxu0 }
 0xc23   :  { %v5474_v5 = vpop.f32.mrf.mxu0 }
 0xc25   :  { %v5476_v46 = vpop.f32.mrf.mxu0 }
 0xc26   :  { %v6131_v46 = vld [vmem:[#allocation15 + $0x1b0] sm:$0xff] }
 0xc27   :  { %v5477_v12 = vpop.f32.mrf.mxu0 }
 0xc28   :  { %v6130_v12 = vld [vmem:[#allocation15 + $0x1a8] sm:$0xff] }
 0xc29   :  { %v5271_v47 = vpop.f32.mrf.mxu1 }
 0xc2a   :  { %v10782_v33 = vadd.f32 %v5472_v37, %v5271_v47  ;;  %v6133_v37 = vld [vmem:[#allocation15 + $0x1c0] sm:$0xff] }
 0xc2b   :  { %v5273_v18 = vpop.f32.mrf.mxu1  ;;  %v6129_v47 = vld [vmem:[#allocation15 + $0x1a0] sm:$0xff] }
 0xc2c   :  { %v10784_v63 = vadd.f32 %v5474_v5, %v5273_v18  ;;  %v6132_v5 = vld [vmem:[#allocation15 + $0x1b8] sm:$0xff] }
 0xc2d   :  { %v5275_v61 = vpop.f32.mrf.mxu1  ;;  %v6128_v18 = vld [vmem:[#allocation15 + $0x198] sm:$0xff] }
 0xc2e   :  { %v6127_v61 = vld [vmem:[#allocation15 + $0x190] sm:$0xff] }
 0xc2f   :  { %v5276_v55 = vpop.f32.mrf.mxu1 }
 0xc30   :  { %v6126_v55 = vld [vmem:[#allocation15 + $0x188] sm:$0xff] }
 0xc31   :  { %v5518_v39 = vpop.f32.mrf.mxu1 }
 0xc32   :  { %v5525_v16 = vpack.c.bf16 %v5518_v39, %v5518_v39  ;;  %v6125_v39 = vld [vmem:[#allocation15 + $0x180] sm:$0xff] }
 0xc33   :  { %v5520_v3 = vpop.f32.mrf.mxu1 }
 0xc34   :  { %v5526_v34 = vpack.c.bf16 %v5520_v3, %v5520_v3  ;;  %v6124_v3 = vld [vmem:[#allocation15 + $0x178] sm:$0xff] }
 0xc35   :  { %v5522_v35 = vpop.f32.mrf.mxu1 }
 0xc36   :  { %5752 = vmatprep.mubr.bf16.mxu0 %v5526_v34  ;;  %v6123_v34 = vld [vmem:[#allocation15 + $0x170] sm:$0xff]  ;;  %v6121_v35 = vld [vmem:[#allocation15 + $0x160] sm:$0xff] }
 0xc37   :  { %v5523_v56 = vpop.f32.mrf.mxu1  ;;  %5753 = vmatmul.mubr.bf16.vlgmr.msra.gmra.mxu0 %v5525_v16  ;;  %v6122_v16 = vld [vmem:[#allocation15 + $0x168] sm:$0xff] }
 0xc38   :  { %6142 = vmatpush1.msra.mxu0 %v6107_v11  ;;  %v6118_v56 = vld [vmem:[#allocation15 + $0x148] sm:$0xff] }
 0xc39   :  { %v5802_v44 = vpop.f32.mrf.mxu1  ;;  %6143 = vmatprep.subr.mxu0 %v6106_v36 }
 0xc3a   :  { %6144 = vmatpush1.msra.mxu0 %v6105_v40  ;;  %v5809_v20 = vpack.c.bf16 %v5802_v44, %v5802_v44  ;;  %v6115_v44 = vld [vmem:[#allocation15 + $0x130] sm:$0xff] }
 0xc3b   :  { %v5804_v50 = vpop.f32.mrf.mxu1  ;;  %6145 = vmatprep.subr.mxu0 %v6104_v43 }
 0xc3c   :  { %v5810_v62 = vpack.c.bf16 %v5804_v50, %v5804_v50  ;;  %6146 = vmatpush1.msra.mxu0 %v6103_v45  ;;  %v6112_v50 = vld [vmem:[#allocation15 + $0x118] sm:$0xff] }
 0xc3d   :  { %v5806_v2 = vpop.f32.mrf.mxu1  ;;  %6147 = vmatprep.subr.mxu0 %v6102_v49 }
 0xc3e   :  { %6036 = vmatprep.mubr.bf16.mxu1 %v5810_v62  ;;  %6148 = vmatpush1.msra.mxu0 %v6101_v54  ;;  %v6110_v62 = vld [vmem:[#allocation15 + $0x108] sm:$0xff] }
 0xc3f   :  { %6037 = vmatmul.mubr.bf16.vlgmr.msra.gmra.mxu1 %v5809_v20  ;;  %v5807_v9 = vpop.f32.mrf.mxu1  ;;  %6149 = vmatprep.subr.mxu0 %v6100_v28 }
 0xc40   :  { %6213 = vmatpush1.msra.mxu1 %v6107_v11  ;;  %6150 = vmatpush1.msra.mxu0 %v6099_v48  ;;  %v6120_v11 = vld [vmem:[#allocation15 + $0x158] sm:$0xff] }
 0xc41   :  { %6214 = vmatprep.subr.mxu1 %v6106_v36  ;;  %6151 = vmatprep.subr.mxu0 %v6098_v22  ;;  %v6119_v36 = vld [vmem:[#allocation15 + $0x150] sm:$0xff] }
 0xc42   :  { %6215 = vmatpush1.msra.mxu1 %v6105_v40  ;;  %6152 = vmatpush1.msra.mxu0 %v6097_v27  ;;  %v6117_v40 = vld [vmem:[#allocation15 + $0x140] sm:$0xff] }
 0xc43   :  { %6216 = vmatprep.subr.mxu1 %v6104_v43  ;;  %6153 = vmatprep.subr.mxu0 %v6096_v58  ;;  %v6116_v43 = vld [vmem:[#allocation15 + $0x138] sm:$0xff] }
 0xc44   :  { %6217 = vmatpush1.msra.mxu1 %v6103_v45  ;;  %6154 = vmatpush1.msra.mxu0 %v6095_v21  ;;  %v6114_v45 = vld [vmem:[#allocation15 + $0x128] sm:$0xff] }
 0xc45   :  { %6218 = vmatprep.subr.mxu1 %v6102_v49  ;;  %6155 = vmatprep.subr.mxu0 %v6094_v24  ;;  %v6113_v49 = vld [vmem:[#allocation15 + $0x120] sm:$0xff] }
 0xc46   :  { %6219 = vmatpush1.msra.mxu1 %v6101_v54  ;;  %6156 = vmatpush1.msra.mxu0 %v6093_v4  ;;  %v6111_v54 = vld [vmem:[#allocation15 + $0x110] sm:$0xff] }
 0xc47   :  { %6220 = vmatprep.subr.mxu1 %v6100_v28  ;;  %6157 = vmatprep.subr.mxu0 %v6092_v13  ;;  %v6109_v28 = vld [vmem:[#allocation15 + $0x100] sm:$0xff] }
 0xc48   :  { %6221 = vmatpush1.msra.mxu1 %v6099_v48  ;;  %6158 = vmatpush1.msra.mxu0 %v6091_v17 }
 0xc49   :  { %6222 = vmatprep.subr.mxu1 %v6098_v22  ;;  %6159 = vmatprep.subr.mxu0 %v6090_v51 }
 0xc4a   :  { %6223 = vmatpush1.msra.mxu1 %v6097_v27  ;;  %6160 = vmatpush1.msra.mxu0 %v6089_v42 }
 0xc4b   :  { %6224 = vmatprep.subr.mxu1 %v6096_v58  ;;  %6161 = vmatprep.subr.mxu0 %v6088_v53 }
 0xc4c   :  { %6225 = vmatpush1.msra.mxu1 %v6095_v21  ;;  %6162 = vmatpush1.msra.mxu0 %v6087_v14 }
 0xc4d   :  { %6226 = vmatprep.subr.mxu1 %v6094_v24  ;;  %6163 = vmatprep.subr.mxu0 %v6086_v6 }
 0xc4e   :  { %6227 = vmatpush1.msra.mxu1 %v6093_v4  ;;  %6164 = vmatpush1.msra.mxu0 %v6085_v57 }
 0xc4f   :  { %6228 = vmatprep.subr.mxu1 %v6092_v13  ;;  %6165 = vmatprep.subr.mxu0 %v6084_v19 }
 0xc50   :  { %6229 = vmatpush1.msra.mxu1 %v6091_v17  ;;  %6166 = vmatpush1.msra.mxu0 %v6083_v60 }
 0xc51   :  { %6230 = vmatprep.subr.mxu1 %v6090_v51  ;;  %6167 = vmatprep.subr.mxu0 %v6082_v52 }
 0xc52   :  { %6231 = vmatpush1.msra.mxu1 %v6089_v42  ;;  %6168 = vmatpush1.msra.mxu0 %v6081_v41 }
 0xc53   :  { %6232 = vmatprep.subr.mxu1 %v6088_v53  ;;  %6169 = vmatprep.subr.mxu0 %v6080_v23 }
 0xc54   :  { %6233 = vmatpush1.msra.mxu1 %v6087_v14  ;;  %6170 = vmatpush1.msra.mxu0 %v6079_v10 }
 0xc55   :  { %6234 = vmatprep.subr.mxu1 %v6086_v6  ;;  %6171 = vmatprep.subr.mxu0 %v6078_v25 }
 0xc56   :  { %6235 = vmatpush1.msra.mxu1 %v6085_v57  ;;  %6172 = vmatpush1.msra.mxu0 %v6077_v59 }
 0xc57   :  { %6236 = vmatprep.subr.mxu1 %v6084_v19  ;;  %6173 = vmatprep.subr.mxu0 %v6140_v7 }
 0xc58   :  { %6237 = vmatpush1.msra.mxu1 %v6083_v60  ;;  %6174 = vmatpush2.msra.mxu0 %v6139_v26 }
 0xc59   :  { %6238 = vmatprep.subr.mxu1 %v6082_v52  ;;  %6175 = vmatprep.subr.mxu0 %v6138_v1 }
 0xc5a   :  { %6239 = vmatpush1.msra.mxu1 %v6081_v41  ;;  %6176 = vmatpush2.msra.mxu0 %v6137_v29 }
 0xc5b   :  { %6240 = vmatprep.subr.mxu1 %v6080_v23  ;;  %6177 = vmatprep.subr.mxu0 %v6136_v8 }
 0xc5c   :  { %6241 = vmatpush1.msra.mxu1 %v6079_v10  ;;  %6178 = vmatpush2.msra.mxu0 %v6135_v30 }
 0xc5d   :  { %6242 = vmatprep.subr.mxu1 %v6078_v25  ;;  %6179 = vmatprep.subr.mxu0 %v6134_v15 }
 0xc5e   :  { %6243 = vmatpush1.msra.mxu1 %v6077_v59  ;;  %6180 = vmatpush2.msra.mxu0 %v6133_v37 }
 0xc5f   :  { %6244 = vmatprep.subr.mxu1 %v6140_v7  ;;  %6181 = vmatprep.subr.mxu0 %v6132_v5 }
 0xc60   :  { %6245 = vmatpush2.msra.mxu1 %v6139_v26  ;;  %6182 = vmatpush2.msra.mxu0 %v6131_v46 }
 0xc61   :  { %6246 = vmatprep.subr.mxu1 %v6138_v1  ;;  %6183 = vmatprep.subr.mxu0 %v6130_v12 }
 0xc62   :  { %6247 = vmatpush2.msra.mxu1 %v6137_v29  ;;  %6184 = vmatpush2.msra.mxu0 %v6129_v47 }
 0xc63   :  { %6248 = vmatprep.subr.mxu1 %v6136_v8  ;;  %6185 = vmatprep.subr.mxu0 %v6128_v18 }
 0xc64   :  { %6249 = vmatpush2.msra.mxu1 %v6135_v30  ;;  %6186 = vmatpush2.msra.mxu0 %v6127_v61 }
 0xc65   :  { %6250 = vmatprep.subr.mxu1 %v6134_v15  ;;  %6187 = vmatprep.subr.mxu0 %v6126_v55 }
 0xc66   :  { %6251 = vmatpush2.msra.mxu1 %v6133_v37  ;;  %6188 = vmatpush2.msra.mxu0 %v6125_v39 }
 0xc67   :  { %6252 = vmatprep.subr.mxu1 %v6132_v5  ;;  %6189 = vmatprep.subr.mxu0 %v6124_v3 }
 0xc68   :  { %6253 = vmatpush2.msra.mxu1 %v6131_v46  ;;  %6190 = vmatpush2.msra.mxu0 %v6123_v34 }
 0xc69   :  { %6254 = vmatprep.subr.mxu1 %v6130_v12  ;;  %6191 = vmatprep.subr.mxu0 %v6122_v16 }
 0xc6a   :  { %6255 = vmatpush2.msra.mxu1 %v6129_v47  ;;  %6192 = vmatpush2.msra.mxu0 %v6121_v35 }
 0xc6b   :  { %6256 = vmatprep.subr.mxu1 %v6128_v18  ;;  %6193 = vmatprep.subr.mxu0 %v6120_v11 }
 0xc6c   :  { %6257 = vmatpush2.msra.mxu1 %v6127_v61  ;;  %6194 = vmatpush2.msra.mxu0 %v6119_v36 }
 0xc6d   :  { %6258 = vmatprep.subr.mxu1 %v6126_v55  ;;  %6195 = vmatprep.subr.mxu0 %v6118_v56  ;;  %v9087_v55 = vld [vmem:[%s11064_s19 + $0x78] sm:$0xff]  }
 0xc6e   :  { %6259 = vmatpush2.msra.mxu1 %v6125_v39  ;;  %6196 = vmatpush2.msra.mxu0 %v6117_v40  ;;  %v9088_v39 = vld [vmem:[%s11064_s19 + $0x38] sm:$0xff]  }
 0xc6f   :  { %6260 = vmatprep.subr.mxu1 %v6124_v3  ;;  %6197 = vmatprep.subr.mxu0 %v6116_v43  ;;  %v9089_v3 = vld [vmem:[%s11064_s19 + $0x70] sm:$0xff]  }
 0xc70   :  { %6261 = vmatpush2.msra.mxu1 %v6123_v34  ;;  %6198 = vmatpush2.msra.mxu0 %v6115_v44  ;;  %v9090_v34 = vld [vmem:[%s11064_s19 + $0x30] sm:$0xff]  }
 0xc71   :  { %6262 = vmatprep.subr.mxu1 %v6122_v16  ;;  %6199 = vmatprep.subr.mxu0 %v6114_v45  ;;  %v9091_v16 = vld [vmem:[%s11064_s19 + $0x68] sm:$0xff]  }
 0xc72   :  { %6263 = vmatpush2.msra.mxu1 %v6121_v35  ;;  %6200 = vmatpush2.msra.mxu0 %v6113_v49  ;;  %v9092_v35 = vld [vmem:[%s11064_s19 + $0x28] sm:$0xff]  }
 0xc73   :  { %6264 = vmatprep.subr.mxu1 %v6120_v11  ;;  %6201 = vmatprep.subr.mxu0 %v6112_v50  ;;  %v9093_v11 = vld [vmem:[%s11064_s19 + $0x60] sm:$0xff]  }
 0xc74   :  { %6265 = vmatpush2.msra.mxu1 %v6119_v36  ;;  %6202 = vmatpush2.msra.mxu0 %v6111_v54  ;;  %v9094_v36 = vld [vmem:[%s11064_s19 + $0x20] sm:$0xff]  }
 0xc75   :  { %6266 = vmatprep.subr.mxu1 %v6118_v56  ;;  %6203 = vmatprep.subr.mxu0 %v6110_v62  ;;  %v9095_v56 = vld [vmem:[%s11064_s19 + $0x58] sm:$0xff]  }
 0xc76   :  { %6267 = vmatpush2.msra.mxu1 %v6117_v40  ;;  %6204 = vmatpush2.msra.mxu0 %v6109_v28  ;;  %v9096_v40 = vld [vmem:[%s11064_s19 + $0x18] sm:$0xff]  }
 0xc77   :  { %6268 = vmatprep.subr.mxu1 %v6116_v43 }
 0xc78   :  { %6269 = vmatpush2.msra.mxu1 %v6115_v44 }
 0xc79   :  { %6270 = vmatprep.subr.mxu1 %v6114_v45 }
 0xc7a   :  { %6271 = vmatpush2.msra.mxu1 %v6113_v49 }
 0xc7b   :  { %6272 = vmatprep.subr.mxu1 %v6112_v50 }
 0xc7c   :  { %6273 = vmatpush2.msra.mxu1 %v6111_v54 }
 0xc7d   :  { %6274 = vmatprep.subr.mxu1 %v6110_v62 }
 0xc7e   :  { %6275 = vmatpush2.msra.mxu1 %v6109_v28 }
 0xc7f   :  { %8215 = vmatprep.subr.bf16.mxu1 %v9087_v55  ;;  %v9083_v55 = vld [vmem:[%s11064_s19 + $0xc8] sm:$0xff]  }
 0xcf7   :  { %v5754_v20 = vpop.f32.mrf.mxu0 }
 0xcf8   :  { %v5761_v9 = vadd.f32 %v5754_v20, %v10782_v33 }
 0xcf9   :  { %v5756_v2 = vpop.f32.mrf.mxu0 }
 0xcfa   :  { %v5762_v58 = vadd.f32 %v5756_v2, %v10784_v63 }
 0xcfb   :  { %v5758_v48 = vpop.f32.mrf.mxu0 }
 0xcfd   :  { %v5759_v22 = vpop.f32.mrf.mxu0 }
 0xcff   :  { %v6038_v27 = vpop.f32.mrf.mxu1 }
 0xd00   :  { %v10788_v21 = vadd.f32 %v6038_v27, %v5761_v9 }
 0xd01   :  { %v6040_v24 = vpop.f32.mrf.mxu1 }
 0xd02   :  { %v6047_v4 = vrot.slane %v10788_v21, 4  ;;  %v6061_v13 = vmul.f32 %v10788_v21, %v10788_v21  ;;  %v10793_v17 = vadd.f32 %v6040_v24, %v5762_v58  ;;  %v6287_v58 = vld [vmem:[%s11061_s16] sm:$0x3] }
 0xd03   :  { %v6042_v51 = vpop.f32.mrf.mxu1 }
 0xd04   :  { %v6048_v42 = vadd.f32 %v6047_v4, %v10788_v21  ;;  %v6063_v53 = vrot.slane %v6061_v13, 4  ;;  %v6053_v14 = vrot.slane %v10793_v17, 4  ;;  %v6062_v33 = vmul.f32 %v10793_v17, %v10793_v17 }
 0xd05   :  { %v6043_v63 = vpop.f32.mrf.mxu1 }
 0xd06   :  { %v6049_v6 = vrot.slane %v6048_v42, 2  ;;  %v6064_v57 = vadd.f32 %v6063_v53, %v6061_v13  ;;  %v6054_v19 = vadd.f32 %v6053_v14, %v10793_v17  ;;  %v6069_v60 = vrot.slane %v6062_v33, 4  ;;  %v6311_v63 = vld [vmem:[#allocation16] sm:$0x3] }
 0xd08   :  { %v6050_v52 = vadd.f32 %v6049_v6, %v6048_v42  ;;  %v6065_v41 = vrot.slane %v6064_v57, 2  ;;  %v6055_v23 = vrot.slane %v6054_v19, 2  ;;  %v6070_v10 = vadd.f32 %v6069_v60, %v6062_v33 }
 0xd0a   :  { %v6051_v25 = vrot.slane %v6050_v52, 1  ;;  %v6066_v59 = vadd.f32 %v6065_v41, %v6064_v57  ;;  %v6056_v7 = vadd.f32 %v6055_v23, %v6054_v19  ;;  %v6071_v26 = vrot.slane %v6070_v10, 2 }
 0xd0c   :  { %v6057_v1 = vrot.slane %v6056_v7, 1  ;;  %v6072_v29 = vadd.f32 %v6071_v26, %v6070_v10  ;;  %v6067_v8 = vrot.slane %v6066_v59, 1  ;;  %v6052_v30 = vadd.f32 %v6051_v25, %v6050_v52 }
 0xd0e   :  { %v6058_v15 = vadd.f32 %v6057_v1, %v6056_v7  ;;  %v6073_v37 = vrot.slane %v6072_v29, 1  ;;  %v6068_v5 = vadd.f32 %v6067_v8, %v6066_v59  ;;  %v6059_v47 = vmul.f32 0.125, %v6052_v30  ;;  %v9073_v8 = vld [vmem:[%s11064_s19 + $0xf0] sm:$0xff]  }
 0xd0f   :  { %v9074_v30 = vld [vmem:[%s11064_s19 + $0xb0] sm:$0xff]  }
 0xd10   :  { %v6060_v46 = vmul.f32 0.125, %v6058_v15  ;;  %v6074_v12 = vadd.f32 %v6073_v37, %v6072_v29  ;;  %v6075_v61 = vmul.f32 0.125, %v6068_v5  ;;  %v9075_v15 = vld [vmem:[%s11064_s19 + $0xe8] sm:$0xff]   ;;  %v9077_v5 = vld [vmem:[%s11064_s19 + $0xe0] sm:$0xff]  }
 0xd11   :  { %v9076_v37 = vld [vmem:[%s11064_s19 + $0xa8] sm:$0xff]  }
 0xd12   :  { %6205 = vmatprep.mubr.f32.mxu0 %v6060_v46  ;;  %v6076_v18 = vmul.f32 0.125, %v6074_v12  ;;  %v9078_v46 = vld [vmem:[%s11064_s19 + $0xa0] sm:$0xff]   ;;  %v9079_v12 = vld [vmem:[%s11064_s19 + $0xd8] sm:$0xff]  }
 0xd13   :  { %6206 = vmatmul.mubr.f32.vlgmr.msra.gmra.mxu0 %v6059_v47  ;;  %v9080_v47 = vld [vmem:[%s11064_s19 + $0x98] sm:$0xff]  }
 0xd14   :  { %6276 = vmatprep.mubr.f32.mxu1 %v6076_v18  ;;  %6409 = vmatprep.mubr.bf16.mxu0 %v9395_v0  ;;  %v9081_v18 = vld [vmem:[%s11064_s19 + $0xd0] sm:$0xff]  }
 0xd15   :  { %6277 = vmatmul.mubr.f32.vlgmr.msra.gmra.mxu1 %v6075_v61  ;;  %v9082_v61 = vld [vmem:[%s11064_s19 + $0x90] sm:$0xff]  }
 0xd16   :  { %8216 = vmatpush3.bf16.msra.mxu1 %v9088_v39  ;;  %v9084_v39 = vld [vmem:[%s11064_s19 + $0x88] sm:$0xff]  }
 0xd17   :  { %8217 = vmatprep.subr.bf16.mxu1 %v9089_v3  ;;  %v9085_v3 = vld [vmem:[%s11064_s19 + $0xc0] sm:$0xff]  }
 0xd1a   :  { %8218 = vmatpush3.bf16.msra.mxu1 %v9090_v34  ;;  %v9086_v34 = vld [vmem:[%s11064_s19 + $0x80] sm:$0xff]  }
 0xd1b   :  { %8219 = vmatprep.subr.bf16.mxu1 %v9091_v16  ;;  %v9097_v16 = vld [vmem:[%s11064_s19 + $0x50] sm:$0xff]  }
 0xd1e   :  { %8220 = vmatpush3.bf16.msra.mxu1 %v9092_v35  ;;  %v9098_v35 = vld [vmem:[%s11064_s19 + $0x10] sm:$0xff]  }
 0xd1f   :  { %8221 = vmatprep.subr.bf16.mxu1 %v9093_v11  ;;  %v9099_v11 = vld [vmem:[%s11064_s19 + $0x48] sm:$0xff]  }
 0xd22   :  { %8222 = vmatpush3.bf16.msra.mxu1 %v9094_v36  ;;  %v9100_v36 = vld [vmem:[%s11064_s19 + $0x8] sm:$0xff]  }
 0xd23   :  { %8223 = vmatprep.subr.bf16.mxu1 %v9095_v56  ;;  %v9101_v56 = vld [vmem:[%s11064_s19 + $0x40] sm:$0xff]  }
 0xd26   :  { %8224 = vmatpush3.bf16.msra.mxu1 %v9096_v40  ;;  %v9102_v40 = vld [vmem:[%s11064_s19] sm:$0xff]  }
 0xd27   :  { %8225 = vmatprep.subr.bf16.mxu1 %v9097_v16 }
 0xd2a   :  { %8226 = vmatpush3.bf16.msra.mxu1 %v9098_v35 }
 0xd2b   :  { %8227 = vmatprep.subr.bf16.mxu1 %v9099_v11 }
 0xd2e   :  { %8228 = vmatpush3.bf16.msra.mxu1 %v9100_v36 }
 0xd2f   :  { %8229 = vmatprep.subr.bf16.mxu1 %v9101_v56 }
 0xd32   :  { %8230 = vmatpush3.bf16.msra.mxu1 %v9102_v40 }
 0xdd3   :  { %v6207_v43 = vpop.f32.mrf.mxu0 }
 0xdd4   :  { %v6283_v44 = vmul.f32 %v6207_v43, %v6207_v43 }
 0xdd5   :  { %v6209_v45 = vpop.f32.mrf.mxu0  ;;  %v6278_v49 = vpop.f32.mrf.mxu1 }
 0xdd6   :  { %v6284_v50 = vmul.f32 %v6209_v45, %v6209_v45  ;;  %v6285_v54 = vsub.f32 %v6278_v49, %v6283_v44 }
 0xdd7   :  { %v6280_v62 = vpop.f32.mrf.mxu1 }
 0xdd8   :  { %v6288_v28 = vadd.f32 1e-05, %v6285_v54  ;;  %v6286_v20 = vsub.f32 %v6280_v62, %v6284_v50  ;;  %v9104_v50 = vld [vmem:[%s11064_s19 + $0x138] sm:$0xff]  }
 0xdda   :  { %v6289_v2 = vadd.f32 1e-05, %v6286_v20  ;;  %9143 = vrsqrt.f32 %v6288_v28  ;;  %v9105_v28 = vld [vmem:[%s11064_s19 + $0x170] sm:$0xff]  }
 0xddc   :  { %9145 = vrsqrt.f32 %v6289_v2  ;;  %v9106_v2 = vld [vmem:[%s11064_s19 + $0x130] sm:$0xff]  }
 0xde7   :  { %v9144_v48 = vpop.eup %9143 }
 0xde9   :  { %v9146_v22 = vpop.eup %9145 }
 0xdea   :  { %v6294_v9 = vcombine.low %v9144_v48, %v9146_v22  ;;  %v9107_v22 = vld [vmem:[%s11064_s19 + $0x168] sm:$0xff]  }
 0xdec   :  { %v6301_v27 = vrot.slane %v6294_v9, %v10651_v38 }
 0xdee   :  { %v6308_v24 = vrot.slane %v6301_v27, %v10651_v38 }
 0xdf0   :  { %v6310_v4 = vmul.f32 %v6308_v24, %v6287_v58 }
 0xdf2   :  { %v6316_v13 = vrot.slane %v6310_v4, %v10658_v31  ;;  %v6320_v51 = vrot.slane %v6310_v4, %v10660_v32  ;;  %v9109_v4 = vld [vmem:[%s11064_s19 + $0x128] sm:$0xff]  }
 0xdf4   :  { %v6323_v42 = vmul.f32 %v6316_v13, %v6207_v43  ;;  %v6324_v53 = vmul.f32 %v6320_v51, %v6209_v45  ;;  %v6345_v19 = vmul.f32 %v6320_v51, %v10793_v17  ;;  %v6344_v52 = vmul.f32 %v6316_v13, %v10788_v21  ;;  %v8024_v21 = vld [vmem:[%s11063_s18 + $0x1] sm:$0x1]  ;;  %v9072_v17 = vld [vmem:[%s11064_s19 + $0xb8] sm:$0xff]  }
 0xdf5   :  { %v9103_v43 = vld [vmem:[%s11064_s19 + $0x178] sm:$0xff]   ;;  %v9111_v13 = vld [vmem:[%s11064_s19 + $0x160] sm:$0xff]  }
 0xdf6   :  { %v6327_v14 = vcombine.low %v6323_v42, %v6324_v53  ;;  %8237 = vmatprep.subr.bf16.mxu1 %v9103_v43  ;;  %v9113_v42 = vld [vmem:[%s11064_s19 + $0x120] sm:$0xff]   ;;  %v9115_v53 = vld [vmem:[%s11064_s19 + $0x158] sm:$0xff]  }
 0xdf8   :  { %v6334_v33 = vrot.slane %v6327_v14, %v10651_v38  ;;  %v8091_v14 = vld [vmem:[%s11063_s18 + $0x2] sm:$0x1] }
 0xdfa   :  { %v6341_v6 = vrot.slane %v6334_v33, %v10651_v38  ;;  %v9108_v33 = vld [vmem:[%s11064_s19 + $0x1f8] sm:$0xff]  }
 0xdfc   :  { %v6343_v57 = vsub.f32 %v6311_v63, %v6341_v6  ;;  %v9117_v63 = vld [vmem:[%s11064_s19 + $0x118] sm:$0xff]   ;;  %v8142_v6 = vld [vmem:[%s11063_s18 + $0x3] sm:$0x1] }
 0xdfe   :  { %v6354_v60 = vrot.slane %v6343_v57, %v10660_v32  ;;  %v6350_v41 = vrot.slane %v6343_v57, %v10658_v31  ;;  %v6365_v31 = vld [vmem:[%s11063_s18] sm:$0x1]  ;;  %v9071_v32 = vld [vmem:[%s11064_s19 + $0xf8] sm:$0xff]  }
 0xdff   :  { %v9110_v57 = vld [vmem:[%s11064_s19 + $0x1b8] sm:$0xff]  }
 0xe00   :  { %v6358_v23 = vadd.f32 %v6354_v60, %v6345_v19  ;;  %v6357_v10 = vadd.f32 %v6350_v41, %v6344_v52  ;;  %v9112_v19 = vld [vmem:[%s11064_s19 + $0x1f0] sm:$0xff]   ;;  %v9116_v60 = vld [vmem:[%s11064_s19 + $0x1e8] sm:$0xff]  }
 0xe01   :  { %v9118_v52 = vld [vmem:[%s11064_s19 + $0x1a8] sm:$0xff]   ;;  %v9119_v41 = vld [vmem:[%s11064_s19 + $0x150] sm:$0xff]  }
 0xe02   :  { %v6360_v25 = vmul.f32 0.2, %v6358_v23  ;;  %v6359_v59 = vmul.f32 0.2, %v6357_v10 }
 0xe04   :  { %v6362_v7 = vmax.f32 %v6358_v23, %v6360_v25  ;;  %v6361_v26 = vmax.f32 %v6357_v10, %v6359_v59  ;;  %v9120_v23 = vld [vmem:[%s11064_s19 + $0x1e0] sm:$0xff]   ;;  %v9121_v10 = vld [vmem:[%s11064_s19 + $0x110] sm:$0xff]   ;;  %v9123_v59 = vld [vmem:[%s11064_s19 + $0x148] sm:$0xff]  }
 0xe05   :  { %v9122_v25 = vld [vmem:[%s11064_s19 + $0x1a0] sm:$0xff]  }
 0xe06   :  { %v10844_v1 = vpack.c.bf16 %v6362_v7, %v6362_v7  ;;  %v6363_v29 = vpack.c.bf16 %v6361_v26, %v6361_v26  ;;  %v9124_v7 = vld [vmem:[%s11064_s19 + $0x1d8] sm:$0xff]   ;;  %v9125_v26 = vld [vmem:[%s11064_s19 + $0x108] sm:$0xff]  }
 0xe08   :  { %8022 = vmatprep.subr.msk.bf16.mxu0 %vm6370_vm3, %v10844_v1  ;;  %v10849_v38 = vsel %vm6370_vm3, %v6363_v29, 0  ;;  %v9127_v29 = vld [vmem:[%s11064_s19 + $0x140] sm:$0xff]  }
 0xe09   :  { %6392 = vmatpush1.bf16.msra.mxu0 %v10849_v38 }
 0xe0a   :  { %8025 = vmatprep.subr.msk.bf16.mxu0 %vm6370_vm3, %v10844_v1 }
 0xe0c   :  { %8023 = vmatmul.mubr.msk.bf16.vlgmr.msra.gmra.mxu0 %vm6366_vm4, %v6365_v31  ;;  %v9129_v31 = vld [vmem:[%s11064_s19 + $0x100] sm:$0xff]  }
 0xe0d   :  { %6472 = vmatpush1.bf16.msra.mxu0 %v10849_v38  ;;  %6489 = vmatprep.mubr.bf16.mxu0 %v9395_v0 }
 0xe0e   :  { %8193 = vmatprep.subr.bf16.mxu0 %v9071_v32  ;;  %v9130_v32 = vld [vmem:[%s11064_s19 + $0x190] sm:$0xff]  }
 0xe14   :  { %8026 = vmatmul.mubr.msk.bf16.vlgmr.msra.gmra.mxu0 %vm6366_vm4, %v8024_v21  ;;  %v9131_v21 = vld [vmem:[%s11064_s19 + $0x1c8] sm:$0xff]  }
 0xe15   :  { %8194 = vmatpush3.bf16.msra.mxu0 %v9072_v17  ;;  %v9132_v17 = vld [vmem:[%s11064_s19 + $0x188] sm:$0xff]  }
 0xe16   :  { %8195 = vmatprep.subr.bf16.mxu0 %v9073_v8  ;;  %v9133_v8 = vld [vmem:[%s11064_s19 + $0x1c0] sm:$0xff]  }
 0xe19   :  { %8196 = vmatpush3.bf16.msra.mxu0 %v9074_v30  ;;  %v9134_v30 = vld [vmem:[%s11064_s19 + $0x180] sm:$0xff]  }
 0xe1a   :  { %8197 = vmatprep.subr.bf16.mxu0 %v9075_v15 }
 0xe1d   :  { %8198 = vmatpush3.bf16.msra.mxu0 %v9076_v37 }
 0xe1e   :  { %8199 = vmatprep.subr.bf16.mxu0 %v9077_v5 }
 0xe21   :  { %8200 = vmatpush3.bf16.msra.mxu0 %v9078_v46 }
 0xe22   :  { %8201 = vmatprep.subr.bf16.mxu0 %v9079_v12 }
 0xe25   :  { %8202 = vmatpush3.bf16.msra.mxu0 %v9080_v47 }
 0xe26   :  { %8203 = vmatprep.subr.bf16.mxu0 %v9081_v18 }
 0xe29   :  { %8204 = vmatpush3.bf16.msra.mxu0 %v9082_v61 }
 0xe2a   :  { %8205 = vmatprep.subr.bf16.mxu0 %v9083_v55 }
 0xe2d   :  { %8206 = vmatpush3.bf16.msra.mxu0 %v9084_v39 }
 0xe2e   :  { %8207 = vmatprep.subr.bf16.mxu0 %v9085_v3 }
 0xe31   :  { %8208 = vmatpush3.bf16.msra.mxu0 %v9086_v34 }
 0xe32   :  { %8092 = vmatprep.subr.msk.bf16.mxu0 %vm6370_vm3, %v10844_v1 }
 0xecc   :  { %v6411_v44 = vpop.f32.mrf.mxu0 }
 0xecd   :  { %v6418_v54 = vpack.c.bf16 %v6411_v44, %v6411_v44 }
 0xece   :  { %v6413_v45 = vpop.f32.mrf.mxu0 }
 0xecf   :  { %v6419_v49 = vpack.c.bf16 %v6413_v45, %v6413_v45 }
 0xed0   :  { %v6415_v62 = vpop.f32.mrf.mxu0 }
 0xed1   :  { %6797 = vmatprep.mubr.bf16.mxu1 %v6419_v49 }
 0xed2   :  { %v6416_v20 = vpop.f32.mrf.mxu0  ;;  %6798 = vmatmul.mubr.bf16.vlgmr.msra.gmra.mxu1 %v6418_v54 }
 0xed3   :  { %8238 = vmatpush3.bf16.msra.mxu1 %v9104_v50 }
 0xed4   :  { %v6491_v48 = vpop.f32.mrf.mxu0  ;;  %8239 = vmatprep.subr.bf16.mxu1 %v9105_v28 }
 0xed5   :  { %v6498_v58 = vpack.c.bf16 %v6491_v48, %v6491_v48 }
 0xed6   :  { %v6493_v9 = vpop.f32.mrf.mxu0 }
 0xed7   :  { %v6499_v27 = vpack.c.bf16 %v6493_v9, %v6493_v9  ;;  %8240 = vmatpush3.bf16.msra.mxu1 %v9106_v2 }
 0xed8   :  { %v6495_v24 = vpop.f32.mrf.mxu0  ;;  %8241 = vmatprep.subr.bf16.mxu1 %v9107_v22 }
 0xed9   :  { %6661 = vmatprep.mubr.bf16.mxu0 %v6499_v27 }
 0xeda   :  { %6662 = vmatmul.mubr.bf16.vlgmr.msra.gmra.mxu0 %v6498_v58  ;;  %v6496_v51 = vpop.f32.mrf.mxu0 }
 0xedb   :  { %6825 = vmatpush1.bf16.msra.mxu0 %v10849_v38  ;;  %6842 = vmatprep.mubr.bf16.mxu0 %v9395_v0 }
 0xedc   :  { %8143 = vmatprep.subr.msk.bf16.mxu0 %vm6370_vm3, %v10844_v1  ;;  %8242 = vmatpush3.bf16.msra.mxu1 %v9109_v4  ;;  %v9126_v1 = vld [vmem:[%s11064_s19 + $0x198] sm:$0xff]  }
 0xedd   :  { %8243 = vmatprep.subr.bf16.mxu1 %v9111_v13 }
 0xee0   :  { %8244 = vmatpush3.bf16.msra.mxu1 %v9113_v42 }
 0xee1   :  { %8245 = vmatprep.subr.bf16.mxu1 %v9115_v53 }
 0xee2   :  { %8093 = vmatmul.mubr.msk.bf16.vlgmr.msra.gmra.mxu0 %vm6366_vm4, %v8091_v14 }
 0xee3   :  { %7043 = vmatpush1.bf16.msra.mxu0 %v10849_v38  ;;  %7060 = vmatprep.mubr.bf16.mxu0 %v9395_v0  ;;  %v9114_v0 = vld [vmem:[%s11064_s19 + $0x1b0] sm:$0xff]  }
 0xee4   :  { %8259 = vmatprep.subr.bf16.mxu0 %v9108_v33  ;;  %8246 = vmatpush3.bf16.msra.mxu1 %v9117_v63  ;;  %v9128_v38 = vld [vmem:[%s11064_s19 + $0x1d0] sm:$0xff]  }
 0xee5   :  { %8247 = vmatprep.subr.bf16.mxu1 %v9119_v41 }
 0xee8   :  { %8248 = vmatpush3.bf16.msra.mxu1 %v9121_v10 }
 0xee9   :  { %8249 = vmatprep.subr.bf16.mxu1 %v9123_v59 }
 0xeea   :  { %8144 = vmatmul.mubr.msk.bf16.vlgmr.msra.gmra.mxu0 %vm6366_vm4, %v8142_v6 }
 0xeeb   :  { %8260 = vmatpush3.bf16.msra.mxu0 %v9110_v57 }
 0xeec   :  { %8261 = vmatprep.subr.bf16.mxu0 %v9112_v19  ;;  %8250 = vmatpush3.bf16.msra.mxu1 %v9125_v26 }
 0xeed   :  { %8251 = vmatprep.subr.bf16.mxu1 %v9127_v29 }
 0xeef   :  { %8262 = vmatpush3.bf16.msra.mxu0 %v9114_v0 }
 0xef0   :  { %8263 = vmatprep.subr.bf16.mxu0 %v9116_v60  ;;  %8252 = vmatpush3.bf16.msra.mxu1 %v9129_v31 }
 0xef3   :  { %8264 = vmatpush3.bf16.msra.mxu0 %v9118_v52 }
 0xef4   :  { %8265 = vmatprep.subr.bf16.mxu0 %v9120_v23 }
 0xef7   :  { %8266 = vmatpush3.bf16.msra.mxu0 %v9122_v25 }
 0xef8   :  { %8267 = vmatprep.subr.bf16.mxu0 %v9124_v7 }
 0xefb   :  { %8268 = vmatpush3.bf16.msra.mxu0 %v9126_v1 }
 0xefc   :  { %8269 = vmatprep.subr.bf16.mxu0 %v9128_v38 }
 0xeff   :  { %8270 = vmatpush3.bf16.msra.mxu0 %v9130_v32 }
 0xf00   :  { %8271 = vmatprep.subr.bf16.mxu0 %v9131_v21 }
 0xf03   :  { %8272 = vmatpush3.bf16.msra.mxu0 %v9132_v17 }
 0xf04   :  { %8273 = vmatprep.subr.bf16.mxu0 %v9133_v8 }
 0xf07   :  { %8274 = vmatpush3.bf16.msra.mxu0 %v9134_v30 }
 0xf92   :  { %v8231_v15 = vpop.f32.mrf.mxu1 }
 0xf94   :  { %v8232_v37 = vpop.f32.mrf.mxu1 }
 0xf95   :  { %v8233_v5 = vadd.f32 %v8232_v37, %v8231_v15 }
 0xf96   :  { %v8234_v46 = vpop.f32.mrf.mxu1 }
 0xf98   :  { %v8235_v12 = vpop.f32.mrf.mxu1 }
 0xf9a   :  { %v8209_v47 = vpop.f32.mrf.mxu0 }
 0xf9c   :  { %v8210_v18 = vpop.f32.mrf.mxu0 }
 0xf9d   :  { %v8211_v61 = vadd.f32 %v8210_v18, %v8209_v47 }
 0xf9e   :  { %v8212_v55 = vpop.f32.mrf.mxu0 }
 0xf9f   :  { %v6800_v39 = vadd.f32 %v8233_v5, %v8211_v61 }
 0xfa0   :  { %v8213_v3 = vpop.f32.mrf.mxu0 }
 0xfa2   :  { %v6844_v34 = vpop.f32.mrf.mxu0 }
 0xfa3   :  { %v6851_v11 = vpack.c.bf16 %v6844_v34, %v6844_v34 }
 0xfa4   :  { %v6846_v16 = vpop.f32.mrf.mxu0 }
 0xfa5   :  { %v6852_v35 = vpack.c.bf16 %v6846_v16, %v6846_v16 }
 0xfa6   :  { %v6848_v36 = vpop.f32.mrf.mxu0 }
 0xfa7   :  { %7014 = vmatprep.mubr.bf16.mxu1 %v6852_v35 }
 0xfa8   :  { %v6849_v56 = vpop.f32.mrf.mxu0  ;;  %7015 = vmatmul.mubr.bf16.vlgmr.msra.gmra.mxu1 %v6851_v11 }
 0xfaa   :  { %v7062_v40 = vpop.f32.mrf.mxu0 }
 0xfab   :  { %v7069_v45 = vpack.c.bf16 %v7062_v40, %v7062_v40 }
 0xfac   :  { %v7064_v43 = vpop.f32.mrf.mxu0 }
 0xfad   :  { %v7070_v44 = vpack.c.bf16 %v7064_v43, %v7064_v43 }
 0xfae   :  { %v7066_v49 = vpop.f32.mrf.mxu0 }
 0xfaf   :  { %7232 = vmatprep.mubr.bf16.mxu0 %v7070_v44 }
 0xfb0   :  { %7233 = vmatmul.mubr.bf16.vlgmr.msra.gmra.mxu0 %v7069_v45  ;;  %v7067_v50 = vpop.f32.mrf.mxu0 }
0x1068   :  { %v8253_v54 = vpop.f32.mrf.mxu1 }
0x106a   :  { %v8254_v62 = vpop.f32.mrf.mxu1 }
0x106b   :  { %v8255_v2 = vadd.f32 %v8254_v62, %v8253_v54 }
0x106c   :  { %v8256_v28 = vpop.f32.mrf.mxu1 }
0x106d   :  { %v7022_v9 = vadd.f32 %v8255_v2, %v6800_v39 }
0x106e   :  { %v8257_v20 = vpop.f32.mrf.mxu1 }
0x1070   :  { %v8275_v48 = vpop.f32.mrf.mxu0 }
0x1072   :  { %v8276_v22 = vpop.f32.mrf.mxu0 }
0x1073   :  { %v8277_v27 = vadd.f32 %v8276_v22, %v8275_v48 }
0x1074   :  { %v8278_v58 = vpop.f32.mrf.mxu0 }
0x1075   :  { %v7240_v24 = vadd.f32 %v8277_v27, %v7022_v9 }
0x1076   :  { %v8279_v4 = vpop.f32.mrf.mxu0 }
0x1077   :  { %v7241_v13 = vsub.f32 0.0, %v7240_v24 }
0x1079   :  { %v7242_v51 = vmul.f32 1.442695, %v7241_v13 }
0x107b   :  { %9147 = vpow2.f32 %v7242_v51 }
0x1088   :  { %v9148_v42 = vpop.eup %9147 }
0x1089   :  { %v7244_v53 = vadd.f32 1.0, %v9148_v42 }
0x108b   :  { %9149 = vrcp.f32 %v7244_v53 }
0x1098   :  { %v9150_v14 = vpop.eup %9149 }
0x1099   :  { %7248 = vst.msk [vmem:[%s11065_s20] sm:$0x3] %vm7247_vm5, %v9150_v14 }
0x109a   :  { %7253 = vsyncpa [#allocation3], 1 }
0x109b   :  { %7254 = vsyncpa [#allocation5], 1 }
0x109c   :  { %7255 = vsyncpa [#allocation8], 1 }
0x109d   :  { %7256 = vsyncpa [#allocation11], 1 }
0x109e   :  { %7257 = vsyncpa [#allocation14], 1 }
0x109f   :  { %7258 = vsyncpa [#allocation17], 1 }

</bundles_post_ra>
